<compile_context>
chip_gen: v5e
topology: v5e:2x2
jax: 0.10.0
libtpu: 0.0.40
codegen_flags: <defaults>
</compile_context>

<pallas_src>
import math

import jax
import jax.numpy as jnp
from jax.experimental import pallas as pl
from jax.experimental.pallas import tpu as pltpu


# ----------------------------------------------------------------------------
# Pallas kernel: matmul (bf16 in, f32 MXU accumulate, bf16 out) + fused
# epilogue:  out = [relu|gate]( A @ B + shift [+ residual] )
# ----------------------------------------------------------------------------
_TM, _TN, _TK = 128, 128, 512   # 128-wide tiles: >=2 parallel steps (v7x
                                # megacore) at M>=256, native v5e MXU width.
_K_WHOLE = 2048                 # single-K fast path up to this reduction size


def _make_kernel(*, relu, has_gate, has_res, split_k):
    """Build a matmul kernel body with a statically specialised epilogue."""

    def epilogue(acc, s_ref, g_ref, r_ref, o_ref):
        out = acc + s_ref[...]                       # per-channel shift (f32)
        if has_res:
            out = out + r_ref[...].astype(jnp.float32)
        if has_gate:                                 # per-channel ReLU gate
            out = jnp.where(g_ref[...] > 0.0, jnp.maximum(out, 0.0), out)
        elif relu:
            out = jnp.maximum(out, 0.0)
        o_ref[...] = out.astype(o_ref.dtype)

    def kernel(*refs):
        if split_k:
            acc_ref = refs[-1]
            refs = refs[:-1]
        a_ref, b_ref, s_ref = refs[0], refs[1], refs[2]
        pos = 3
        g_ref = None
        r_ref = None
        if has_gate:
            g_ref = refs[pos]
            pos += 1
        if has_res:
            r_ref = refs[pos]
            pos += 1
        o_ref = refs[pos]

        if not split_k:
            # Single-K fast path: no accumulator scratch round-trip.
            acc = jnp.dot(a_ref[...], b_ref[...],
                          preferred_element_type=jnp.float32)
            epilogue(acc, s_ref, g_ref, r_ref, o_ref)
        else:
            @pl.when(pl.program_id(2) == 0)
            def _init():
                acc_ref[...] = jnp.zeros_like(acc_ref)

            acc_ref[...] += jnp.dot(a_ref[...], b_ref[...],
                                    preferred_element_type=jnp.float32)

            @pl.when(pl.program_id(2) == pl.num_programs(2) - 1)
            def _fin():
                epilogue(acc_ref[...], s_ref, g_ref, r_ref, o_ref)

    return kernel


def matmul_fused(a, wm, shift, residual=None, *, relu=False, gate=None):
    """out(bf16) = epilogue(a @ wm);  a:(M,K), wm:(K,N) bf16, f32 accumulate."""
    M, K = a.shape
    K2, N = wm.shape
    assert K == K2
    a = a.astype(jnp.bfloat16)
    b = wm.astype(jnp.bfloat16)
    s = shift.astype(jnp.float32).reshape(1, N)

    tm = M if M < _TM else _TM
    tn = N if N < _TN else _TN
    has_gate = gate is not None
    has_res = residual is not None

    flops = 2 * M * N * K
    bytes_accessed = 2 * (M * K + K * N + M * N) + 4 * N
    if has_res:
        bytes_accessed += 2 * M * N
    cost = pl.CostEstimate(flops=flops, transcendentals=0,
                           bytes_accessed=bytes_accessed)

    if K <= _K_WHOLE:
        # ---------------- single-K fast path: 2-D grid, no scratch ---------
        grid = (pl.cdiv(M, tm), pl.cdiv(N, tn))
        in_specs = [pl.BlockSpec((tm, K), lambda i, j: (i, 0)),
                    pl.BlockSpec((K, tn), lambda i, j: (0, j)),
                    pl.BlockSpec((1, tn), lambda i, j: (0, j))]
        args = [a, b, s]
        if has_gate:
            in_specs.append(pl.BlockSpec((1, tn), lambda i, j: (0, j)))
            args.append(gate.astype(jnp.float32).reshape(1, N))
        if has_res:
            in_specs.append(pl.BlockSpec((tm, tn), lambda i, j: (i, j)))
            args.append(residual.astype(jnp.bfloat16))
        return pl.pallas_call(
            _make_kernel(relu=relu, has_gate=has_gate, has_res=has_res,
                         split_k=False),
            grid=grid,
            in_specs=in_specs,
            out_specs=pl.BlockSpec((tm, tn), lambda i, j: (i, j)),
            out_shape=jax.ShapeDtypeStruct((M, N), jnp.bfloat16),
            compiler_params=pltpu.CompilerParams(
                dimension_semantics=("parallel", "parallel")),
            cost_estimate=cost,
        )(*args)

    # ---------------- split-K path (not reached at this net's sizes) -------
    tk = _TK
    Kp = ((K + tk - 1) // tk) * tk
    if Kp != K:                          # zero K-pad keeps the reduction exact
        a = jnp.pad(a, ((0, 0), (0, Kp - K)))
        b = jnp.pad(b, ((0, Kp - K), (0, 0)))
    grid = (pl.cdiv(M, tm), pl.cdiv(N, tn), Kp // tk)
    in_specs = [pl.BlockSpec((tm, tk), lambda i, j, k: (i, k)),
                pl.BlockSpec((tk, tn), lambda i, j, k: (k, j)),
                pl.BlockSpec((1, tn), lambda i, j, k: (0, j))]
    args = [a, b, s]
    if has_gate:
        in_specs.append(pl.BlockSpec((1, tn), lambda i, j, k: (0, j)))
        args.append(gate.astype(jnp.float32).reshape(1, N))
    if has_res:
        # TODO(synk): the residual is only consumed at the last k step; a
        # shallower pipeline / gated fetch would avoid re-streaming it per k.
        in_specs.append(pl.BlockSpec((tm, tn), lambda i, j, k: (i, j)))
        args.append(residual.astype(jnp.bfloat16))
    return pl.pallas_call(
        _make_kernel(relu=relu, has_gate=has_gate, has_res=has_res,
                     split_k=True),
        grid=grid,
        in_specs=in_specs,
        out_specs=pl.BlockSpec((tm, tn), lambda i, j, k: (i, j)),
        out_shape=jax.ShapeDtypeStruct((M, N), jnp.bfloat16),
        scratch_shapes=[pltpu.VMEM((tm, tn), jnp.float32)],
        compiler_params=pltpu.CompilerParams(
            dimension_semantics=("parallel", "parallel", "arbitrary")),
        cost_estimate=cost,
    )(*args)


# ----------------------------------------------------------------------------
# Convolutions (NHWC, channel-last im2col -> fused matmul kernel)
# ----------------------------------------------------------------------------
def conv2d_nhwc(xs, p, residual=None):
    """k x k conv of one or more NHWC inputs; multiple inputs have their
    channels implicitly concatenated (concat folded into the im2col)."""
    if not isinstance(xs, (list, tuple)):
        xs = (xs,)
    kh, kw, stride, pad = p['kh'], p['kw'], p['stride'], p['pad']
    B, H, W, _ = xs[0].shape
    Ho = (H + 2 * pad - kh) // stride + 1
    Wo = (W + 2 * pad - kw) // stride + 1
    M = B * Ho * Wo
    if kh == 1 and kw == 1 and pad == 0:
        cols = [x[:, ::stride, ::stride, :] for x in xs]
    else:
        # TODO(synk): patch extraction (im2col) is still built by XLA in HBM;
        # fusing the kh*kw tap walk into the matmul grid would remove the
        # remaining k*k read amplification (now at least done in bf16).
        xps = [jnp.pad(x, ((0, 0), (pad, pad), (pad, pad), (0, 0))) for x in xs]
        cols = []
        for i in range(kh):
            for j in range(kw):
                for xp in xps:
                    cols.append(xp[:, i:i + stride * (Ho - 1) + 1:stride,
                                      j:j + stride * (Wo - 1) + 1:stride, :])
    a = cols[0] if len(cols) == 1 else jnp.concatenate(cols, axis=-1)
    a = a.reshape(M, -1)
    r = None if residual is None else residual.reshape(M, -1)
    out = matmul_fused(a, p['wm'], p['shift'], r,
                       relu=p['relu'], gate=p.get('gate'))
    return out.reshape(B, Ho, Wo, -1)


def conv_transpose2d_nhwc(x, p):
    """4x4 / stride-2 / pad-1 ConvTranspose2d: one matmul over a shared 3x3
    im2col with the four sub-pixel weight mats fused along N, then a bf16
    pixel-shuffle."""
    B, H, W, C = x.shape
    xp = jnp.pad(x, ((0, 0), (1, 1), (1, 1), (0, 0)))
    cols = [xp[:, t:t + H, u:u + W, :] for t in range(3) for u in range(3)]
    a = jnp.concatenate(cols, axis=-1).reshape(B * H * W, 9 * C)
    y = matmul_fused(a, p['wm'], p['shift'], relu=p['relu'])     # (M, 4*O)
    O = p['out_ch']
    y = y.reshape(B, H, W, 2, 2, O).transpose(0, 1, 3, 2, 4, 5)
    return y.reshape(B, 2 * H, 2 * W, O)


# ----------------------------------------------------------------------------
# Deterministic parameters (fresh-init weights; eval-mode BN folded at build)
# ----------------------------------------------------------------------------
class ParamGen:
    def __init__(self, seed):
        self._key = jax.random.PRNGKey(seed)

    def _next(self):
        self._key, sub = jax.random.split(self._key)
        return sub

    def conv_w(self, o, i, k):
        std = math.sqrt(2.0 / (i * k * k))
        return std * jax.random.normal(self._next(), (o, i, k, k), jnp.float32)

    def convT_w(self, i, o, k):
        std = math.sqrt(2.0 / (i * k * k))
        return std * jax.random.normal(self._next(), (i, o, k, k), jnp.float32)

    def bias(self, c):
        return 0.01 * jax.random.normal(self._next(), (c,), jnp.float32)


def _bn_fold(c, eps=1e-5):
    # fresh BatchNorm2d in .eval(): gamma=1, beta=0, mean=0, var=1
    scale = jnp.full((c,), 1.0 / math.sqrt(1.0 + eps), jnp.float32)
    shift = jnp.zeros((c,), jnp.float32)
    return scale, shift


def build_conv(pg, in_ch, out_ch, k, stride, pad, norm, relu):
    w = pg.conv_w(out_ch, in_ch, k)                       # (O, I, k, k)
    if norm:
        scale, shift = _bn_fold(out_ch)
    else:
        scale = jnp.ones((out_ch,), jnp.float32)
        shift = pg.bias(out_ch)                           # conv bias
    wm = jnp.transpose(w, (2, 3, 1, 0)).reshape(k * k * in_ch, out_ch)
    wm = wm * scale[None, :]
    return {'wm': wm.astype(jnp.bfloat16), 'shift': shift,
            'kh': k, 'kw': k, 'stride': stride, 'pad': pad, 'relu': relu}


def build_deconv(pg, in_ch, out_ch, norm=True, relu=True):
    w = pg.convT_w(in_ch, out_ch, 4)                      # (I, O, 4, 4)
    if norm:
        scale, shift = _bn_fold(out_ch)
    else:
        scale = jnp.ones((out_ch,), jnp.float32)
        shift = pg.bias(out_ch)
    # Sub-pixel decomposition: output row 2i+r uses input rows i-1+a (a=0,1)
    # with kernel taps kmap[r][a] (same for columns).  All four (r,s) outputs
    # read from the same 3x3 neighbourhood of the padded input, so they share
    # one im2col and their weights are fused along N (zeros at unused taps).
    kmap = {0: (3, 1), 1: (2, 0)}
    wm = jnp.zeros((3, 3, in_ch, 4, out_ch), jnp.float32)
    for r in range(2):
        for s in range(2):
            for a in range(2):
                for b in range(2):
                    t, u = r + a, s + b
                    p_, q_ = kmap[r][a], kmap[s][b]
                    wm = wm.at[t, u, :, r * 2 + s, :].set(w[:, :, p_, q_])
    wm = wm.reshape(9 * in_ch, 4 * out_ch) * jnp.tile(scale, 4)[None, :]
    return {'wm': wm.astype(jnp.bfloat16), 'shift': jnp.tile(shift, 4),
            'out_ch': out_ch, 'relu': relu}


# ----------------------------------------------------------------------------
# BasicBlock / UpCC / UBNet
# ----------------------------------------------------------------------------
def build_basicblock(pg, inplanes, planes, stride, with_down):
    conv1 = build_conv(pg, inplanes, planes, 3, stride, 1, True, True)
    # bn2 + residual add + relu2 are fused into conv2's matmul epilogue
    conv2 = build_conv(pg, planes, planes, 3, 1, 1, True, True)
    fused = None
    if with_down:
        # Fuse conv1 + 1x1 downsample along N: the 1x1 weight sits at the
        # centre tap of conv1's 3x3 im2col; a per-channel ReLU gate applies
        # ReLU to the conv1 half only (the identity branch stays linear).
        down = build_conv(pg, inplanes, planes, 1, stride, 0, True, False)
        wd = jnp.zeros((9 * inplanes, planes), jnp.bfloat16)
        wd = wd.at[4 * inplanes:5 * inplanes, :].set(down['wm'])
        fused = {'wm': jnp.concatenate([conv1['wm'], wd], axis=1),
                 'shift': jnp.concatenate([conv1['shift'], down['shift']]),
                 'gate': jnp.concatenate([jnp.ones((planes,), jnp.float32),
                                          jnp.zeros((planes,), jnp.float32)]),
                 'kh': 3, 'kw': 3, 'stride': stride, 'pad': 1,
                 'relu': False, 'planes': planes}
    return {'conv1': conv1, 'conv2': conv2, 'fused': fused}


def basicblock_fwd(p, x):
    if p['fused'] is not None:
        f = p['fused']
        y = conv2d_nhwc(x, f)                      # (B,Ho,Wo, 2*planes)
        planes = f['planes']
        out, identity = y[..., :planes], y[..., planes:]
    else:
        out = conv2d_nhwc(x, p['conv1'])
        identity = x
    return conv2d_nhwc(out, p['conv2'], residual=identity)


def build_layer(pg, inplanes, planes, blocks, stride):
    with_down = (stride != 1) or (inplanes != planes)
    layers = [build_basicblock(pg, inplanes, planes, stride, with_down)]
    for _ in range(1, blocks):
        layers.append(build_basicblock(pg, planes, planes, 1, False))
    return layers


def build_upcc(pg, in_channels, mid_channels, out_channels):
    return {'upf': build_deconv(pg, in_channels, out_channels,
                                norm=True, relu=True),
            'conv': build_conv(pg, mid_channels + out_channels, out_channels,
                               3, 1, 1, True, True)}


def upcc_fwd(p, x, y):
    up = conv_transpose2d_nhwc(x, p['upf'])
    # torch.cat([up, y], dim=1) is folded into the conv's im2col column order.
    return conv2d_nhwc([up, y], p['conv'])


def build_ubnet(pg, inplanes, dplanes=1, blocknum=2, depth=1):
    # drop_path = 0.0 -> DropPath == Identity
    bc = inplanes // 2
    encoder = [{'pre': build_conv(pg, inplanes + dplanes, bc * 2,
                                  3, 1, 1, True, True),
                'blocks': build_layer(pg, bc * 2, bc * 2, blocknum, 1)}]
    decoder = []
    in_channels = bc * 2
    for _ in range(depth):
        out_channels = min(in_channels * 2, 256)
        encoder.append({'pre': None,
                        'blocks': build_layer(pg, in_channels, out_channels,
                                              blocknum, 2)})
        decoder.append(build_upcc(pg, out_channels, in_channels, in_channels))
        in_channels = out_channels
    return {'encoder': encoder, 'decoder': decoder}


def ubnet_fwd(params, x, d):
    """x: (B, inplanes, H, W) NCHW, d: (B, dplanes, H, W) or None."""
    x = jnp.transpose(x, (0, 2, 3, 1))                    # NCHW -> NHWC
    if d is not None:
        x = jnp.concatenate([x, jnp.transpose(d, (0, 2, 3, 1))], axis=-1)
    x = x.astype(jnp.bfloat16)        # activations stay bf16 end-to-end
    feats = []
    for stage in params['encoder']:
        if stage['pre'] is not None:
            x = conv2d_nhwc(x, stage['pre'])
        for blk in stage['blocks']:
            x = basicblock_fwd(blk, x)
        feats.append(x)
    out = feats[-1]
    for idx in range(len(feats) - 2, -1, -1):
        out = upcc_fwd(params['decoder'][idx], out, feats[idx])
    return jnp.transpose(out, (0, 3, 1, 2))               # NHWC -> NCHW (bf16)


# ----------------------------------------------------------------------------
if __name__ == "__main__":
    B, inplanes, dplanes = 2, 8, 1
    H = W = 16
    blocknum, depth = 2, 2

    pg = ParamGen(0)
    params = build_ubnet(pg, inplanes, dplanes=dplanes,
                         blocknum=blocknum, depth=depth)

    key = jax.random.PRNGKey(0)
    k1, k2 = jax.random.split(key)
    x = jax.random.normal(k1, (B, inplanes, H, W), jnp.float32)
    d = jax.random.uniform(k2, (B, dplanes, H, W), minval=0.1, maxval=5.0)

    fwd = jax.jit(lambda xx, dd: ubnet_fwd(params, xx, dd))
    out = fwd(x, d)
    jax.block_until_ready(out)
    assert out.shape == (B, (inplanes // 2) * 2, H, W), out.shape
    print("KERNEL_OK")
</pallas_src>

<mosaic_0001>
module attributes {stable_mosaic.version = 11 : i64} {
  func.func @kernel(%arg0: i32, %arg1: i32, %arg2: memref<128x81xbf16, #tpu.memory_space<vmem>>, %arg3: memref<81x8xbf16, #tpu.memory_space<vmem>>, %arg4: memref<1x8xf32, #tpu.memory_space<vmem>>, %arg5: memref<128x8xbf16, #tpu.memory_space<vmem>>) attributes {dimension_semantics = [#tpu.dimension_semantics<parallel>, #tpu.dimension_semantics<parallel>], iteration_bounds = array<i64: 4, 1>, scalar_prefetch = 0 : i64, scratch_operands = 0 : i64, tpu.core_type = #tpu.core_type<tc>, window_params = [{transform_indices = @transform_0, window_bounds = array<i64: 128, 81>}, {transform_indices = @transform_1, window_bounds = array<i64: 81, 8>}, {transform_indices = @transform_2, window_bounds = array<i64: 1, 8>}, {transform_indices = @transform_3, window_bounds = array<i64: 128, 8>}]} {
    %c0 = arith.constant 0 : index
    %c0_0 = arith.constant 0 : index
    %0 = vector.load %arg2[%c0, %c0_0] : memref<128x81xbf16, #tpu.memory_space<vmem>>, vector<128x81xbf16>
    %c0_1 = arith.constant 0 : index
    %c0_2 = arith.constant 0 : index
    %1 = vector.load %arg3[%c0_1, %c0_2] : memref<81x8xbf16, #tpu.memory_space<vmem>>, vector<81x8xbf16>
    %cst = arith.constant dense<0.000000e+00> : vector<128x8xf32>
    %2 = tpu.matmul %0, %1, %cst {dimension_numbers = #tpu.dot_dimension_numbers<[1], [0], [0], [1], [0, 0, 1, 1], [], []>} : vector<128x81xbf16>, vector<81x8xbf16>, vector<128x8xf32> -> vector<128x8xf32>
    %c0_3 = arith.constant 0 : index
    %c0_4 = arith.constant 0 : index
    %3 = vector.load %arg4[%c0_3, %c0_4] : memref<1x8xf32, #tpu.memory_space<vmem>>, vector<1x8xf32>
    %4 = vector.broadcast %3 : vector<1x8xf32> to vector<128x8xf32>
    %5 = arith.addf %2, %4 : vector<128x8xf32>
    %cst_5 = arith.constant 0.000000e+00 : f32
    %6 = vector.broadcast %cst_5 : f32 to vector<128x8xf32>
    %7 = arith.maximumf %5, %6 : vector<128x8xf32>
    %8 = arith.truncf %7 : vector<128x8xf32> to vector<128x8xbf16>
    %c0_6 = arith.constant 0 : index
    %c0_7 = arith.constant 0 : index
    %9 = vector.load %arg5[%c0_6, %c0_7] : memref<128x8xbf16, #tpu.memory_space<vmem>>, vector<128x8xbf16>
    tpu.vector_store %arg5[%c0_6, %c0_7], %8 {strides = array<i32>} : memref<128x8xbf16, #tpu.memory_space<vmem>>, vector<128x8xbf16>,
    return
  }
  func.func @transform_0(%arg0: i32, %arg1: i32) -> (i32, i32) {
    %c0_i32 = arith.constant 0 : i32
    %c0_i32_0 = arith.constant 0 : i32
    return %arg0, %c0_i32 : i32, i32
  }
  func.func @transform_1(%arg0: i32, %arg1: i32) -> (i32, i32) {
    %c0_i32 = arith.constant 0 : i32
    %c0_i32_0 = arith.constant 0 : i32
    return %c0_i32, %arg1 : i32, i32
  }
  func.func @transform_2(%arg0: i32, %arg1: i32) -> (i32, i32) {
    %c0_i32 = arith.constant 0 : i32
    %c0_i32_0 = arith.constant 0 : i32
    return %c0_i32, %arg1 : i32, i32
  }
  func.func @transform_3(%arg0: i32, %arg1: i32) -> (i32, i32) {
    %c0_i32 = arith.constant 0 : i32
    return %arg0, %arg1 : i32, i32
  }
}

module attributes {stable_mosaic.version = 11 : i64} {
  func.func @kernel(%arg0: i32, %arg1: i32, %arg2: memref<128x72xbf16, #tpu.memory_space<vmem>>, %arg3: memref<72x8xbf16, #tpu.memory_space<vmem>>, %arg4: memref<1x8xf32, #tpu.memory_space<vmem>>, %arg5: memref<128x8xbf16, #tpu.memory_space<vmem>>) attributes {dimension_semantics = [#tpu.dimension_semantics<parallel>, #tpu.dimension_semantics<parallel>], iteration_bounds = array<i64: 4, 1>, scalar_prefetch = 0 : i64, scratch_operands = 0 : i64, tpu.core_type = #tpu.core_type<tc>, window_params = [{transform_indices = @transform_0, window_bounds = array<i64: 128, 72>}, {transform_indices = @transform_1, window_bounds = array<i64: 72, 8>}, {transform_indices = @transform_2, window_bounds = array<i64: 1, 8>}, {transform_indices = @transform_3, window_bounds = array<i64: 128, 8>}]} {
    %c0 = arith.constant 0 : index
    %c0_0 = arith.constant 0 : index
    %0 = vector.load %arg2[%c0, %c0_0] : memref<128x72xbf16, #tpu.memory_space<vmem>>, vector<128x72xbf16>
    %c0_1 = arith.constant 0 : index
    %c0_2 = arith.constant 0 : index
    %1 = vector.load %arg3[%c0_1, %c0_2] : memref<72x8xbf16, #tpu.memory_space<vmem>>, vector<72x8xbf16>
    %cst = arith.constant dense<0.000000e+00> : vector<128x8xf32>
    %2 = tpu.matmul %0, %1, %cst {dimension_numbers = #tpu.dot_dimension_numbers<[1], [0], [0], [1], [0, 0, 1, 1], [], []>} : vector<128x72xbf16>, vector<72x8xbf16>, vector<128x8xf32> -> vector<128x8xf32>
    %c0_3 = arith.constant 0 : index
    %c0_4 = arith.constant 0 : index
    %3 = vector.load %arg4[%c0_3, %c0_4] : memref<1x8xf32, #tpu.memory_space<vmem>>, vector<1x8xf32>
    %4 = vector.broadcast %3 : vector<1x8xf32> to vector<128x8xf32>
    %5 = arith.addf %2, %4 : vector<128x8xf32>
    %cst_5 = arith.constant 0.000000e+00 : f32
    %6 = vector.broadcast %cst_5 : f32 to vector<128x8xf32>
    %7 = arith.maximumf %5, %6 : vector<128x8xf32>
    %8 = arith.truncf %7 : vector<128x8xf32> to vector<128x8xbf16>
    %c0_6 = arith.constant 0 : index
    %c0_7 = arith.constant 0 : index
    %9 = vector.load %arg5[%c0_6, %c0_7] : memref<128x8xbf16, #tpu.memory_space<vmem>>, vector<128x8xbf16>
    tpu.vector_store %arg5[%c0_6, %c0_7], %8 {strides = array<i32>} : memref<128x8xbf16, #tpu.memory_space<vmem>>, vector<128x8xbf16>,
    return
  }
  func.func @transform_0(%arg0: i32, %arg1: i32) -> (i32, i32) {
    %c0_i32 = arith.constant 0 : i32
    %c0_i32_0 = arith.constant 0 : i32
    return %arg0, %c0_i32 : i32, i32
  }
  func.func @transform_1(%arg0: i32, %arg1: i32) -> (i32, i32) {
    %c0_i32 = arith.constant 0 : i32
    %c0_i32_0 = arith.constant 0 : i32
    return %c0_i32, %arg1 : i32, i32
  }
  func.func @transform_2(%arg0: i32, %arg1: i32) -> (i32, i32) {
    %c0_i32 = arith.constant 0 : i32
    %c0_i32_0 = arith.constant 0 : i32
    return %c0_i32, %arg1 : i32, i32
  }
  func.func @transform_3(%arg0: i32, %arg1: i32) -> (i32, i32) {
    %c0_i32 = arith.constant 0 : i32
    return %arg0, %arg1 : i32, i32
  }
}

module attributes {stable_mosaic.version = 11 : i64} {
  func.func @kernel(%arg0: i32, %arg1: i32, %arg2: memref<128x72xbf16, #tpu.memory_space<vmem>>, %arg3: memref<72x8xbf16, #tpu.memory_space<vmem>>, %arg4: memref<1x8xf32, #tpu.memory_space<vmem>>, %arg5: memref<128x8xbf16, #tpu.memory_space<vmem>>, %arg6: memref<128x8xbf16, #tpu.memory_space<vmem>>) attributes {dimension_semantics = [#tpu.dimension_semantics<parallel>, #tpu.dimension_semantics<parallel>], iteration_bounds = array<i64: 4, 1>, scalar_prefetch = 0 : i64, scratch_operands = 0 : i64, tpu.core_type = #tpu.core_type<tc>, window_params = [{transform_indices = @transform_0, window_bounds = array<i64: 128, 72>}, {transform_indices = @transform_1, window_bounds = array<i64: 72, 8>}, {transform_indices = @transform_2, window_bounds = array<i64: 1, 8>}, {transform_indices = @transform_3, window_bounds = array<i64: 128, 8>}, {transform_indices = @transform_4, window_bounds = array<i64: 128, 8>}]} {
    %c0 = arith.constant 0 : index
    %c0_0 = arith.constant 0 : index
    %0 = vector.load %arg2[%c0, %c0_0] : memref<128x72xbf16, #tpu.memory_space<vmem>>, vector<128x72xbf16>
    %c0_1 = arith.constant 0 : index
    %c0_2 = arith.constant 0 : index
    %1 = vector.load %arg3[%c0_1, %c0_2] : memref<72x8xbf16, #tpu.memory_space<vmem>>, vector<72x8xbf16>
    %cst = arith.constant dense<0.000000e+00> : vector<128x8xf32>
    %2 = tpu.matmul %0, %1, %cst {dimension_numbers = #tpu.dot_dimension_numbers<[1], [0], [0], [1], [0, 0, 1, 1], [], []>} : vector<128x72xbf16>, vector<72x8xbf16>, vector<128x8xf32> -> vector<128x8xf32>
    %c0_3 = arith.constant 0 : index
    %c0_4 = arith.constant 0 : index
    %3 = vector.load %arg4[%c0_3, %c0_4] : memref<1x8xf32, #tpu.memory_space<vmem>>, vector<1x8xf32>
    %4 = vector.broadcast %3 : vector<1x8xf32> to vector<128x8xf32>
    %5 = arith.addf %2, %4 : vector<128x8xf32>
    %c0_5 = arith.constant 0 : index
    %c0_6 = arith.constant 0 : index
    %6 = vector.load %arg5[%c0_5, %c0_6] : memref<128x8xbf16, #tpu.memory_space<vmem>>, vector<128x8xbf16>
    %7 = arith.extf %6 : vector<128x8xbf16> to vector<128x8xf32>
    %8 = arith.addf %5, %7 : vector<128x8xf32>
    %cst_7 = arith.constant 0.000000e+00 : f32
    %9 = vector.broadcast %cst_7 : f32 to vector<128x8xf32>
    %10 = arith.maximumf %8, %9 : vector<128x8xf32>
    %11 = arith.truncf %10 : vector<128x8xf32> to vector<128x8xbf16>
    %c0_8 = arith.constant 0 : index
    %c0_9 = arith.constant 0 : index
    %12 = vector.load %arg6[%c0_8, %c0_9] : memref<128x8xbf16, #tpu.memory_space<vmem>>, vector<128x8xbf16>
    tpu.vector_store %arg6[%c0_8, %c0_9], %11 {strides = array<i32>} : memref<128x8xbf16, #tpu.memory_space<vmem>>, vector<128x8xbf16>,
    return
  }
  func.func @transform_0(%arg0: i32, %arg1: i32) -> (i32, i32) {
    %c0_i32 = arith.constant 0 : i32
    %c0_i32_0 = arith.constant 0 : i32
    return %arg0, %c0_i32 : i32, i32
  }
  func.func @transform_1(%arg0: i32, %arg1: i32) -> (i32, i32) {
    %c0_i32 = arith.constant 0 : i32
    %c0_i32_0 = arith.constant 0 : i32
    return %c0_i32, %arg1 : i32, i32
  }
  func.func @transform_2(%arg0: i32, %arg1: i32) -> (i32, i32) {
    %c0_i32 = arith.constant 0 : i32
    %c0_i32_0 = arith.constant 0 : i32
    return %c0_i32, %arg1 : i32, i32
  }
  func.func @transform_3(%arg0: i32, %arg1: i32) -> (i32, i32) {
    %c0_i32 = arith.constant 0 : i32
    return %arg0, %arg1 : i32, i32
  }
  func.func @transform_4(%arg0: i32, %arg1: i32) -> (i32, i32) {
    %c0_i32 = arith.constant 0 : i32
    return %arg0, %arg1 : i32, i32
  }
}

module attributes {stable_mosaic.version = 11 : i64} {
  func.func @kernel(%arg0: i32, %arg1: i32, %arg2: memref<128x72xbf16, #tpu.memory_space<vmem>>, %arg3: memref<72x32xbf16, #tpu.memory_space<vmem>>, %arg4: memref<1x32xf32, #tpu.memory_space<vmem>>, %arg5: memref<1x32xf32, #tpu.memory_space<vmem>>, %arg6: memref<128x32xbf16, #tpu.memory_space<vmem>>) attributes {dimension_semantics = [#tpu.dimension_semantics<parallel>, #tpu.dimension_semantics<parallel>], iteration_bounds = array<i64: 1, 1>, scalar_prefetch = 0 : i64, scratch_operands = 0 : i64, tpu.core_type = #tpu.core_type<tc>, window_params = [{transform_indices = @transform_0, window_bounds = array<i64: 128, 72>}, {transform_indices = @transform_1, window_bounds = array<i64: 72, 32>}, {transform_indices = @transform_2, window_bounds = array<i64: 1, 32>}, {transform_indices = @transform_3, window_bounds = array<i64: 1, 32>}, {transform_indices = @transform_4, window_bounds = array<i64: 128, 32>}]} {
    %c0 = arith.constant 0 : index
    %c0_0 = arith.constant 0 : index
    %0 = vector.load %arg2[%c0, %c0_0] : memref<128x72xbf16, #tpu.memory_space<vmem>>, vector<128x72xbf16>
    %c0_1 = arith.constant 0 : index
    %c0_2 = arith.constant 0 : index
    %1 = vector.load %arg3[%c0_1, %c0_2] : memref<72x32xbf16, #tpu.memory_space<vmem>>, vector<72x32xbf16>
    %cst = arith.constant dense<0.000000e+00> : vector<128x32xf32>
    %2 = tpu.matmul %0, %1, %cst {dimension_numbers = #tpu.dot_dimension_numbers<[1], [0], [0], [1], [0, 0, 1, 1], [], []>} : vector<128x72xbf16>, vector<72x32xbf16>, vector<128x32xf32> -> vector<128x32xf32>
    %c0_3 = arith.constant 0 : index
    %c0_4 = arith.constant 0 : index
    %3 = vector.load %arg4[%c0_3, %c0_4] : memref<1x32xf32, #tpu.memory_space<vmem>>, vector<1x32xf32>
    %4 = vector.broadcast %3 : vector<1x32xf32> to vector<128x32xf32>
    %5 = arith.addf %2, %4 : vector<128x32xf32>
    %c0_5 = arith.constant 0 : index
    %c0_6 = arith.constant 0 : index
    %6 = vector.load %arg5[%c0_5, %c0_6] : memref<1x32xf32, #tpu.memory_space<vmem>>, vector<1x32xf32>
    %cst_7 = arith.constant 0.000000e+00 : f32
    %7 = vector.broadcast %cst_7 : f32 to vector<1x32xf32>
    %8 = arith.cmpf ogt, %6, %7 : vector<1x32xf32>
    %cst_8 = arith.constant 0.000000e+00 : f32
    %9 = vector.broadcast %cst_8 : f32 to vector<128x32xf32>
    %10 = arith.maximumf %5, %9 : vector<128x32xf32>
    %11 = vector.shape_cast %8 : vector<1x32xi1> to vector<1x32xi1>
    %12 = vector.broadcast %11 : vector<1x32xi1> to vector<128x32xi1>
    %13 = arith.select %12, %10, %5 : vector<128x32xi1>, vector<128x32xf32>
    %14 = arith.truncf %13 : vector<128x32xf32> to vector<128x32xbf16>
    %c0_9 = arith.constant 0 : index
    %c0_10 = arith.constant 0 : index
    %15 = vector.load %arg6[%c0_9, %c0_10] : memref<128x32xbf16, #tpu.memory_space<vmem>>, vector<128x32xbf16>
    tpu.vector_store %arg6[%c0_9, %c0_10], %14 {strides = array<i32>} : memref<128x32xbf16, #tpu.memory_space<vmem>>, vector<128x32xbf16>,
    return
  }
  func.func @transform_0(%arg0: i32, %arg1: i32) -> (i32, i32) {
    %c0_i32 = arith.constant 0 : i32
    %c0_i32_0 = arith.constant 0 : i32
    return %arg0, %c0_i32 : i32, i32
  }
  func.func @transform_1(%arg0: i32, %arg1: i32) -> (i32, i32) {
    %c0_i32 = arith.constant 0 : i32
    %c0_i32_0 = arith.constant 0 : i32
    return %c0_i32, %arg1 : i32, i32
  }
  func.func @transform_2(%arg0: i32, %arg1: i32) -> (i32, i32) {
    %c0_i32 = arith.constant 0 : i32
    %c0_i32_0 = arith.constant 0 : i32
    return %c0_i32, %arg1 : i32, i32
  }
  func.func @transform_3(%arg0: i32, %arg1: i32) -> (i32, i32) {
    %c0_i32 = arith.constant 0 : i32
    %c0_i32_0 = arith.constant 0 : i32
    return %c0_i32, %arg1 : i32, i32
  }
  func.func @transform_4(%arg0: i32, %arg1: i32) -> (i32, i32) {
    %c0_i32 = arith.constant 0 : i32
    return %arg0, %arg1 : i32, i32
  }
}

module attributes {stable_mosaic.version = 11 : i64} {
  func.func @kernel(%arg0: i32, %arg1: i32, %arg2: memref<128x144xbf16, #tpu.memory_space<vmem>>, %arg3: memref<144x16xbf16, #tpu.memory_space<vmem>>, %arg4: memref<1x16xf32, #tpu.memory_space<vmem>>, %arg5: memref<128x16xbf16, #tpu.memory_space<vmem>>, %arg6: memref<128x16xbf16, #tpu.memory_space<vmem>>) attributes {dimension_semantics = [#tpu.dimension_semantics<parallel>, #tpu.dimension_semantics<parallel>], iteration_bounds = array<i64: 1, 1>, scalar_prefetch = 0 : i64, scratch_operands = 0 : i64, tpu.core_type = #tpu.core_type<tc>, window_params = [{transform_indices = @transform_0, window_bounds = array<i64: 128, 144>}, {transform_indices = @transform_1, window_bounds = array<i64: 144, 16>}, {transform_indices = @transform_2, window_bounds = array<i64: 1, 16>}, {transform_indices = @transform_3, window_bounds = array<i64: 128, 16>}, {transform_indices = @transform_4, window_bounds = array<i64: 128, 16>}]} {
    %c0 = arith.constant 0 : index
    %c0_0 = arith.constant 0 : index
    %0 = vector.load %arg2[%c0, %c0_0] : memref<128x144xbf16, #tpu.memory_space<vmem>>, vector<128x144xbf16>
    %c0_1 = arith.constant 0 : index
    %c0_2 = arith.constant 0 : index
    %1 = vector.load %arg3[%c0_1, %c0_2] : memref<144x16xbf16, #tpu.memory_space<vmem>>, vector<144x16xbf16>
    %cst = arith.constant dense<0.000000e+00> : vector<128x16xf32>
    %2 = tpu.matmul %0, %1, %cst {dimension_numbers = #tpu.dot_dimension_numbers<[1], [0], [0], [1], [0, 0, 1, 1], [], []>} : vector<128x144xbf16>, vector<144x16xbf16>, vector<128x16xf32> -> vector<128x16xf32>
    %c0_3 = arith.constant 0 : index
    %c0_4 = arith.constant 0 : index
    %3 = vector.load %arg4[%c0_3, %c0_4] : memref<1x16xf32, #tpu.memory_space<vmem>>, vector<1x16xf32>
    %4 = vector.broadcast %3 : vector<1x16xf32> to vector<128x16xf32>
    %5 = arith.addf %2, %4 : vector<128x16xf32>
    %c0_5 = arith.constant 0 : index
    %c0_6 = arith.constant 0 : index
    %6 = vector.load %arg5[%c0_5, %c0_6] : memref<128x16xbf16, #tpu.memory_space<vmem>>, vector<128x16xbf16>
    %7 = arith.extf %6 : vector<128x16xbf16> to vector<128x16xf32>
    %8 = arith.addf %5, %7 : vector<128x16xf32>
    %cst_7 = arith.constant 0.000000e+00 : f32
    %9 = vector.broadcast %cst_7 : f32 to vector<128x16xf32>
    %10 = arith.maximumf %8, %9 : vector<128x16xf32>
    %11 = arith.truncf %10 : vector<128x16xf32> to vector<128x16xbf16>
    %c0_8 = arith.constant 0 : index
    %c0_9 = arith.constant 0 : index
    %12 = vector.load %arg6[%c0_8, %c0_9] : memref<128x16xbf16, #tpu.memory_space<vmem>>, vector<128x16xbf16>
    tpu.vector_store %arg6[%c0_8, %c0_9], %11 {strides = array<i32>} : memref<128x16xbf16, #tpu.memory_space<vmem>>, vector<128x16xbf16>,
    return
  }
  func.func @transform_0(%arg0: i32, %arg1: i32) -> (i32, i32) {
    %c0_i32 = arith.constant 0 : i32
    %c0_i32_0 = arith.constant 0 : i32
    return %arg0, %c0_i32 : i32, i32
  }
  func.func @transform_1(%arg0: i32, %arg1: i32) -> (i32, i32) {
    %c0_i32 = arith.constant 0 : i32
    %c0_i32_0 = arith.constant 0 : i32
    return %c0_i32, %arg1 : i32, i32
  }
  func.func @transform_2(%arg0: i32, %arg1: i32) -> (i32, i32) {
    %c0_i32 = arith.constant 0 : i32
    %c0_i32_0 = arith.constant 0 : i32
    return %c0_i32, %arg1 : i32, i32
  }
  func.func @transform_3(%arg0: i32, %arg1: i32) -> (i32, i32) {
    %c0_i32 = arith.constant 0 : i32
    return %arg0, %arg1 : i32, i32
  }
  func.func @transform_4(%arg0: i32, %arg1: i32) -> (i32, i32) {
    %c0_i32 = arith.constant 0 : i32
    return %arg0, %arg1 : i32, i32
  }
}

module attributes {stable_mosaic.version = 11 : i64} {
  func.func @kernel(%arg0: i32, %arg1: i32, %arg2: memref<128x144xbf16, #tpu.memory_space<vmem>>, %arg3: memref<144x16xbf16, #tpu.memory_space<vmem>>, %arg4: memref<1x16xf32, #tpu.memory_space<vmem>>, %arg5: memref<128x16xbf16, #tpu.memory_space<vmem>>) attributes {dimension_semantics = [#tpu.dimension_semantics<parallel>, #tpu.dimension_semantics<parallel>], iteration_bounds = array<i64: 1, 1>, scalar_prefetch = 0 : i64, scratch_operands = 0 : i64, tpu.core_type = #tpu.core_type<tc>, window_params = [{transform_indices = @transform_0, window_bounds = array<i64: 128, 144>}, {transform_indices = @transform_1, window_bounds = array<i64: 144, 16>}, {transform_indices = @transform_2, window_bounds = array<i64: 1, 16>}, {transform_indices = @transform_3, window_bounds = array<i64: 128, 16>}]} {
    %c0 = arith.constant 0 : index
    %c0_0 = arith.constant 0 : index
    %0 = vector.load %arg2[%c0, %c0_0] : memref<128x144xbf16, #tpu.memory_space<vmem>>, vector<128x144xbf16>
    %c0_1 = arith.constant 0 : index
    %c0_2 = arith.constant 0 : index
    %1 = vector.load %arg3[%c0_1, %c0_2] : memref<144x16xbf16, #tpu.memory_space<vmem>>, vector<144x16xbf16>
    %cst = arith.constant dense<0.000000e+00> : vector<128x16xf32>
    %2 = tpu.matmul %0, %1, %cst {dimension_numbers = #tpu.dot_dimension_numbers<[1], [0], [0], [1], [0, 0, 1, 1], [], []>} : vector<128x144xbf16>, vector<144x16xbf16>, vector<128x16xf32> -> vector<128x16xf32>
    %c0_3 = arith.constant 0 : index
    %c0_4 = arith.constant 0 : index
    %3 = vector.load %arg4[%c0_3, %c0_4] : memref<1x16xf32, #tpu.memory_space<vmem>>, vector<1x16xf32>
    %4 = vector.broadcast %3 : vector<1x16xf32> to vector<128x16xf32>
    %5 = arith.addf %2, %4 : vector<128x16xf32>
    %cst_5 = arith.constant 0.000000e+00 : f32
    %6 = vector.broadcast %cst_5 : f32 to vector<128x16xf32>
    %7 = arith.maximumf %5, %6 : vector<128x16xf32>
    %8 = arith.truncf %7 : vector<128x16xf32> to vector<128x16xbf16>
    %c0_6 = arith.constant 0 : index
    %c0_7 = arith.constant 0 : index
    %9 = vector.load %arg5[%c0_6, %c0_7] : memref<128x16xbf16, #tpu.memory_space<vmem>>, vector<128x16xbf16>
    tpu.vector_store %arg5[%c0_6, %c0_7], %8 {strides = array<i32>} : memref<128x16xbf16, #tpu.memory_space<vmem>>, vector<128x16xbf16>,
    return
  }
  func.func @transform_0(%arg0: i32, %arg1: i32) -> (i32, i32) {
    %c0_i32 = arith.constant 0 : i32
    %c0_i32_0 = arith.constant 0 : i32
    return %arg0, %c0_i32 : i32, i32
  }
  func.func @transform_1(%arg0: i32, %arg1: i32) -> (i32, i32) {
    %c0_i32 = arith.constant 0 : i32
    %c0_i32_0 = arith.constant 0 : i32
    return %c0_i32, %arg1 : i32, i32
  }
  func.func @transform_2(%arg0: i32, %arg1: i32) -> (i32, i32) {
    %c0_i32 = arith.constant 0 : i32
    %c0_i32_0 = arith.constant 0 : i32
    return %c0_i32, %arg1 : i32, i32
  }
  func.func @transform_3(%arg0: i32, %arg1: i32) -> (i32, i32) {
    %c0_i32 = arith.constant 0 : i32
    return %arg0, %arg1 : i32, i32
  }
}

module attributes {stable_mosaic.version = 11 : i64} {
  func.func @kernel(%arg0: i32, %arg1: i32, %arg2: memref<32x144xbf16, #tpu.memory_space<vmem>>, %arg3: memref<144x64xbf16, #tpu.memory_space<vmem>>, %arg4: memref<1x64xf32, #tpu.memory_space<vmem>>, %arg5: memref<1x64xf32, #tpu.memory_space<vmem>>, %arg6: memref<32x64xbf16, #tpu.memory_space<vmem>>) attributes {dimension_semantics = [#tpu.dimension_semantics<parallel>, #tpu.dimension_semantics<parallel>], iteration_bounds = array<i64: 1, 1>, scalar_prefetch = 0 : i64, scratch_operands = 0 : i64, tpu.core_type = #tpu.core_type<tc>, window_params = [{transform_indices = @transform_0, window_bounds = array<i64: 32, 144>}, {transform_indices = @transform_1, window_bounds = array<i64: 144, 64>}, {transform_indices = @transform_2, window_bounds = array<i64: 1, 64>}, {transform_indices = @transform_3, window_bounds = array<i64: 1, 64>}, {transform_indices = @transform_4, window_bounds = array<i64: 32, 64>}]} {
    %c0 = arith.constant 0 : index
    %c0_0 = arith.constant 0 : index
    %0 = vector.load %arg2[%c0, %c0_0] : memref<32x144xbf16, #tpu.memory_space<vmem>>, vector<32x144xbf16>
    %c0_1 = arith.constant 0 : index
    %c0_2 = arith.constant 0 : index
    %1 = vector.load %arg3[%c0_1, %c0_2] : memref<144x64xbf16, #tpu.memory_space<vmem>>, vector<144x64xbf16>
    %cst = arith.constant dense<0.000000e+00> : vector<32x64xf32>
    %2 = tpu.matmul %0, %1, %cst {dimension_numbers = #tpu.dot_dimension_numbers<[1], [0], [0], [1], [0, 0, 1, 1], [], []>} : vector<32x144xbf16>, vector<144x64xbf16>, vector<32x64xf32> -> vector<32x64xf32>
    %c0_3 = arith.constant 0 : index
    %c0_4 = arith.constant 0 : index
    %3 = vector.load %arg4[%c0_3, %c0_4] : memref<1x64xf32, #tpu.memory_space<vmem>>, vector<1x64xf32>
    %4 = vector.broadcast %3 : vector<1x64xf32> to vector<32x64xf32>
    %5 = arith.addf %2, %4 : vector<32x64xf32>
    %c0_5 = arith.constant 0 : index
    %c0_6 = arith.constant 0 : index
    %6 = vector.load %arg5[%c0_5, %c0_6] : memref<1x64xf32, #tpu.memory_space<vmem>>, vector<1x64xf32>
    %cst_7 = arith.constant 0.000000e+00 : f32
    %7 = vector.broadcast %cst_7 : f32 to vector<1x64xf32>
    %8 = arith.cmpf ogt, %6, %7 : vector<1x64xf32>
    %cst_8 = arith.constant 0.000000e+00 : f32
    %9 = vector.broadcast %cst_8 : f32 to vector<32x64xf32>
    %10 = arith.maximumf %5, %9 : vector<32x64xf32>
    %11 = vector.shape_cast %8 : vector<1x64xi1> to vector<1x64xi1>
    %12 = vector.broadcast %11 : vector<1x64xi1> to vector<32x64xi1>
    %13 = arith.select %12, %10, %5 : vector<32x64xi1>, vector<32x64xf32>
    %14 = arith.truncf %13 : vector<32x64xf32> to vector<32x64xbf16>
    %c0_9 = arith.constant 0 : index
    %c0_10 = arith.constant 0 : index
    %15 = vector.load %arg6[%c0_9, %c0_10] : memref<32x64xbf16, #tpu.memory_space<vmem>>, vector<32x64xbf16>
    tpu.vector_store %arg6[%c0_9, %c0_10], %14 {strides = array<i32>} : memref<32x64xbf16, #tpu.memory_space<vmem>>, vector<32x64xbf16>,
    return
  }
  func.func @transform_0(%arg0: i32, %arg1: i32) -> (i32, i32) {
    %c0_i32 = arith.constant 0 : i32
    %c0_i32_0 = arith.constant 0 : i32
    return %arg0, %c0_i32 : i32, i32
  }
  func.func @transform_1(%arg0: i32, %arg1: i32) -> (i32, i32) {
    %c0_i32 = arith.constant 0 : i32
    %c0_i32_0 = arith.constant 0 : i32
    return %c0_i32, %arg1 : i32, i32
  }
  func.func @transform_2(%arg0: i32, %arg1: i32) -> (i32, i32) {
    %c0_i32 = arith.constant 0 : i32
    %c0_i32_0 = arith.constant 0 : i32
    return %c0_i32, %arg1 : i32, i32
  }
  func.func @transform_3(%arg0: i32, %arg1: i32) -> (i32, i32) {
    %c0_i32 = arith.constant 0 : i32
    %c0_i32_0 = arith.constant 0 : i32
    return %c0_i32, %arg1 : i32, i32
  }
  func.func @transform_4(%arg0: i32, %arg1: i32) -> (i32, i32) {
    %c0_i32 = arith.constant 0 : i32
    return %arg0, %arg1 : i32, i32
  }
}

module attributes {stable_mosaic.version = 11 : i64} {
  func.func @kernel(%arg0: i32, %arg1: i32, %arg2: memref<32x288xbf16, #tpu.memory_space<vmem>>, %arg3: memref<288x32xbf16, #tpu.memory_space<vmem>>, %arg4: memref<1x32xf32, #tpu.memory_space<vmem>>, %arg5: memref<32x32xbf16, #tpu.memory_space<vmem>>, %arg6: memref<32x32xbf16, #tpu.memory_space<vmem>>) attributes {dimension_semantics = [#tpu.dimension_semantics<parallel>, #tpu.dimension_semantics<parallel>], iteration_bounds = array<i64: 1, 1>, scalar_prefetch = 0 : i64, scratch_operands = 0 : i64, tpu.core_type = #tpu.core_type<tc>, window_params = [{transform_indices = @transform_0, window_bounds = array<i64: 32, 288>}, {transform_indices = @transform_1, window_bounds = array<i64: 288, 32>}, {transform_indices = @transform_2, window_bounds = array<i64: 1, 32>}, {transform_indices = @transform_3, window_bounds = array<i64: 32, 32>}, {transform_indices = @transform_4, window_bounds = array<i64: 32, 32>}]} {
    %c0 = arith.constant 0 : index
    %c0_0 = arith.constant 0 : index
    %0 = vector.load %arg2[%c0, %c0_0] : memref<32x288xbf16, #tpu.memory_space<vmem>>, vector<32x288xbf16>
    %c0_1 = arith.constant 0 : index
    %c0_2 = arith.constant 0 : index
    %1 = vector.load %arg3[%c0_1, %c0_2] : memref<288x32xbf16, #tpu.memory_space<vmem>>, vector<288x32xbf16>
    %cst = arith.constant dense<0.000000e+00> : vector<32x32xf32>
    %2 = tpu.matmul %0, %1, %cst {dimension_numbers = #tpu.dot_dimension_numbers<[1], [0], [0], [1], [0, 0, 1, 1], [], []>} : vector<32x288xbf16>, vector<288x32xbf16>, vector<32x32xf32> -> vector<32x32xf32>
    %c0_3 = arith.constant 0 : index
    %c0_4 = arith.constant 0 : index
    %3 = vector.load %arg4[%c0_3, %c0_4] : memref<1x32xf32, #tpu.memory_space<vmem>>, vector<1x32xf32>
    %4 = vector.broadcast %3 : vector<1x32xf32> to vector<32x32xf32>
    %5 = arith.addf %2, %4 : vector<32x32xf32>
    %c0_5 = arith.constant 0 : index
    %c0_6 = arith.constant 0 : index
    %6 = vector.load %arg5[%c0_5, %c0_6] : memref<32x32xbf16, #tpu.memory_space<vmem>>, vector<32x32xbf16>
    %7 = arith.extf %6 : vector<32x32xbf16> to vector<32x32xf32>
    %8 = arith.addf %5, %7 : vector<32x32xf32>
    %cst_7 = arith.constant 0.000000e+00 : f32
    %9 = vector.broadcast %cst_7 : f32 to vector<32x32xf32>
    %10 = arith.maximumf %8, %9 : vector<32x32xf32>
    %11 = arith.truncf %10 : vector<32x32xf32> to vector<32x32xbf16>
    %c0_8 = arith.constant 0 : index
    %c0_9 = arith.constant 0 : index
    %12 = vector.load %arg6[%c0_8, %c0_9] : memref<32x32xbf16, #tpu.memory_space<vmem>>, vector<32x32xbf16>
    tpu.vector_store %arg6[%c0_8, %c0_9], %11 {strides = array<i32>} : memref<32x32xbf16, #tpu.memory_space<vmem>>, vector<32x32xbf16>,
    return
  }
  func.func @transform_0(%arg0: i32, %arg1: i32) -> (i32, i32) {
    %c0_i32 = arith.constant 0 : i32
    %c0_i32_0 = arith.constant 0 : i32
    return %arg0, %c0_i32 : i32, i32
  }
  func.func @transform_1(%arg0: i32, %arg1: i32) -> (i32, i32) {
    %c0_i32 = arith.constant 0 : i32
    %c0_i32_0 = arith.constant 0 : i32
    return %c0_i32, %arg1 : i32, i32
  }
  func.func @transform_2(%arg0: i32, %arg1: i32) -> (i32, i32) {
    %c0_i32 = arith.constant 0 : i32
    %c0_i32_0 = arith.constant 0 : i32
    return %c0_i32, %arg1 : i32, i32
  }
  func.func @transform_3(%arg0: i32, %arg1: i32) -> (i32, i32) {
    %c0_i32 = arith.constant 0 : i32
    return %arg0, %arg1 : i32, i32
  }
  func.func @transform_4(%arg0: i32, %arg1: i32) -> (i32, i32) {
    %c0_i32 = arith.constant 0 : i32
    return %arg0, %arg1 : i32, i32
  }
}

module attributes {stable_mosaic.version = 11 : i64} {
  func.func @kernel(%arg0: i32, %arg1: i32, %arg2: memref<32x288xbf16, #tpu.memory_space<vmem>>, %arg3: memref<288x64xbf16, #tpu.memory_space<vmem>>, %arg4: memref<1x64xf32, #tpu.memory_space<vmem>>, %arg5: memref<32x64xbf16, #tpu.memory_space<vmem>>) attributes {dimension_semantics = [#tpu.dimension_semantics<parallel>, #tpu.dimension_semantics<parallel>], iteration_bounds = array<i64: 1, 1>, scalar_prefetch = 0 : i64, scratch_operands = 0 : i64, tpu.core_type = #tpu.core_type<tc>, window_params = [{transform_indices = @transform_0, window_bounds = array<i64: 32, 288>}, {transform_indices = @transform_1, window_bounds = array<i64: 288, 64>}, {transform_indices = @transform_2, window_bounds = array<i64: 1, 64>}, {transform_indices = @transform_3, window_bounds = array<i64: 32, 64>}]} {
    %c0 = arith.constant 0 : index
    %c0_0 = arith.constant 0 : index
    %0 = vector.load %arg2[%c0, %c0_0] : memref<32x288xbf16, #tpu.memory_space<vmem>>, vector<32x288xbf16>
    %c0_1 = arith.constant 0 : index
    %c0_2 = arith.constant 0 : index
    %1 = vector.load %arg3[%c0_1, %c0_2] : memref<288x64xbf16, #tpu.memory_space<vmem>>, vector<288x64xbf16>
    %cst = arith.constant dense<0.000000e+00> : vector<32x64xf32>
    %2 = tpu.matmul %0, %1, %cst {dimension_numbers = #tpu.dot_dimension_numbers<[1], [0], [0], [1], [0, 0, 1, 1], [], []>} : vector<32x288xbf16>, vector<288x64xbf16>, vector<32x64xf32> -> vector<32x64xf32>
    %c0_3 = arith.constant 0 : index
    %c0_4 = arith.constant 0 : index
    %3 = vector.load %arg4[%c0_3, %c0_4] : memref<1x64xf32, #tpu.memory_space<vmem>>, vector<1x64xf32>
    %4 = vector.broadcast %3 : vector<1x64xf32> to vector<32x64xf32>
    %5 = arith.addf %2, %4 : vector<32x64xf32>
    %cst_5 = arith.constant 0.000000e+00 : f32
    %6 = vector.broadcast %cst_5 : f32 to vector<32x64xf32>
    %7 = arith.maximumf %5, %6 : vector<32x64xf32>
    %8 = arith.truncf %7 : vector<32x64xf32> to vector<32x64xbf16>
    %c0_6 = arith.constant 0 : index
    %c0_7 = arith.constant 0 : index
    %9 = vector.load %arg5[%c0_6, %c0_7] : memref<32x64xbf16, #tpu.memory_space<vmem>>, vector<32x64xbf16>
    tpu.vector_store %arg5[%c0_6, %c0_7], %8 {strides = array<i32>} : memref<32x64xbf16, #tpu.memory_space<vmem>>, vector<32x64xbf16>,
    return
  }
  func.func @transform_0(%arg0: i32, %arg1: i32) -> (i32, i32) {
    %c0_i32 = arith.constant 0 : i32
    %c0_i32_0 = arith.constant 0 : i32
    return %arg0, %c0_i32 : i32, i32
  }
  func.func @transform_1(%arg0: i32, %arg1: i32) -> (i32, i32) {
    %c0_i32 = arith.constant 0 : i32
    %c0_i32_0 = arith.constant 0 : i32
    return %c0_i32, %arg1 : i32, i32
  }
  func.func @transform_2(%arg0: i32, %arg1: i32) -> (i32, i32) {
    %c0_i32 = arith.constant 0 : i32
    %c0_i32_0 = arith.constant 0 : i32
    return %c0_i32, %arg1 : i32, i32
  }
  func.func @transform_3(%arg0: i32, %arg1: i32) -> (i32, i32) {
    %c0_i32 = arith.constant 0 : i32
    return %arg0, %arg1 : i32, i32
  }
}

module attributes {stable_mosaic.version = 11 : i64} {
  func.func @kernel(%arg0: i32, %arg1: i32, %arg2: memref<32x288xbf16, #tpu.memory_space<vmem>>, %arg3: memref<288x32xbf16, #tpu.memory_space<vmem>>, %arg4: memref<1x32xf32, #tpu.memory_space<vmem>>, %arg5: memref<32x32xbf16, #tpu.memory_space<vmem>>) attributes {dimension_semantics = [#tpu.dimension_semantics<parallel>, #tpu.dimension_semantics<parallel>], iteration_bounds = array<i64: 1, 1>, scalar_prefetch = 0 : i64, scratch_operands = 0 : i64, tpu.core_type = #tpu.core_type<tc>, window_params = [{transform_indices = @transform_0, window_bounds = array<i64: 32, 288>}, {transform_indices = @transform_1, window_bounds = array<i64: 288, 32>}, {transform_indices = @transform_2, window_bounds = array<i64: 1, 32>}, {transform_indices = @transform_3, window_bounds = array<i64: 32, 32>}]} {
    %c0 = arith.constant 0 : index
    %c0_0 = arith.constant 0 : index
    %0 = vector.load %arg2[%c0, %c0_0] : memref<32x288xbf16, #tpu.memory_space<vmem>>, vector<32x288xbf16>
    %c0_1 = arith.constant 0 : index
    %c0_2 = arith.constant 0 : index
    %1 = vector.load %arg3[%c0_1, %c0_2] : memref<288x32xbf16, #tpu.memory_space<vmem>>, vector<288x32xbf16>
    %cst = arith.constant dense<0.000000e+00> : vector<32x32xf32>
    %2 = tpu.matmul %0, %1, %cst {dimension_numbers = #tpu.dot_dimension_numbers<[1], [0], [0], [1], [0, 0, 1, 1], [], []>} : vector<32x288xbf16>, vector<288x32xbf16>, vector<32x32xf32> -> vector<32x32xf32>
    %c0_3 = arith.constant 0 : index
    %c0_4 = arith.constant 0 : index
    %3 = vector.load %arg4[%c0_3, %c0_4] : memref<1x32xf32, #tpu.memory_space<vmem>>, vector<1x32xf32>
    %4 = vector.broadcast %3 : vector<1x32xf32> to vector<32x32xf32>
    %5 = arith.addf %2, %4 : vector<32x32xf32>
    %cst_5 = arith.constant 0.000000e+00 : f32
    %6 = vector.broadcast %cst_5 : f32 to vector<32x32xf32>
    %7 = arith.maximumf %5, %6 : vector<32x32xf32>
    %8 = arith.truncf %7 : vector<32x32xf32> to vector<32x32xbf16>
    %c0_6 = arith.constant 0 : index
    %c0_7 = arith.constant 0 : index
    %9 = vector.load %arg5[%c0_6, %c0_7] : memref<32x32xbf16, #tpu.memory_space<vmem>>, vector<32x32xbf16>
    tpu.vector_store %arg5[%c0_6, %c0_7], %8 {strides = array<i32>} : memref<32x32xbf16, #tpu.memory_space<vmem>>, vector<32x32xbf16>,
    return
  }
  func.func @transform_0(%arg0: i32, %arg1: i32) -> (i32, i32) {
    %c0_i32 = arith.constant 0 : i32
    %c0_i32_0 = arith.constant 0 : i32
    return %arg0, %c0_i32 : i32, i32
  }
  func.func @transform_1(%arg0: i32, %arg1: i32) -> (i32, i32) {
    %c0_i32 = arith.constant 0 : i32
    %c0_i32_0 = arith.constant 0 : i32
    return %c0_i32, %arg1 : i32, i32
  }
  func.func @transform_2(%arg0: i32, %arg1: i32) -> (i32, i32) {
    %c0_i32 = arith.constant 0 : i32
    %c0_i32_0 = arith.constant 0 : i32
    return %c0_i32, %arg1 : i32, i32
  }
  func.func @transform_3(%arg0: i32, %arg1: i32) -> (i32, i32) {
    %c0_i32 = arith.constant 0 : i32
    return %arg0, %arg1 : i32, i32
  }
}

module attributes {stable_mosaic.version = 11 : i64} {
  func.func @kernel(%arg0: i32, %arg1: i32, %arg2: memref<128x288xbf16, #tpu.memory_space<vmem>>, %arg3: memref<288x16xbf16, #tpu.memory_space<vmem>>, %arg4: memref<1x16xf32, #tpu.memory_space<vmem>>, %arg5: memref<128x16xbf16, #tpu.memory_space<vmem>>) attributes {dimension_semantics = [#tpu.dimension_semantics<parallel>, #tpu.dimension_semantics<parallel>], iteration_bounds = array<i64: 1, 1>, scalar_prefetch = 0 : i64, scratch_operands = 0 : i64, tpu.core_type = #tpu.core_type<tc>, window_params = [{transform_indices = @transform_0, window_bounds = array<i64: 128, 288>}, {transform_indices = @transform_1, window_bounds = array<i64: 288, 16>}, {transform_indices = @transform_2, window_bounds = array<i64: 1, 16>}, {transform_indices = @transform_3, window_bounds = array<i64: 128, 16>}]} {
    %c0 = arith.constant 0 : index
    %c0_0 = arith.constant 0 : index
    %0 = vector.load %arg2[%c0, %c0_0] : memref<128x288xbf16, #tpu.memory_space<vmem>>, vector<128x288xbf16>
    %c0_1 = arith.constant 0 : index
    %c0_2 = arith.constant 0 : index
    %1 = vector.load %arg3[%c0_1, %c0_2] : memref<288x16xbf16, #tpu.memory_space<vmem>>, vector<288x16xbf16>
    %cst = arith.constant dense<0.000000e+00> : vector<128x16xf32>
    %2 = tpu.matmul %0, %1, %cst {dimension_numbers = #tpu.dot_dimension_numbers<[1], [0], [0], [1], [0, 0, 1, 1], [], []>} : vector<128x288xbf16>, vector<288x16xbf16>, vector<128x16xf32> -> vector<128x16xf32>
    %c0_3 = arith.constant 0 : index
    %c0_4 = arith.constant 0 : index
    %3 = vector.load %arg4[%c0_3, %c0_4] : memref<1x16xf32, #tpu.memory_space<vmem>>, vector<1x16xf32>
    %4 = vector.broadcast %3 : vector<1x16xf32> to vector<128x16xf32>
    %5 = arith.addf %2, %4 : vector<128x16xf32>
    %cst_5 = arith.constant 0.000000e+00 : f32
    %6 = vector.broadcast %cst_5 : f32 to vector<128x16xf32>
    %7 = arith.maximumf %5, %6 : vector<128x16xf32>
    %8 = arith.truncf %7 : vector<128x16xf32> to vector<128x16xbf16>
    %c0_6 = arith.constant 0 : index
    %c0_7 = arith.constant 0 : index
    %9 = vector.load %arg5[%c0_6, %c0_7] : memref<128x16xbf16, #tpu.memory_space<vmem>>, vector<128x16xbf16>
    tpu.vector_store %arg5[%c0_6, %c0_7], %8 {strides = array<i32>} : memref<128x16xbf16, #tpu.memory_space<vmem>>, vector<128x16xbf16>,
    return
  }
  func.func @transform_0(%arg0: i32, %arg1: i32) -> (i32, i32) {
    %c0_i32 = arith.constant 0 : i32
    %c0_i32_0 = arith.constant 0 : i32
    return %arg0, %c0_i32 : i32, i32
  }
  func.func @transform_1(%arg0: i32, %arg1: i32) -> (i32, i32) {
    %c0_i32 = arith.constant 0 : i32
    %c0_i32_0 = arith.constant 0 : i32
    return %c0_i32, %arg1 : i32, i32
  }
  func.func @transform_2(%arg0: i32, %arg1: i32) -> (i32, i32) {
    %c0_i32 = arith.constant 0 : i32
    %c0_i32_0 = arith.constant 0 : i32
    return %c0_i32, %arg1 : i32, i32
  }
  func.func @transform_3(%arg0: i32, %arg1: i32) -> (i32, i32) {
    %c0_i32 = arith.constant 0 : i32
    return %arg0, %arg1 : i32, i32
  }
}

module attributes {stable_mosaic.version = 11 : i64} {
  func.func @kernel(%arg0: i32, %arg1: i32, %arg2: memref<128x144xbf16, #tpu.memory_space<vmem>>, %arg3: memref<144x32xbf16, #tpu.memory_space<vmem>>, %arg4: memref<1x32xf32, #tpu.memory_space<vmem>>, %arg5: memref<128x32xbf16, #tpu.memory_space<vmem>>) attributes {dimension_semantics = [#tpu.dimension_semantics<parallel>, #tpu.dimension_semantics<parallel>], iteration_bounds = array<i64: 1, 1>, scalar_prefetch = 0 : i64, scratch_operands = 0 : i64, tpu.core_type = #tpu.core_type<tc>, window_params = [{transform_indices = @transform_0, window_bounds = array<i64: 128, 144>}, {transform_indices = @transform_1, window_bounds = array<i64: 144, 32>}, {transform_indices = @transform_2, window_bounds = array<i64: 1, 32>}, {transform_indices = @transform_3, window_bounds = array<i64: 128, 32>}]} {
    %c0 = arith.constant 0 : index
    %c0_0 = arith.constant 0 : index
    %0 = vector.load %arg2[%c0, %c0_0] : memref<128x144xbf16, #tpu.memory_space<vmem>>, vector<128x144xbf16>
    %c0_1 = arith.constant 0 : index
    %c0_2 = arith.constant 0 : index
    %1 = vector.load %arg3[%c0_1, %c0_2] : memref<144x32xbf16, #tpu.memory_space<vmem>>, vector<144x32xbf16>
    %cst = arith.constant dense<0.000000e+00> : vector<128x32xf32>
    %2 = tpu.matmul %0, %1, %cst {dimension_numbers = #tpu.dot_dimension_numbers<[1], [0], [0], [1], [0, 0, 1, 1], [], []>} : vector<128x144xbf16>, vector<144x32xbf16>, vector<128x32xf32> -> vector<128x32xf32>
    %c0_3 = arith.constant 0 : index
    %c0_4 = arith.constant 0 : index
    %3 = vector.load %arg4[%c0_3, %c0_4] : memref<1x32xf32, #tpu.memory_space<vmem>>, vector<1x32xf32>
    %4 = vector.broadcast %3 : vector<1x32xf32> to vector<128x32xf32>
    %5 = arith.addf %2, %4 : vector<128x32xf32>
    %cst_5 = arith.constant 0.000000e+00 : f32
    %6 = vector.broadcast %cst_5 : f32 to vector<128x32xf32>
    %7 = arith.maximumf %5, %6 : vector<128x32xf32>
    %8 = arith.truncf %7 : vector<128x32xf32> to vector<128x32xbf16>
    %c0_6 = arith.constant 0 : index
    %c0_7 = arith.constant 0 : index
    %9 = vector.load %arg5[%c0_6, %c0_7] : memref<128x32xbf16, #tpu.memory_space<vmem>>, vector<128x32xbf16>
    tpu.vector_store %arg5[%c0_6, %c0_7], %8 {strides = array<i32>} : memref<128x32xbf16, #tpu.memory_space<vmem>>, vector<128x32xbf16>,
    return
  }
  func.func @transform_0(%arg0: i32, %arg1: i32) -> (i32, i32) {
    %c0_i32 = arith.constant 0 : i32
    %c0_i32_0 = arith.constant 0 : i32
    return %arg0, %c0_i32 : i32, i32
  }
  func.func @transform_1(%arg0: i32, %arg1: i32) -> (i32, i32) {
    %c0_i32 = arith.constant 0 : i32
    %c0_i32_0 = arith.constant 0 : i32
    return %c0_i32, %arg1 : i32, i32
  }
  func.func @transform_2(%arg0: i32, %arg1: i32) -> (i32, i32) {
    %c0_i32 = arith.constant 0 : i32
    %c0_i32_0 = arith.constant 0 : i32
    return %c0_i32, %arg1 : i32, i32
  }
  func.func @transform_3(%arg0: i32, %arg1: i32) -> (i32, i32) {
    %c0_i32 = arith.constant 0 : i32
    return %arg0, %arg1 : i32, i32
  }
}

module attributes {stable_mosaic.version = 11 : i64} {
  func.func @kernel(%arg0: i32, %arg1: i32, %arg2: memref<128x144xbf16, #tpu.memory_space<vmem>>, %arg3: memref<144x8xbf16, #tpu.memory_space<vmem>>, %arg4: memref<1x8xf32, #tpu.memory_space<vmem>>, %arg5: memref<128x8xbf16, #tpu.memory_space<vmem>>) attributes {dimension_semantics = [#tpu.dimension_semantics<parallel>, #tpu.dimension_semantics<parallel>], iteration_bounds = array<i64: 4, 1>, scalar_prefetch = 0 : i64, scratch_operands = 0 : i64, tpu.core_type = #tpu.core_type<tc>, window_params = [{transform_indices = @transform_0, window_bounds = array<i64: 128, 144>}, {transform_indices = @transform_1, window_bounds = array<i64: 144, 8>}, {transform_indices = @transform_2, window_bounds = array<i64: 1, 8>}, {transform_indices = @transform_3, window_bounds = array<i64: 128, 8>}]} {
    %c0 = arith.constant 0 : index
    %c0_0 = arith.constant 0 : index
    %0 = vector.load %arg2[%c0, %c0_0] : memref<128x144xbf16, #tpu.memory_space<vmem>>, vector<128x144xbf16>
    %c0_1 = arith.constant 0 : index
    %c0_2 = arith.constant 0 : index
    %1 = vector.load %arg3[%c0_1, %c0_2] : memref<144x8xbf16, #tpu.memory_space<vmem>>, vector<144x8xbf16>
    %cst = arith.constant dense<0.000000e+00> : vector<128x8xf32>
    %2 = tpu.matmul %0, %1, %cst {dimension_numbers = #tpu.dot_dimension_numbers<[1], [0], [0], [1], [0, 0, 1, 1], [], []>} : vector<128x144xbf16>, vector<144x8xbf16>, vector<128x8xf32> -> vector<128x8xf32>
    %c0_3 = arith.constant 0 : index
    %c0_4 = arith.constant 0 : index
    %3 = vector.load %arg4[%c0_3, %c0_4] : memref<1x8xf32, #tpu.memory_space<vmem>>, vector<1x8xf32>
    %4 = vector.broadcast %3 : vector<1x8xf32> to vector<128x8xf32>
    %5 = arith.addf %2, %4 : vector<128x8xf32>
    %cst_5 = arith.constant 0.000000e+00 : f32
    %6 = vector.broadcast %cst_5 : f32 to vector<128x8xf32>
    %7 = arith.maximumf %5, %6 : vector<128x8xf32>
    %8 = arith.truncf %7 : vector<128x8xf32> to vector<128x8xbf16>
    %c0_6 = arith.constant 0 : index
    %c0_7 = arith.constant 0 : index
    %9 = vector.load %arg5[%c0_6, %c0_7] : memref<128x8xbf16, #tpu.memory_space<vmem>>, vector<128x8xbf16>
    tpu.vector_store %arg5[%c0_6, %c0_7], %8 {strides = array<i32>} : memref<128x8xbf16, #tpu.memory_space<vmem>>, vector<128x8xbf16>,
    return
  }
  func.func @transform_0(%arg0: i32, %arg1: i32) -> (i32, i32) {
    %c0_i32 = arith.constant 0 : i32
    %c0_i32_0 = arith.constant 0 : i32
    return %arg0, %c0_i32 : i32, i32
  }
  func.func @transform_1(%arg0: i32, %arg1: i32) -> (i32, i32) {
    %c0_i32 = arith.constant 0 : i32
    %c0_i32_0 = arith.constant 0 : i32
    return %c0_i32, %arg1 : i32, i32
  }
  func.func @transform_2(%arg0: i32, %arg1: i32) -> (i32, i32) {
    %c0_i32 = arith.constant 0 : i32
    %c0_i32_0 = arith.constant 0 : i32
    return %c0_i32, %arg1 : i32, i32
  }
  func.func @transform_3(%arg0: i32, %arg1: i32) -> (i32, i32) {
    %c0_i32 = arith.constant 0 : i32
    return %arg0, %arg1 : i32, i32
  }
}

</mosaic_0001>

<bundles_post_ra>
// kernel: _lambda_.17
= control target key start
LH: loop header
LB: loop body
LE: loop exit
PB: predicated region body
PF: predicated region fallthrough
CT: control target
= control target key end

     0   :  { %s736_s12 = smov 0   ;;  %s738_s13 = smov 0   ;;  %s860_s0 = inlined_call_operand.vmem [shape: bf16[512,81], index: 0, kind: input, shape index: {}]   ;;  %s861_s1 = inlined_call_operand.vmem [shape: bf16[81,8], index: 1, kind: input, shape index: {}]   ;;  %s862_s2 = inlined_call_operand.vmem [shape: f32[1,8], index: 2, kind: input, shape index: {}]   ;;  %s863_s3 = inlined_call_operand.vmem [shape: bf16[512,8], index: 3, kind: output, shape index: {}]  }
   0x1   :  { %s740_s14 = smov 0  }
   0x2 LB: > { %s25_s15 = sadd.s32 1, %s709_s13  ;;  %p567_p0 = scmp.ge.s32.totalorder %s713_s14, 1  ;;  %s713_s14 = sphi %s740_s14, %s13_s14   ;;  %s709_s13 = sphi %s738_s13, %s865_s13   ;;  %s705_s12 = sphi %s736_s12, %s864_s12  }
   0x3   : > { %p27_p1 = scmp.ge.s32.totalorder %s25_s15, 4  ;;  %p169_p2 = scmp.lt.s32.totalorder %s713_s14, 5 }
   0x5   : > { %s867_s15 = smov (%p27_p1, %s25_s15), 0  ;;  %p170_p3 = pnand %p567_p0, %p169_p2 }
   0x6   : > { %s568_s20 = sshll.u32 (!%p170_p3), %s705_s12, 4 }
   0x7   : > { %173 = sbr.rel (%p170_p3) target bundleno = 207 (0xcf), region = 32  ;;  %p204_p4 = scmp.lt.s32.totalorder (!%p170_p3), %s568_s20, 63 }
   0xc   : > { %v252_v0 = vld [vmem:[%s861_s1 + $0x28] sm:$0x1]  ;;  %vm355_vm0 = vcmask 1040384   ;;  %v715_v2 = vmov 0   ;;  %v646_v6 = vld [vmem:[%s861_s1 + $0x20] sm:$0xff]  ;;  %v645_v7 = vld [vmem:[%s861_s1 + $0x18] sm:$0xff] }
   0xd   : > { %v318_v1 = vunpack.c.l.b16 %v252_v0  ;;  %v357_v3 = vsel %vm355_vm0, 65535, %v715_v2  ;;  %v644_v8 = vld [vmem:[%s861_s1 + $0x10] sm:$0xff]  ;;  %s869_s20 = smov (!%p204_p4, %s568_s20), 63  ;;  %v643_v9 = vld [vmem:[%s861_s1 + $0x8] sm:$0xff]  ;;  %v642_v10 = vld [vmem:[%s861_s1] sm:$0xff]  ;;  %vm330_vm1 = vcmask 662528  }
   0xe   : > { %s569_s27 = sshll.u32 %s869_s20, 2  ;;  %v794_v19 = vld [vmem:[%s862_s2] ss:$0 sm:$0xff]  ;;  %vm442_vm2 = vcmask 60416  }
   0xf   : > { %v324_v4 = vpack.c.b16 %v318_v1, %v318_v1  ;;  %s207_s5 = scalar_lea.vmem %s860_s0, %s569_s27  ;;  %s803_s10 = scalar_lea.vmem %s863_s3, %s569_s27 }
  0x10   : > { %v634_v11 = vld [vmem:[%s207_s5] sm:$0xff]  ;;  %v636_v12 = vld [vmem:[%s207_s5 + $0x10] sm:$0xff]  ;;  %v635_v15 = vld [vmem:[%s207_s5 + $0x8] sm:$0xff] }
  0x11   : > { %v359_v5 = vand.u32 %v357_v3, %v324_v4  ;;  %v638_v13 = vld [vmem:[%s207_s5 + $0x20] sm:$0xff]  ;;  %v640_v14 = vld [vmem:[%s207_s5 + $0x30] sm:$0xff]  ;;  %v637_v16 = vld [vmem:[%s207_s5 + $0x18] sm:$0xff] }
  0x12   : > { %v639_v17 = vld [vmem:[%s207_s5 + $0x28] sm:$0xff]  ;;  %v641_v18 = vld [vmem:[%s207_s5 + $0x38] sm:$0xff] }
  0x13   : > { %363 = vmatpush.bf16.msra.mxu0 %v359_v5  ;;  %647 = vmatpush.bf16.msra.mxu1 %v359_v5 }
  0x14   : > { %648 = vmatpush.bf16.msra.mxu2 %v359_v5  ;;  %649 = vmatpush.bf16.msra.mxu3 %v359_v5 }
  0x17   : > { %364 = vmatpush.bf16.msra.mxu0 %v646_v6  ;;  %650 = vmatpush.bf16.msra.mxu1 %v646_v6 }
  0x18   : > { %651 = vmatpush.bf16.msra.mxu2 %v646_v6  ;;  %652 = vmatpush.bf16.msra.mxu3 %v646_v6 }
  0x1b   : > { %365 = vmatpush.bf16.msra.mxu0 %v645_v7  ;;  %653 = vmatpush.bf16.msra.mxu1 %v645_v7 }
  0x1c   : > { %654 = vmatpush.bf16.msra.mxu2 %v645_v7  ;;  %655 = vmatpush.bf16.msra.mxu3 %v645_v7 }
  0x1f   : > { %366 = vmatpush.bf16.msra.mxu0 %v644_v8  ;;  %656 = vmatpush.bf16.msra.mxu1 %v644_v8 }
  0x20   : > { %657 = vmatpush.bf16.msra.mxu2 %v644_v8  ;;  %658 = vmatpush.bf16.msra.mxu3 %v644_v8 }
  0x23   : > { %367 = vmatpush.bf16.msra.mxu0 %v643_v9  ;;  %659 = vmatpush.bf16.msra.mxu1 %v643_v9 }
  0x24   : > { %660 = vmatpush.bf16.msra.mxu2 %v643_v9  ;;  %661 = vmatpush.bf16.msra.mxu3 %v643_v9 }
  0x27   : > { %368 = vmatpush.bf16.msra.mxu0 %v642_v10  ;;  %662 = vmatpush.bf16.msra.mxu1 %v642_v10 }
  0x28   : > { %663 = vmatpush.bf16.msra.mxu2 %v642_v10  ;;  %664 = vmatpush.bf16.msra.mxu3 %v642_v10 }
  0x2a   : > { %624 = vmatmul.msk.bf16.vlgmr.msra.gmra.mxu0 %vm330_vm1, %v634_v11  ;;  %626 = vmatmul.msk.bf16.vlgmr.msra.gmra.mxu1 %vm330_vm1, %v636_v12 }
  0x2b   : > { %628 = vmatmul.msk.bf16.vlgmr.msra.gmra.mxu2 %vm330_vm1, %v638_v13  ;;  %630 = vmatmul.msk.bf16.vlgmr.msra.gmra.mxu3 %vm330_vm1, %v640_v14 }
  0x3a   : > { %625 = vmatmul.msk.bf16.gmra.mxu0 %vm330_vm1, %v635_v15  ;;  %627 = vmatmul.msk.bf16.gmra.mxu1 %vm330_vm1, %v637_v16 }
  0x3b   : > { %629 = vmatmul.msk.bf16.gmra.mxu2 %vm330_vm1, %v639_v17  ;;  %631 = vmatmul.msk.bf16.gmra.mxu3 %vm330_vm1, %v641_v18 }
  0xa7   : > { %v370_v20 = vpop.f32.mrf.mxu0  ;;  %v380_v21 = vpop.f32.mrf.mxu1 }
  0xa8   : > { %v371_v22 = vadd.f32 %v794_v19, %v370_v20  ;;  %v381_v23 = vadd.f32 %v794_v19, %v380_v21 }
  0xaa   : > { %v410_v24 = vmax.f32 %v371_v22, 0.0  ;;  %v414_v25 = vmax.f32 %v381_v23, 0.0 }
  0xac   : > { %v426_v26 = vpack.c.bf16 %v410_v24, %v410_v24  ;;  %v430_v27 = vpack.c.bf16 %v414_v25, %v414_v25 }
  0xae   : > { %443 = vst.msk [vmem:[%s803_s10] sm:$0xf] %vm442_vm2, %v426_v26  ;;  %v390_v28 = vpop.f32.mrf.mxu2  ;;  %v400_v29 = vpop.f32.mrf.mxu3 }
  0xaf   : > { %447 = vst.msk [vmem:[%s803_s10 + $0x10] sm:$0xf] %vm442_vm2, %v430_v27  ;;  %v391_v30 = vadd.f32 %v794_v19, %v390_v28  ;;  %v401_v31 = vadd.f32 %v794_v19, %v400_v29  ;;  %v372_v32 = vpop.f32.mrf.mxu0  ;;  %v382_v33 = vpop.f32.mrf.mxu1 }
  0xb0   : > { %v373_v34 = vadd.f32 %v794_v19, %v372_v32  ;;  %v383_v35 = vadd.f32 %v794_v19, %v382_v33 }
  0xb1   : > { %v418_v36 = vmax.f32 %v391_v30, 0.0  ;;  %v422_v37 = vmax.f32 %v401_v31, 0.0 }
  0xb2   : > { %v411_v38 = vmax.f32 %v373_v34, 0.0  ;;  %v415_v39 = vmax.f32 %v383_v35, 0.0 }
  0xb3   : > { %v434_v40 = vpack.c.bf16 %v418_v36, %v418_v36  ;;  %v438_v41 = vpack.c.bf16 %v422_v37, %v422_v37 }
  0xb4   : > { %v427_v42 = vpack.c.bf16 %v411_v38, %v411_v38  ;;  %v431_v43 = vpack.c.bf16 %v415_v39, %v415_v39 }
  0xb5   : > { %451 = vst.msk [vmem:[%s803_s10 + $0x20] sm:$0xf] %vm442_vm2, %v434_v40 }
  0xb6   : > { %455 = vst.msk [vmem:[%s803_s10 + $0x30] sm:$0xf] %vm442_vm2, %v438_v41  ;;  %v392_v44 = vpop.f32.mrf.mxu2  ;;  %v402_v45 = vpop.f32.mrf.mxu3 }
  0xb7   : > { %444 = vst.msk [vmem:[%s803_s10 + $0x4] sm:$0xf] %vm442_vm2, %v427_v42  ;;  %v393_v46 = vadd.f32 %v794_v19, %v392_v44  ;;  %v403_v47 = vadd.f32 %v794_v19, %v402_v45  ;;  %v375_v48 = vpop.f32.mrf.mxu0  ;;  %v385_v49 = vpop.f32.mrf.mxu1 }
  0xb8   : > { %448 = vst.msk [vmem:[%s803_s10 + $0x14] sm:$0xf] %vm442_vm2, %v431_v43  ;;  %v376_v50 = vadd.f32 %v794_v19, %v375_v48  ;;  %v386_v51 = vadd.f32 %v794_v19, %v385_v49 }
  0xb9   : > { %v419_v52 = vmax.f32 %v393_v46, 0.0  ;;  %v423_v53 = vmax.f32 %v403_v47, 0.0 }
  0xba   : > { %v412_v54 = vmax.f32 %v376_v50, 0.0  ;;  %v416_v55 = vmax.f32 %v386_v51, 0.0 }
  0xbb   : > { %v435_v56 = vpack.c.bf16 %v419_v52, %v419_v52  ;;  %v439_v57 = vpack.c.bf16 %v423_v53, %v423_v53 }
  0xbc   : > { %v428_v58 = vpack.c.bf16 %v412_v54, %v412_v54  ;;  %v432_v59 = vpack.c.bf16 %v416_v55, %v416_v55 }
  0xbd   : > { %452 = vst.msk [vmem:[%s803_s10 + $0x24] sm:$0xf] %vm442_vm2, %v435_v56 }
  0xbe   : > { %456 = vst.msk [vmem:[%s803_s10 + $0x34] sm:$0xf] %vm442_vm2, %v439_v57  ;;  %v395_v60 = vpop.f32.mrf.mxu2  ;;  %v405_v61 = vpop.f32.mrf.mxu3 }
  0xbf   : > { %445 = vst.msk [vmem:[%s803_s10 + $0x8] sm:$0xf] %vm442_vm2, %v428_v58  ;;  %v396_v62 = vadd.f32 %v794_v19, %v395_v60  ;;  %v406_v63 = vadd.f32 %v794_v19, %v405_v61  ;;  %v377_v0 = vpop.f32.mrf.mxu0  ;;  %v387_v1 = vpop.f32.mrf.mxu1 }
  0xc0   : > { %449 = vst.msk [vmem:[%s803_s10 + $0x18] sm:$0xf] %vm442_vm2, %v432_v59  ;;  %v378_v2 = vadd.f32 %v794_v19, %v377_v0  ;;  %v388_v3 = vadd.f32 %v794_v19, %v387_v1 }
  0xc1   : > { %v420_v4 = vmax.f32 %v396_v62, 0.0  ;;  %v424_v5 = vmax.f32 %v406_v63, 0.0 }
  0xc2   : > { %v413_v6 = vmax.f32 %v378_v2, 0.0  ;;  %v417_v7 = vmax.f32 %v388_v3, 0.0 }
  0xc3   : > { %v436_v8 = vpack.c.bf16 %v420_v4, %v420_v4  ;;  %v440_v9 = vpack.c.bf16 %v424_v5, %v424_v5 }
  0xc4   : > { %v429_v10 = vpack.c.bf16 %v413_v6, %v413_v6  ;;  %v433_v11 = vpack.c.bf16 %v417_v7, %v417_v7 }
  0xc5   : > { %453 = vst.msk [vmem:[%s803_s10 + $0x28] sm:$0xf] %vm442_vm2, %v436_v8 }
  0xc6   : > { %457 = vst.msk [vmem:[%s803_s10 + $0x38] sm:$0xf] %vm442_vm2, %v440_v9  ;;  %v397_v12 = vpop.f32.mrf.mxu2  ;;  %v407_v13 = vpop.f32.mrf.mxu3 }
  0xc7   : > { %446 = vst.msk [vmem:[%s803_s10 + $0xc] sm:$0xf] %vm442_vm2, %v429_v10  ;;  %v398_v14 = vadd.f32 %v794_v19, %v397_v12  ;;  %v408_v15 = vadd.f32 %v794_v19, %v407_v13 }
  0xc8   : > { %450 = vst.msk [vmem:[%s803_s10 + $0x1c] sm:$0xf] %vm442_vm2, %v433_v11 }
  0xc9   : > { %v421_v16 = vmax.f32 %v398_v14, 0.0  ;;  %v425_v17 = vmax.f32 %v408_v15, 0.0 }
  0xcb   : > { %v437_v18 = vpack.c.bf16 %v421_v16, %v421_v16  ;;  %v441_v20 = vpack.c.bf16 %v425_v17, %v425_v17 }
  0xcd   : > { %454 = vst.msk [vmem:[%s803_s10 + $0x2c] sm:$0xf] %vm442_vm2, %v437_v18 }
  0xce   : > { %458 = vst.msk [vmem:[%s803_s10 + $0x3c] sm:$0xf] %vm442_vm2, %v441_v20 }
  0xcf PF: > { %s13_s14 = sadd.s32 1, %s713_s14   ;;  %s864_s12 = smov %s709_s13 }
  0xd0   : > { %p10_p5 = scmp.ge.s32.totalorder %s13_s14, 6   ;;  %s865_s13 = smov %s867_s15 }
  0xd2   :  { %12 = sbr.rel (!%p10_p5) target bundleno = 2 (0x2), region = 68 }

// kernel: _lambda_.18
= control target key start
LH: loop header
LB: loop body
LE: loop exit
PB: predicated region body
PF: predicated region fallthrough
CT: control target
= control target key end

     0   :  { %s716_s12 = smov 0   ;;  %s718_s13 = smov 0   ;;  %s834_s0 = inlined_call_operand.vmem [shape: bf16[512,72], index: 0, kind: input, shape index: {}]   ;;  %s835_s1 = inlined_call_operand.vmem [shape: bf16[72,8], index: 1, kind: input, shape index: {}]   ;;  %s836_s2 = inlined_call_operand.vmem [shape: f32[1,8], index: 2, kind: input, shape index: {}]   ;;  %s837_s3 = inlined_call_operand.vmem [shape: bf16[512,8], index: 3, kind: output, shape index: {}]  }
   0x1   :  { %s720_s14 = smov 0  }
   0x2 LB: > { %s25_s15 = sadd.s32 1, %s690_s13  ;;  %p557_p0 = scmp.ge.s32.totalorder %s694_s14, 1  ;;  %s694_s14 = sphi %s720_s14, %s13_s14   ;;  %s690_s13 = sphi %s718_s13, %s839_s13   ;;  %s686_s12 = sphi %s716_s12, %s838_s12  }
   0x3   : > { %p27_p1 = scmp.ge.s32.totalorder %s25_s15, 4  ;;  %p169_p2 = scmp.lt.s32.totalorder %s694_s14, 5 }
   0x5   : > { %s841_s15 = smov (%p27_p1, %s25_s15), 0  ;;  %p170_p3 = pnand %p557_p0, %p169_p2 }
   0x6   : > { %s558_s18 = sshll.u32 (!%p170_p3), %s686_s12, 4 }
   0x7   : > { %173 = sbr.rel (%p170_p3) target bundleno = 202 (0xca), region = 32  ;;  %p204_p4 = scmp.lt.s32.totalorder (!%p170_p3), %s558_s18, 63 }
   0xc   : > { %v250_v0 = vld [vmem:[%s835_s1 + $0x20] sm:$0xf]  ;;  %vm347_vm0 = vcmask 1043456   ;;  %v631_v4 = vld [vmem:[%s835_s1 + $0x18] sm:$0xff]  ;;  %v630_v5 = vld [vmem:[%s835_s1 + $0x10] sm:$0xff]  ;;  %s843_s18 = smov (!%p204_p4, %s558_s18), 63 }
   0xd   : > { %v312_v1 = vunpack.c.l.b16 %v250_v0  ;;  %v629_v6 = vld [vmem:[%s835_s1 + $0x8] sm:$0xff]  ;;  %s559_s25 = sshll.u32 %s843_s18, 2  ;;  %v628_v7 = vld [vmem:[%s835_s1] sm:$0xff]  ;;  %vm322_vm1 = vcmask 588800   ;;  %vm432_vm2 = vcmask 60416  }
   0xe   : > { %s207_s30 = scalar_lea.vmem %s834_s0, %s559_s25  ;;  %v768_v16 = vld [vmem:[%s836_s2] ss:$0 sm:$0xff]  ;;  %s777_s8 = scalar_lea.vmem %s837_s3, %s559_s25 }
   0xf   : > { %v317_v2 = vpack.c.b16 %v312_v1, %v312_v1  ;;  %v620_v8 = vld [vmem:[%s207_s30] sm:$0xff]  ;;  %v622_v9 = vld [vmem:[%s207_s30 + $0x10] sm:$0xff]  ;;  %v621_v12 = vld [vmem:[%s207_s30 + $0x8] sm:$0xff] }
  0x10   : > { %v624_v10 = vld [vmem:[%s207_s30 + $0x20] sm:$0xff]  ;;  %v626_v11 = vld [vmem:[%s207_s30 + $0x30] sm:$0xff]  ;;  %v623_v13 = vld [vmem:[%s207_s30 + $0x18] sm:$0xff] }
  0x11   : > { %v349_v3 = vsel %vm347_vm0, %v317_v2, 0  ;;  %v625_v14 = vld [vmem:[%s207_s30 + $0x28] sm:$0xff]  ;;  %v627_v15 = vld [vmem:[%s207_s30 + $0x38] sm:$0xff] }
  0x12   : > { %354 = vmatpush.bf16.msra.mxu0 %v349_v3  ;;  %632 = vmatpush.bf16.msra.mxu1 %v349_v3 }
  0x13   : > { %633 = vmatpush.bf16.msra.mxu2 %v349_v3  ;;  %634 = vmatpush.bf16.msra.mxu3 %v349_v3 }
  0x16   : > { %355 = vmatpush.bf16.msra.mxu0 %v631_v4  ;;  %635 = vmatpush.bf16.msra.mxu1 %v631_v4 }
  0x17   : > { %636 = vmatpush.bf16.msra.mxu2 %v631_v4  ;;  %637 = vmatpush.bf16.msra.mxu3 %v631_v4 }
  0x1a   : > { %356 = vmatpush.bf16.msra.mxu0 %v630_v5  ;;  %638 = vmatpush.bf16.msra.mxu1 %v630_v5 }
  0x1b   : > { %639 = vmatpush.bf16.msra.mxu2 %v630_v5  ;;  %640 = vmatpush.bf16.msra.mxu3 %v630_v5 }
  0x1e   : > { %357 = vmatpush.bf16.msra.mxu0 %v629_v6  ;;  %641 = vmatpush.bf16.msra.mxu1 %v629_v6 }
  0x1f   : > { %642 = vmatpush.bf16.msra.mxu2 %v629_v6  ;;  %643 = vmatpush.bf16.msra.mxu3 %v629_v6 }
  0x22   : > { %358 = vmatpush.bf16.msra.mxu0 %v628_v7  ;;  %644 = vmatpush.bf16.msra.mxu1 %v628_v7 }
  0x23   : > { %645 = vmatpush.bf16.msra.mxu2 %v628_v7  ;;  %646 = vmatpush.bf16.msra.mxu3 %v628_v7 }
  0x25   : > { %610 = vmatmul.msk.bf16.vlgmr.msra.gmra.mxu0 %vm322_vm1, %v620_v8  ;;  %612 = vmatmul.msk.bf16.vlgmr.msra.gmra.mxu1 %vm322_vm1, %v622_v9 }
  0x26   : > { %614 = vmatmul.msk.bf16.vlgmr.msra.gmra.mxu2 %vm322_vm1, %v624_v10  ;;  %616 = vmatmul.msk.bf16.vlgmr.msra.gmra.mxu3 %vm322_vm1, %v626_v11 }
  0x35   : > { %611 = vmatmul.msk.bf16.gmra.mxu0 %vm322_vm1, %v621_v12  ;;  %613 = vmatmul.msk.bf16.gmra.mxu1 %vm322_vm1, %v623_v13 }
  0x36   : > { %615 = vmatmul.msk.bf16.gmra.mxu2 %vm322_vm1, %v625_v14  ;;  %617 = vmatmul.msk.bf16.gmra.mxu3 %vm322_vm1, %v627_v15 }
  0xa2   : > { %v360_v17 = vpop.f32.mrf.mxu0  ;;  %v370_v18 = vpop.f32.mrf.mxu1 }
  0xa3   : > { %v361_v19 = vadd.f32 %v768_v16, %v360_v17  ;;  %v371_v20 = vadd.f32 %v768_v16, %v370_v18 }
  0xa5   : > { %v400_v21 = vmax.f32 %v361_v19, 0.0  ;;  %v404_v22 = vmax.f32 %v371_v20, 0.0 }
  0xa7   : > { %v416_v23 = vpack.c.bf16 %v400_v21, %v400_v21  ;;  %v420_v24 = vpack.c.bf16 %v404_v22, %v404_v22 }
  0xa9   : > { %433 = vst.msk [vmem:[%s777_s8] sm:$0xf] %vm432_vm2, %v416_v23  ;;  %v380_v25 = vpop.f32.mrf.mxu2  ;;  %v390_v26 = vpop.f32.mrf.mxu3 }
  0xaa   : > { %437 = vst.msk [vmem:[%s777_s8 + $0x10] sm:$0xf] %vm432_vm2, %v420_v24  ;;  %v381_v27 = vadd.f32 %v768_v16, %v380_v25  ;;  %v391_v28 = vadd.f32 %v768_v16, %v390_v26  ;;  %v362_v29 = vpop.f32.mrf.mxu0  ;;  %v372_v30 = vpop.f32.mrf.mxu1 }
  0xab   : > { %v363_v31 = vadd.f32 %v768_v16, %v362_v29  ;;  %v373_v32 = vadd.f32 %v768_v16, %v372_v30 }
  0xac   : > { %v408_v33 = vmax.f32 %v381_v27, 0.0  ;;  %v412_v34 = vmax.f32 %v391_v28, 0.0 }
  0xad   : > { %v401_v35 = vmax.f32 %v363_v31, 0.0  ;;  %v405_v36 = vmax.f32 %v373_v32, 0.0 }
  0xae   : > { %v424_v37 = vpack.c.bf16 %v408_v33, %v408_v33  ;;  %v428_v38 = vpack.c.bf16 %v412_v34, %v412_v34 }
  0xaf   : > { %v417_v39 = vpack.c.bf16 %v401_v35, %v401_v35  ;;  %v421_v40 = vpack.c.bf16 %v405_v36, %v405_v36 }
  0xb0   : > { %441 = vst.msk [vmem:[%s777_s8 + $0x20] sm:$0xf] %vm432_vm2, %v424_v37 }
  0xb1   : > { %445 = vst.msk [vmem:[%s777_s8 + $0x30] sm:$0xf] %vm432_vm2, %v428_v38  ;;  %v382_v41 = vpop.f32.mrf.mxu2  ;;  %v392_v42 = vpop.f32.mrf.mxu3 }
  0xb2   : > { %434 = vst.msk [vmem:[%s777_s8 + $0x4] sm:$0xf] %vm432_vm2, %v417_v39  ;;  %v383_v43 = vadd.f32 %v768_v16, %v382_v41  ;;  %v393_v44 = vadd.f32 %v768_v16, %v392_v42  ;;  %v365_v45 = vpop.f32.mrf.mxu0  ;;  %v375_v46 = vpop.f32.mrf.mxu1 }
  0xb3   : > { %438 = vst.msk [vmem:[%s777_s8 + $0x14] sm:$0xf] %vm432_vm2, %v421_v40  ;;  %v366_v47 = vadd.f32 %v768_v16, %v365_v45  ;;  %v376_v48 = vadd.f32 %v768_v16, %v375_v46 }
  0xb4   : > { %v409_v49 = vmax.f32 %v383_v43, 0.0  ;;  %v413_v50 = vmax.f32 %v393_v44, 0.0 }
  0xb5   : > { %v402_v51 = vmax.f32 %v366_v47, 0.0  ;;  %v406_v52 = vmax.f32 %v376_v48, 0.0 }
  0xb6   : > { %v425_v53 = vpack.c.bf16 %v409_v49, %v409_v49  ;;  %v429_v54 = vpack.c.bf16 %v413_v50, %v413_v50 }
  0xb7   : > { %v418_v55 = vpack.c.bf16 %v402_v51, %v402_v51  ;;  %v422_v56 = vpack.c.bf16 %v406_v52, %v406_v52 }
  0xb8   : > { %442 = vst.msk [vmem:[%s777_s8 + $0x24] sm:$0xf] %vm432_vm2, %v425_v53 }
  0xb9   : > { %446 = vst.msk [vmem:[%s777_s8 + $0x34] sm:$0xf] %vm432_vm2, %v429_v54  ;;  %v385_v57 = vpop.f32.mrf.mxu2  ;;  %v395_v58 = vpop.f32.mrf.mxu3 }
  0xba   : > { %435 = vst.msk [vmem:[%s777_s8 + $0x8] sm:$0xf] %vm432_vm2, %v418_v55  ;;  %v386_v59 = vadd.f32 %v768_v16, %v385_v57  ;;  %v396_v60 = vadd.f32 %v768_v16, %v395_v58  ;;  %v367_v61 = vpop.f32.mrf.mxu0  ;;  %v377_v62 = vpop.f32.mrf.mxu1 }
  0xbb   : > { %439 = vst.msk [vmem:[%s777_s8 + $0x18] sm:$0xf] %vm432_vm2, %v422_v56  ;;  %v368_v63 = vadd.f32 %v768_v16, %v367_v61  ;;  %v378_v0 = vadd.f32 %v768_v16, %v377_v62 }
  0xbc   : > { %v410_v1 = vmax.f32 %v386_v59, 0.0  ;;  %v414_v2 = vmax.f32 %v396_v60, 0.0 }
  0xbd   : > { %v403_v3 = vmax.f32 %v368_v63, 0.0  ;;  %v407_v4 = vmax.f32 %v378_v0, 0.0 }
  0xbe   : > { %v426_v5 = vpack.c.bf16 %v410_v1, %v410_v1  ;;  %v430_v6 = vpack.c.bf16 %v414_v2, %v414_v2 }
  0xbf   : > { %v419_v7 = vpack.c.bf16 %v403_v3, %v403_v3  ;;  %v423_v8 = vpack.c.bf16 %v407_v4, %v407_v4 }
  0xc0   : > { %443 = vst.msk [vmem:[%s777_s8 + $0x28] sm:$0xf] %vm432_vm2, %v426_v5 }
  0xc1   : > { %447 = vst.msk [vmem:[%s777_s8 + $0x38] sm:$0xf] %vm432_vm2, %v430_v6  ;;  %v387_v9 = vpop.f32.mrf.mxu2  ;;  %v397_v10 = vpop.f32.mrf.mxu3 }
  0xc2   : > { %436 = vst.msk [vmem:[%s777_s8 + $0xc] sm:$0xf] %vm432_vm2, %v419_v7  ;;  %v388_v11 = vadd.f32 %v768_v16, %v387_v9  ;;  %v398_v12 = vadd.f32 %v768_v16, %v397_v10 }
  0xc3   : > { %440 = vst.msk [vmem:[%s777_s8 + $0x1c] sm:$0xf] %vm432_vm2, %v423_v8 }
  0xc4   : > { %v411_v13 = vmax.f32 %v388_v11, 0.0  ;;  %v415_v14 = vmax.f32 %v398_v12, 0.0 }
  0xc6   : > { %v427_v15 = vpack.c.bf16 %v411_v13, %v411_v13  ;;  %v431_v17 = vpack.c.bf16 %v415_v14, %v415_v14 }
  0xc8   : > { %444 = vst.msk [vmem:[%s777_s8 + $0x2c] sm:$0xf] %vm432_vm2, %v427_v15 }
  0xc9   : > { %448 = vst.msk [vmem:[%s777_s8 + $0x3c] sm:$0xf] %vm432_vm2, %v431_v17 }
  0xca PF: > { %s13_s14 = sadd.s32 1, %s694_s14   ;;  %s838_s12 = smov %s690_s13 }
  0xcb   : > { %p10_p5 = scmp.ge.s32.totalorder %s13_s14, 6   ;;  %s839_s13 = smov %s841_s15 }
  0xcd   :  { %12 = sbr.rel (!%p10_p5) target bundleno = 2 (0x2), region = 68 }

// kernel: _lambda_.19
= control target key start
LH: loop header
LB: loop body
LE: loop exit
PB: predicated region body
PF: predicated region fallthrough
CT: control target
= control target key end

     0   :  { %s885_s15 = smov 0   ;;  %s887_s16 = smov 0   ;;  %s1014_s0 = inlined_call_operand.vmem [shape: bf16[512,72], index: 0, kind: input, shape index: {}]   ;;  %s1015_s1 = inlined_call_operand.vmem [shape: bf16[72,8], index: 1, kind: input, shape index: {}]   ;;  %s1016_s2 = inlined_call_operand.vmem [shape: f32[1,8], index: 2, kind: input, shape index: {}]   ;;  %s1017_s3 = inlined_call_operand.vmem [shape: bf16[512,8], index: 3, kind: input, shape index: {}]   ;;  %s1018_s4 = inlined_call_operand.vmem [shape: bf16[512,8], index: 4, kind: output, shape index: {}]  }
   0x1   :  { %s889_s17 = smov 0  }
   0x2 LB: > { %s26_s18 = sadd.s32 1, %s854_s16  ;;  %p680_p0 = scmp.ge.s32.totalorder %s858_s17, 1  ;;  %s858_s17 = sphi %s889_s17, %s14_s17   ;;  %s854_s16 = sphi %s887_s16, %s1020_s16   ;;  %s850_s15 = sphi %s885_s15, %s1019_s15  }
   0x3   : > { %p28_p1 = scmp.ge.s32.totalorder %s26_s18, 4  ;;  %p210_p2 = scmp.lt.s32.totalorder %s858_s17, 5 }
   0x5   : > { %s1022_s18 = smov (%p28_p1, %s26_s18), 0  ;;  %p211_p3 = pnand %p680_p0, %p210_p2 }
   0x6   : > { %s681_s21 = sshll.u32 (!%p211_p3), %s850_s15, 4 }
   0x7   : > { %214 = sbr.rel (%p211_p3) target bundleno = 204 (0xcc), region = 36  ;;  %p255_p4 = scmp.lt.s32.totalorder (!%p211_p3), %s681_s21, 63 }
   0xc   : > { %v310_v0 = vld [vmem:[%s1015_s1 + $0x20] sm:$0xf]  ;;  %vm407_vm0 = vcmask 1043456   ;;  %v756_v4 = vld [vmem:[%s1015_s1 + $0x18] sm:$0xff]  ;;  %v755_v5 = vld [vmem:[%s1015_s1 + $0x10] sm:$0xff]  ;;  %s1024_s21 = smov (!%p255_p4, %s681_s21), 63 }
   0xd   : > { %v372_v1 = vunpack.c.l.b16 %v310_v0  ;;  %v754_v6 = vld [vmem:[%s1015_s1 + $0x8] sm:$0xff]  ;;  %s915_s28 = sshll.u32 %s1024_s21, 2  ;;  %v753_v7 = vld [vmem:[%s1015_s1] sm:$0xff]  ;;  %vm382_vm1 = vcmask 588800   ;;  %vm540_vm2 = vcmask 60416  }
   0xe   : > { %s258_s7 = scalar_lea.vmem %s1014_s0, %s915_s28  ;;  %s936_s10 = scalar_lea.vmem %s1017_s3, %s915_s28  ;;  %v943_v18 = vld [vmem:[%s1016_s2] ss:$0 sm:$0xff] }
   0xf   : > { %v377_v2 = vpack.c.b16 %v372_v1, %v372_v1  ;;  %v745_v8 = vld [vmem:[%s258_s7] sm:$0xff]  ;;  %v747_v9 = vld [vmem:[%s258_s7 + $0x10] sm:$0xff]  ;;  %v746_v12 = vld [vmem:[%s258_s7 + $0x8] sm:$0xff]  ;;  %s953_s15 = scalar_lea.vmem %s1018_s4, %s915_s28 }
  0x10   : > { %v749_v10 = vld [vmem:[%s258_s7 + $0x20] sm:$0xff]  ;;  %v751_v11 = vld [vmem:[%s258_s7 + $0x30] sm:$0xff]  ;;  %v748_v13 = vld [vmem:[%s258_s7 + $0x18] sm:$0xff] }
  0x11   : > { %v409_v3 = vsel %vm407_vm0, %v377_v2, 0  ;;  %v750_v14 = vld [vmem:[%s258_s7 + $0x28] sm:$0xff]  ;;  %v752_v15 = vld [vmem:[%s258_s7 + $0x38] sm:$0xff]  ;;  %v758_v16 = vld [vmem:[%s936_s10] sm:$0xff]  }
  0x12   : > { %414 = vmatpush.bf16.msra.mxu0 %v409_v3  ;;  %796 = vmatpush.bf16.msra.mxu1 %v409_v3  ;;  %v790_v17 = vld [vmem:[%s936_s10 + $0x10] sm:$0xff]   ;;  %v759_v19 = vunpack.c.l.bf16 %v758_v16  ;;  %v792_v27 = vld [vmem:[%s936_s10 + $0x20] sm:$0xff]   ;;  %v760_v37 = vunpack.c.h.bf16 %v758_v16  ;;  %v789_v51 = vld [vmem:[%s936_s10 + $0x8] sm:$0xff]  }
  0x13   : > { %797 = vmatpush.bf16.msra.mxu2 %v409_v3  ;;  %798 = vmatpush.bf16.msra.mxu3 %v409_v3  ;;  %v767_v20 = vunpack.c.l.bf16 %v790_v17  ;;  %v794_v28 = vld [vmem:[%s936_s10 + $0x30] sm:$0xff]   ;;  %v775_v31 = vunpack.c.l.bf16 %v792_v27  ;;  %v768_v38 = vunpack.c.h.bf16 %v790_v17  ;;  %v791_v52 = vld [vmem:[%s936_s10 + $0x18] sm:$0xff]   ;;  %v776_v57 = vunpack.c.h.bf16 %v792_v27 }
  0x14   : > { %v783_v32 = vunpack.c.l.bf16 %v794_v28  ;;  %v784_v58 = vunpack.c.h.bf16 %v794_v28  ;;  %v763_v63 = vunpack.c.l.bf16 %v789_v51  ;;  %v771_v0 = vunpack.c.l.bf16 %v791_v52 }
  0x15   : > { %v772_v27 = vunpack.c.h.bf16 %v791_v52 }
  0x16   : > { %415 = vmatpush.bf16.msra.mxu0 %v756_v4  ;;  %799 = vmatpush.bf16.msra.mxu1 %v756_v4 }
  0x17   : > { %800 = vmatpush.bf16.msra.mxu2 %v756_v4  ;;  %801 = vmatpush.bf16.msra.mxu3 %v756_v4 }
  0x1a   : > { %416 = vmatpush.bf16.msra.mxu0 %v755_v5  ;;  %802 = vmatpush.bf16.msra.mxu1 %v755_v5 }
  0x1b   : > { %803 = vmatpush.bf16.msra.mxu2 %v755_v5  ;;  %804 = vmatpush.bf16.msra.mxu3 %v755_v5 }
  0x1e   : > { %417 = vmatpush.bf16.msra.mxu0 %v754_v6  ;;  %805 = vmatpush.bf16.msra.mxu1 %v754_v6 }
  0x1f   : > { %806 = vmatpush.bf16.msra.mxu2 %v754_v6  ;;  %807 = vmatpush.bf16.msra.mxu3 %v754_v6 }
  0x22   : > { %418 = vmatpush.bf16.msra.mxu0 %v753_v7  ;;  %808 = vmatpush.bf16.msra.mxu1 %v753_v7 }
  0x23   : > { %809 = vmatpush.bf16.msra.mxu2 %v753_v7  ;;  %810 = vmatpush.bf16.msra.mxu3 %v753_v7 }
  0x25   : > { %735 = vmatmul.msk.bf16.vlgmr.msra.gmra.mxu0 %vm382_vm1, %v745_v8  ;;  %737 = vmatmul.msk.bf16.vlgmr.msra.gmra.mxu1 %vm382_vm1, %v747_v9 }
  0x26   : > { %739 = vmatmul.msk.bf16.vlgmr.msra.gmra.mxu2 %vm382_vm1, %v749_v10  ;;  %741 = vmatmul.msk.bf16.vlgmr.msra.gmra.mxu3 %vm382_vm1, %v751_v11  ;;  %v793_v11 = vld [vmem:[%s936_s10 + $0x28] sm:$0xff]  }
  0x35   : > { %736 = vmatmul.msk.bf16.gmra.mxu0 %vm382_vm1, %v746_v12  ;;  %738 = vmatmul.msk.bf16.gmra.mxu1 %vm382_vm1, %v748_v13  ;;  %v795_v12 = vld [vmem:[%s936_s10 + $0x38] sm:$0xff]  }
  0x36   : > { %740 = vmatmul.msk.bf16.gmra.mxu2 %vm382_vm1, %v750_v14  ;;  %742 = vmatmul.msk.bf16.gmra.mxu3 %vm382_vm1, %v752_v15 }
  0xa2   : > { %v420_v21 = vpop.f32.mrf.mxu0  ;;  %v430_v22 = vpop.f32.mrf.mxu1 }
  0xa3   : > { %v421_v23 = vadd.f32 %v943_v18, %v420_v21  ;;  %v431_v24 = vadd.f32 %v943_v18, %v430_v22  ;;  %v787_v21 = vunpack.c.l.bf16 %v795_v12 }
  0xa5   : > { %v492_v25 = vadd.f32 %v759_v19, %v421_v23  ;;  %v496_v26 = vadd.f32 %v767_v20, %v431_v24  ;;  %v779_v20 = vunpack.c.l.bf16 %v793_v11 }
  0xa7   : > { %v508_v29 = vmax.f32 %v492_v25, 0.0  ;;  %v512_v30 = vmax.f32 %v496_v26, 0.0  ;;  %v764_v26 = vunpack.c.h.bf16 %v789_v51 }
  0xa9   : > { %v524_v33 = vpack.c.bf16 %v508_v29, %v508_v29  ;;  %v528_v34 = vpack.c.bf16 %v512_v30, %v512_v30  ;;  %v440_v35 = vpop.f32.mrf.mxu2  ;;  %v450_v36 = vpop.f32.mrf.mxu3 }
  0xaa   : > { %v441_v39 = vadd.f32 %v943_v18, %v440_v35  ;;  %v451_v40 = vadd.f32 %v943_v18, %v450_v36  ;;  %v422_v41 = vpop.f32.mrf.mxu0  ;;  %v432_v42 = vpop.f32.mrf.mxu1 }
  0xab   : > { %541 = vst.msk [vmem:[%s953_s15] sm:$0xf] %vm540_vm2, %v524_v33  ;;  %v423_v43 = vadd.f32 %v943_v18, %v422_v41  ;;  %v433_v44 = vadd.f32 %v943_v18, %v432_v42 }
  0xac   : > { %545 = vst.msk [vmem:[%s953_s15 + $0x10] sm:$0xf] %vm540_vm2, %v528_v34  ;;  %v500_v45 = vadd.f32 %v775_v31, %v441_v39  ;;  %v504_v46 = vadd.f32 %v783_v32, %v451_v40 }
  0xad   : > { %v493_v47 = vadd.f32 %v760_v37, %v423_v43  ;;  %v497_v48 = vadd.f32 %v768_v38, %v433_v44  ;;  %v780_v44 = vunpack.c.h.bf16 %v793_v11 }
  0xae   : > { %v516_v49 = vmax.f32 %v500_v45, 0.0  ;;  %v520_v50 = vmax.f32 %v504_v46, 0.0  ;;  %v788_v45 = vunpack.c.h.bf16 %v795_v12 }
  0xaf   : > { %v509_v53 = vmax.f32 %v493_v47, 0.0  ;;  %v513_v54 = vmax.f32 %v497_v48, 0.0 }
  0xb0   : > { %v532_v55 = vpack.c.bf16 %v516_v49, %v516_v49  ;;  %v536_v56 = vpack.c.bf16 %v520_v50, %v520_v50 }
  0xb1   : > { %v525_v59 = vpack.c.bf16 %v509_v53, %v509_v53  ;;  %v529_v60 = vpack.c.bf16 %v513_v54, %v513_v54  ;;  %v442_v61 = vpop.f32.mrf.mxu2  ;;  %v452_v62 = vpop.f32.mrf.mxu3 }
  0xb2   : > { %549 = vst.msk [vmem:[%s953_s15 + $0x20] sm:$0xf] %vm540_vm2, %v532_v55  ;;  %v443_v1 = vadd.f32 %v943_v18, %v442_v61  ;;  %v453_v2 = vadd.f32 %v943_v18, %v452_v62  ;;  %v425_v3 = vpop.f32.mrf.mxu0  ;;  %v435_v4 = vpop.f32.mrf.mxu1 }
  0xb3   : > { %553 = vst.msk [vmem:[%s953_s15 + $0x30] sm:$0xf] %vm540_vm2, %v536_v56  ;;  %v426_v5 = vadd.f32 %v943_v18, %v425_v3  ;;  %v436_v6 = vadd.f32 %v943_v18, %v435_v4 }
  0xb4   : > { %542 = vst.msk [vmem:[%s953_s15 + $0x4] sm:$0xf] %vm540_vm2, %v525_v59  ;;  %v501_v7 = vadd.f32 %v776_v57, %v443_v1  ;;  %v505_v8 = vadd.f32 %v784_v58, %v453_v2 }
  0xb5   : > { %546 = vst.msk [vmem:[%s953_s15 + $0x14] sm:$0xf] %vm540_vm2, %v529_v60  ;;  %v494_v9 = vadd.f32 %v763_v63, %v426_v5  ;;  %v498_v10 = vadd.f32 %v771_v0, %v436_v6 }
  0xb6   : > { %v517_v13 = vmax.f32 %v501_v7, 0.0  ;;  %v521_v14 = vmax.f32 %v505_v8, 0.0 }
  0xb7   : > { %v510_v15 = vmax.f32 %v494_v9, 0.0  ;;  %v514_v16 = vmax.f32 %v498_v10, 0.0 }
  0xb8   : > { %v533_v17 = vpack.c.bf16 %v517_v13, %v517_v13  ;;  %v537_v19 = vpack.c.bf16 %v521_v14, %v521_v14 }
  0xb9   : > { %v526_v22 = vpack.c.bf16 %v510_v15, %v510_v15  ;;  %v530_v23 = vpack.c.bf16 %v514_v16, %v514_v16  ;;  %v445_v24 = vpop.f32.mrf.mxu2  ;;  %v455_v25 = vpop.f32.mrf.mxu3 }
  0xba   : > { %550 = vst.msk [vmem:[%s953_s15 + $0x24] sm:$0xf] %vm540_vm2, %v533_v17  ;;  %v446_v28 = vadd.f32 %v943_v18, %v445_v24  ;;  %v456_v29 = vadd.f32 %v943_v18, %v455_v25  ;;  %v427_v30 = vpop.f32.mrf.mxu0  ;;  %v437_v31 = vpop.f32.mrf.mxu1 }
  0xbb   : > { %554 = vst.msk [vmem:[%s953_s15 + $0x34] sm:$0xf] %vm540_vm2, %v537_v19  ;;  %v428_v32 = vadd.f32 %v943_v18, %v427_v30  ;;  %v438_v33 = vadd.f32 %v943_v18, %v437_v31 }
  0xbc   : > { %543 = vst.msk [vmem:[%s953_s15 + $0x8] sm:$0xf] %vm540_vm2, %v526_v22  ;;  %v502_v34 = vadd.f32 %v779_v20, %v446_v28  ;;  %v506_v35 = vadd.f32 %v787_v21, %v456_v29 }
  0xbd   : > { %547 = vst.msk [vmem:[%s953_s15 + $0x18] sm:$0xf] %vm540_vm2, %v530_v23  ;;  %v495_v36 = vadd.f32 %v764_v26, %v428_v32  ;;  %v499_v37 = vadd.f32 %v772_v27, %v438_v33 }
  0xbe   : > { %v518_v38 = vmax.f32 %v502_v34, 0.0  ;;  %v522_v39 = vmax.f32 %v506_v35, 0.0 }
  0xbf   : > { %v511_v40 = vmax.f32 %v495_v36, 0.0  ;;  %v515_v41 = vmax.f32 %v499_v37, 0.0 }
  0xc0   : > { %v534_v42 = vpack.c.bf16 %v518_v38, %v518_v38  ;;  %v538_v43 = vpack.c.bf16 %v522_v39, %v522_v39 }
  0xc1   : > { %v527_v46 = vpack.c.bf16 %v511_v40, %v511_v40  ;;  %v531_v47 = vpack.c.bf16 %v515_v41, %v515_v41  ;;  %v447_v48 = vpop.f32.mrf.mxu2  ;;  %v457_v49 = vpop.f32.mrf.mxu3 }
  0xc2   : > { %551 = vst.msk [vmem:[%s953_s15 + $0x28] sm:$0xf] %vm540_vm2, %v534_v42  ;;  %v448_v50 = vadd.f32 %v943_v18, %v447_v48  ;;  %v458_v51 = vadd.f32 %v943_v18, %v457_v49 }
  0xc3   : > { %555 = vst.msk [vmem:[%s953_s15 + $0x38] sm:$0xf] %vm540_vm2, %v538_v43 }
  0xc4   : > { %544 = vst.msk [vmem:[%s953_s15 + $0xc] sm:$0xf] %vm540_vm2, %v527_v46  ;;  %v503_v52 = vadd.f32 %v780_v44, %v448_v50  ;;  %v507_v53 = vadd.f32 %v788_v45, %v458_v51 }
  0xc5   : > { %548 = vst.msk [vmem:[%s953_s15 + $0x1c] sm:$0xf] %vm540_vm2, %v531_v47 }
  0xc6   : > { %v519_v54 = vmax.f32 %v503_v52, 0.0  ;;  %v523_v55 = vmax.f32 %v507_v53, 0.0 }
  0xc8   : > { %v535_v56 = vpack.c.bf16 %v519_v54, %v519_v54  ;;  %v539_v57 = vpack.c.bf16 %v523_v55, %v523_v55 }
  0xca   : > { %552 = vst.msk [vmem:[%s953_s15 + $0x2c] sm:$0xf] %vm540_vm2, %v535_v56 }
  0xcb   : > { %556 = vst.msk [vmem:[%s953_s15 + $0x3c] sm:$0xf] %vm540_vm2, %v539_v57 }
  0xcc PF: > { %s14_s17 = sadd.s32 1, %s858_s17   ;;  %s1019_s15 = smov %s854_s16 }
  0xcd   : > { %p11_p5 = scmp.ge.s32.totalorder %s14_s17, 6   ;;  %s1020_s16 = smov %s1022_s18 }
  0xcf   :  { %13 = sbr.rel (!%p11_p5) target bundleno = 2 (0x2), region = 75 }

// kernel: _lambda_.22
= control target key start
LH: loop header
LB: loop body
LE: loop exit
PB: predicated region body
PF: predicated region fallthrough
CT: control target
= control target key end

     0   :  { %vm139_vm0 = vcmask 1043456   ;;  %vm114_vm1 = vcmask 588800   ;;  %v351_v17 = vmov 0   ;;  %vm245_vm4 = vcmask 257024   ;;  %s548_s1 = inlined_call_operand.vmem [shape: bf16[72,32], index: 1, kind: input, shape index: {}]   ;;  %s549_s2 = inlined_call_operand.vmem [shape: f32[1,32], index: 2, kind: input, shape index: {}]   ;;  %s550_s0 = inlined_call_operand.vmem [shape: bf16[128,72], index: 0, kind: input, shape index: {}]   ;;  %s551_s3 = inlined_call_operand.vmem [shape: f32[1,32], index: 3, kind: input, shape index: {}]   ;;  %s552_s4 = inlined_call_operand.vmem [shape: bf16[128,32], index: 4, kind: output, shape index: {}]  }
   0x1   :  { %v42_v0 = vld [vmem:[%s548_s1 + $0x20] sm:$0xf]  ;;  %v333_v4 = vld [vmem:[%s548_s1 + $0x18] sm:$0xff]  ;;  %v332_v5 = vld [vmem:[%s548_s1 + $0x10] sm:$0xff] }
   0x2   :  { %v104_v1 = vunpack.c.l.b16 %v42_v0  ;;  %v331_v6 = vld [vmem:[%s548_s1 + $0x8] sm:$0xff]  ;;  %v330_v7 = vld [vmem:[%s548_s1] sm:$0xff]  ;;  %v324_v9 = vld [vmem:[%s550_s0 + $0x10] sm:$0xff] }
   0x3   :  { %v322_v8 = vld [vmem:[%s550_s0] sm:$0xff]  ;;  %v328_v11 = vld [vmem:[%s550_s0 + $0x30] sm:$0xff]  ;;  %v323_v12 = vld [vmem:[%s550_s0 + $0x8] sm:$0xff] }
   0x4   :  { %v109_v2 = vpack.c.b16 %v104_v1, %v104_v1  ;;  %v326_v10 = vld [vmem:[%s550_s0 + $0x20] sm:$0xff]  ;;  %v325_v13 = vld [vmem:[%s550_s0 + $0x18] sm:$0xff]  ;;  %v327_v14 = vld [vmem:[%s550_s0 + $0x28] sm:$0xff] }
   0x5   :  { %v329_v15 = vld [vmem:[%s550_s0 + $0x38] sm:$0xff]  ;;  %v192_v16 = vld [vmem:[%s551_s3] sm:$0x1] }
   0x6   :  { %v141_v3 = vsel %vm139_vm0, %v109_v2, 0  ;;  %vm193_vm2 = vcmp.gt.f32.partialorder %v192_v16, 0.0  ;;  %v430_v19 = vld [vmem:[%s549_s2] ss:$0 sm:$0xff] }
   0x7   :  { %146 = vmatpush.bf16.msra.mxu0 %v141_v3  ;;  %334 = vmatpush.bf16.msra.mxu1 %v141_v3  ;;  %v210_v18 = vsel %vm193_vm2, 1, %v351_v17 }
   0x8   :  { %335 = vmatpush.bf16.msra.mxu2 %v141_v3  ;;  %336 = vmatpush.bf16.msra.mxu3 %v141_v3  ;;  %v211_v20 = vperm.slane %v210_v18, 0 }
   0xa   :  { %vm434_vm3 = vcmp.eq.s32.totalorder %v211_v20, 1 }
   0xb   :  { %147 = vmatpush.bf16.msra.mxu0 %v333_v4  ;;  %337 = vmatpush.bf16.msra.mxu1 %v333_v4 }
   0xc   :  { %338 = vmatpush.bf16.msra.mxu2 %v333_v4  ;;  %339 = vmatpush.bf16.msra.mxu3 %v333_v4 }
   0xf   :  { %148 = vmatpush.bf16.msra.mxu0 %v332_v5  ;;  %340 = vmatpush.bf16.msra.mxu1 %v332_v5 }
  0x10   :  { %341 = vmatpush.bf16.msra.mxu2 %v332_v5  ;;  %342 = vmatpush.bf16.msra.mxu3 %v332_v5 }
  0x13   :  { %149 = vmatpush.bf16.msra.mxu0 %v331_v6  ;;  %343 = vmatpush.bf16.msra.mxu1 %v331_v6 }
  0x14   :  { %344 = vmatpush.bf16.msra.mxu2 %v331_v6  ;;  %345 = vmatpush.bf16.msra.mxu3 %v331_v6 }
  0x17   :  { %150 = vmatpush.bf16.msra.mxu0 %v330_v7  ;;  %346 = vmatpush.bf16.msra.mxu1 %v330_v7 }
  0x18   :  { %347 = vmatpush.bf16.msra.mxu2 %v330_v7  ;;  %348 = vmatpush.bf16.msra.mxu3 %v330_v7 }
  0x1a   :  { %314 = vmatmul.msk.bf16.vlgmr.msra.gmra.mxu0 %vm114_vm1, %v322_v8  ;;  %316 = vmatmul.msk.bf16.vlgmr.msra.gmra.mxu1 %vm114_vm1, %v324_v9 }
  0x1b   :  { %318 = vmatmul.msk.bf16.vlgmr.msra.gmra.mxu2 %vm114_vm1, %v326_v10  ;;  %320 = vmatmul.msk.bf16.vlgmr.msra.gmra.mxu3 %vm114_vm1, %v328_v11 }
  0x2a   :  { %315 = vmatmul.msk.bf16.gmra.mxu0 %vm114_vm1, %v323_v12  ;;  %317 = vmatmul.msk.bf16.gmra.mxu1 %vm114_vm1, %v325_v13 }
  0x2b   :  { %319 = vmatmul.msk.bf16.gmra.mxu2 %vm114_vm1, %v327_v14  ;;  %321 = vmatmul.msk.bf16.gmra.mxu3 %vm114_vm1, %v329_v15 }
  0x97   :  { %v152_v21 = vpop.f32.mrf.mxu0  ;;  %v162_v22 = vpop.f32.mrf.mxu1 }
  0x98   :  { %v153_v23 = vadd.f32 %v430_v19, %v152_v21  ;;  %v163_v24 = vadd.f32 %v430_v19, %v162_v22 }
  0x9a   :  { %v194_v26 = vmax.f32 %v153_v23, 0.0  ;;  %v198_v27 = vmax.f32 %v163_v24, 0.0 }
  0x9c   :  { %v213_v28 = vsel %vm434_vm3, %v194_v26, %v153_v23  ;;  %v217_v29 = vsel %vm434_vm3, %v198_v27, %v163_v24 }
  0x9d   :  { %v229_v30 = vpack.c.bf16 %v213_v28, %v213_v28  ;;  %v233_v31 = vpack.c.bf16 %v217_v29, %v217_v29 }
  0x9e   :  { %v172_v32 = vpop.f32.mrf.mxu2  ;;  %v182_v33 = vpop.f32.mrf.mxu3 }
  0x9f   :  { %246 = vst.msk [vmem:[%s552_s4] sm:$0xf] %vm245_vm4, %v229_v30  ;;  %v173_v34 = vadd.f32 %v430_v19, %v172_v32  ;;  %v183_v35 = vadd.f32 %v430_v19, %v182_v33  ;;  %v154_v36 = vpop.f32.mrf.mxu0  ;;  %v164_v37 = vpop.f32.mrf.mxu1 }
  0xa0   :  { %250 = vst.msk [vmem:[%s552_s4 + $0x10] sm:$0xf] %vm245_vm4, %v233_v31  ;;  %v155_v38 = vadd.f32 %v430_v19, %v154_v36  ;;  %v165_v39 = vadd.f32 %v430_v19, %v164_v37 }
  0xa1   :  { %v202_v40 = vmax.f32 %v173_v34, 0.0  ;;  %v206_v41 = vmax.f32 %v183_v35, 0.0 }
  0xa2   :  { %v195_v42 = vmax.f32 %v155_v38, 0.0  ;;  %v199_v43 = vmax.f32 %v165_v39, 0.0 }
  0xa3   :  { %v221_v44 = vsel %vm434_vm3, %v202_v40, %v173_v34  ;;  %v225_v45 = vsel %vm434_vm3, %v206_v41, %v183_v35 }
  0xa4   :  { %v237_v46 = vpack.c.bf16 %v221_v44, %v221_v44  ;;  %v241_v47 = vpack.c.bf16 %v225_v45, %v225_v45  ;;  %v214_v48 = vsel %vm434_vm3, %v195_v42, %v155_v38  ;;  %v218_v49 = vsel %vm434_vm3, %v199_v43, %v165_v39 }
  0xa5   :  { %v230_v50 = vpack.c.bf16 %v214_v48, %v214_v48  ;;  %v234_v51 = vpack.c.bf16 %v218_v49, %v218_v49 }
  0xa6   :  { %254 = vst.msk [vmem:[%s552_s4 + $0x20] sm:$0xf] %vm245_vm4, %v237_v46  ;;  %v174_v52 = vpop.f32.mrf.mxu2  ;;  %v184_v53 = vpop.f32.mrf.mxu3 }
  0xa7   :  { %258 = vst.msk [vmem:[%s552_s4 + $0x30] sm:$0xf] %vm245_vm4, %v241_v47  ;;  %v175_v54 = vadd.f32 %v430_v19, %v174_v52  ;;  %v185_v55 = vadd.f32 %v430_v19, %v184_v53  ;;  %v157_v56 = vpop.f32.mrf.mxu0  ;;  %v167_v57 = vpop.f32.mrf.mxu1 }
  0xa8   :  { %247 = vst.msk [vmem:[%s552_s4 + $0x4] sm:$0xf] %vm245_vm4, %v230_v50  ;;  %v158_v58 = vadd.f32 %v430_v19, %v157_v56  ;;  %v168_v59 = vadd.f32 %v430_v19, %v167_v57 }
  0xa9   :  { %251 = vst.msk [vmem:[%s552_s4 + $0x14] sm:$0xf] %vm245_vm4, %v234_v51  ;;  %v203_v60 = vmax.f32 %v175_v54, 0.0  ;;  %v207_v61 = vmax.f32 %v185_v55, 0.0 }
  0xaa   :  { %v196_v62 = vmax.f32 %v158_v58, 0.0  ;;  %v200_v63 = vmax.f32 %v168_v59, 0.0 }
  0xab   :  { %v222_v0 = vsel %vm434_vm3, %v203_v60, %v175_v54  ;;  %v226_v1 = vsel %vm434_vm3, %v207_v61, %v185_v55 }
  0xac   :  { %v238_v2 = vpack.c.bf16 %v222_v0, %v222_v0  ;;  %v242_v3 = vpack.c.bf16 %v226_v1, %v226_v1  ;;  %v215_v4 = vsel %vm434_vm3, %v196_v62, %v158_v58  ;;  %v219_v5 = vsel %vm434_vm3, %v200_v63, %v168_v59 }
  0xad   :  { %v231_v6 = vpack.c.bf16 %v215_v4, %v215_v4  ;;  %v235_v7 = vpack.c.bf16 %v219_v5, %v219_v5 }
  0xae   :  { %255 = vst.msk [vmem:[%s552_s4 + $0x24] sm:$0xf] %vm245_vm4, %v238_v2  ;;  %v177_v8 = vpop.f32.mrf.mxu2  ;;  %v187_v9 = vpop.f32.mrf.mxu3 }
  0xaf   :  { %259 = vst.msk [vmem:[%s552_s4 + $0x34] sm:$0xf] %vm245_vm4, %v242_v3  ;;  %v178_v10 = vadd.f32 %v430_v19, %v177_v8  ;;  %v188_v11 = vadd.f32 %v430_v19, %v187_v9  ;;  %v159_v12 = vpop.f32.mrf.mxu0  ;;  %v169_v13 = vpop.f32.mrf.mxu1 }
  0xb0   :  { %248 = vst.msk [vmem:[%s552_s4 + $0x8] sm:$0xf] %vm245_vm4, %v231_v6  ;;  %v160_v14 = vadd.f32 %v430_v19, %v159_v12  ;;  %v170_v15 = vadd.f32 %v430_v19, %v169_v13 }
  0xb1   :  { %252 = vst.msk [vmem:[%s552_s4 + $0x18] sm:$0xf] %vm245_vm4, %v235_v7  ;;  %v204_v16 = vmax.f32 %v178_v10, 0.0  ;;  %v208_v17 = vmax.f32 %v188_v11, 0.0 }
  0xb2   :  { %v197_v18 = vmax.f32 %v160_v14, 0.0  ;;  %v201_v20 = vmax.f32 %v170_v15, 0.0 }
  0xb3   :  { %v223_v21 = vsel %vm434_vm3, %v204_v16, %v178_v10  ;;  %v227_v22 = vsel %vm434_vm3, %v208_v17, %v188_v11 }
  0xb4   :  { %v239_v23 = vpack.c.bf16 %v223_v21, %v223_v21  ;;  %v243_v24 = vpack.c.bf16 %v227_v22, %v227_v22  ;;  %v216_v26 = vsel %vm434_vm3, %v197_v18, %v160_v14  ;;  %v220_v27 = vsel %vm434_vm3, %v201_v20, %v170_v15 }
  0xb5   :  { %v232_v28 = vpack.c.bf16 %v216_v26, %v216_v26  ;;  %v236_v29 = vpack.c.bf16 %v220_v27, %v220_v27 }
  0xb6   :  { %256 = vst.msk [vmem:[%s552_s4 + $0x28] sm:$0xf] %vm245_vm4, %v239_v23  ;;  %v179_v30 = vpop.f32.mrf.mxu2  ;;  %v189_v31 = vpop.f32.mrf.mxu3 }
  0xb7   :  { %260 = vst.msk [vmem:[%s552_s4 + $0x38] sm:$0xf] %vm245_vm4, %v243_v24  ;;  %v180_v32 = vadd.f32 %v430_v19, %v179_v30  ;;  %v190_v33 = vadd.f32 %v430_v19, %v189_v31 }
  0xb8   :  { %249 = vst.msk [vmem:[%s552_s4 + $0xc] sm:$0xf] %vm245_vm4, %v232_v28 }
  0xb9   :  { %253 = vst.msk [vmem:[%s552_s4 + $0x1c] sm:$0xf] %vm245_vm4, %v236_v29  ;;  %v205_v34 = vmax.f32 %v180_v32, 0.0  ;;  %v209_v35 = vmax.f32 %v190_v33, 0.0 }
  0xbb   :  { %v224_v36 = vsel %vm434_vm3, %v205_v34, %v180_v32  ;;  %v228_v37 = vsel %vm434_vm3, %v209_v35, %v190_v33 }
  0xbc   :  { %v240_v38 = vpack.c.bf16 %v224_v36, %v224_v36  ;;  %v244_v19 = vpack.c.bf16 %v228_v37, %v228_v37 }
  0xbe   :  { %257 = vst.msk [vmem:[%s552_s4 + $0x2c] sm:$0xf] %vm245_vm4, %v240_v38 }
  0xbf   :  { %261 = vst.msk [vmem:[%s552_s4 + $0x3c] sm:$0xf] %vm245_vm4, %v244_v19 }

// kernel: _lambda_.23
= control target key start
LH: loop header
LB: loop body
LE: loop exit
PB: predicated region body
PF: predicated region fallthrough
CT: control target
= control target key end

     0   :  { %vm182_vm0 = vcmask 130048   ;;  %vm385_vm1 = vcmask 125952   ;;  %s865_s1 = inlined_call_operand.vmem [shape: bf16[144,16], index: 1, kind: input, shape index: {}]   ;;  %s866_s0 = inlined_call_operand.vmem [shape: bf16[128,144], index: 0, kind: input, shape index: {}]   ;;  %s867_s2 = inlined_call_operand.vmem [shape: f32[1,16], index: 2, kind: input, shape index: {}]   ;;  %s868_s3 = inlined_call_operand.vmem [shape: bf16[128,16], index: 3, kind: input, shape index: {}]   ;;  %s869_s4 = inlined_call_operand.vmem [shape: bf16[128,16], index: 4, kind: output, shape index: {}]  }
   0x1   :  { %v537_v0 = vld [vmem:[%s865_s1 + $0x38] sm:$0xff]  ;;  %v538_v1 = vld [vmem:[%s865_s1 + $0x40] sm:$0xff]  ;;  %v410_v3 = vld [vmem:[%s866_s0 + $0x8] sm:$0xf0] }
   0x2   :  { %v514_v2 = vld [vmem:[%s866_s0 + $0x4] sm:$0xf]  ;;  %207 = vmatpush.bf16.msra.mxu0 %v537_v0  ;;  %578 = vmatpush.bf16.msra.mxu2 %v537_v0  ;;  %v536_v5 = vld [vmem:[%s865_s1 + $0x30] sm:$0xff]  ;;  %v535_v6 = vld [vmem:[%s865_s1 + $0x28] sm:$0xff] }
   0x3   :  { %v413_v4 = vor.u32 %v514_v2, %v410_v3  ;;  %263 = vmatpush.bf16.msra.mxu1 %v538_v1  ;;  %586 = vmatpush.bf16.msra.mxu3 %v538_v1  ;;  %v524_v7 = vld [vmem:[%s866_s0 + $0x54] sm:$0xf]  ;;  %v450_v8 = vld [vmem:[%s866_s0 + $0x58] sm:$0xf0]  ;;  %v534_v10 = vld [vmem:[%s865_s1 + $0x20] sm:$0xff] }
   0x4   :  { %v453_v9 = vor.u32 %v524_v7, %v450_v8  ;;  %v533_v11 = vld [vmem:[%s865_s1 + $0x18] sm:$0xff]  ;;  %v516_v12 = vld [vmem:[%s866_s0 + $0x14] sm:$0xf]  ;;  %v531_v16 = vld [vmem:[%s865_s1 + $0x8] sm:$0xff] }
   0x5   :  { %v418_v13 = vld [vmem:[%s866_s0 + $0x18] sm:$0xf0]  ;;  %v532_v15 = vld [vmem:[%s865_s1 + $0x10] sm:$0xff]  ;;  %v526_v17 = vld [vmem:[%s866_s0 + $0x64] sm:$0xf] }
   0x6   :  { %506 = vmatmul.msk.bf16.vlgmr.msra.gmra.mxu1 %vm182_vm0, %v413_v4  ;;  %208 = vmatpush.bf16.msra.mxu0 %v536_v5  ;;  %v421_v14 = vor.u32 %v516_v12, %v418_v13  ;;  %v458_v18 = vld [vmem:[%s866_s0 + $0x68] sm:$0xf0]  ;;  %v530_v20 = vld [vmem:[%s865_s1] sm:$0xff]  ;;  %v515_v22 = vld [vmem:[%s866_s0 + $0x4] sm:$0xf0] }
   0x7   :  { %579 = vmatpush.bf16.msra.mxu2 %v536_v5  ;;  %511 = vmatmul.msk.bf16.vlgmr.msra.gmra.mxu3 %vm182_vm0, %v453_v9  ;;  %v461_v19 = vor.u32 %v526_v17, %v458_v18  ;;  %v408_v21 = vld [vmem:[%s866_s0] sm:$0xf]  ;;  %v523_v24 = vld [vmem:[%s866_s0 + $0x44] sm:$0xf0]  ;;  %v518_v27 = vld [vmem:[%s866_s0 + $0x24] sm:$0xf] }
   0x8   :  { %v440_v23 = vld [vmem:[%s866_s0 + $0x40] sm:$0xf]  ;;  %v409_v25 = vor.u32 %v515_v22, %v408_v21  ;;  %v426_v28 = vld [vmem:[%s866_s0 + $0x28] sm:$0xf0]  ;;  %v528_v30 = vld [vmem:[%s866_s0 + $0x74] sm:$0xf] }
   0x9   :  { %v441_v26 = vor.u32 %v523_v24, %v440_v23  ;;  %v429_v29 = vor.u32 %v518_v27, %v426_v28  ;;  %v466_v31 = vld [vmem:[%s866_s0 + $0x78] sm:$0xf0]  ;;  %v416_v33 = vld [vmem:[%s866_s0 + $0x10] sm:$0xf]  ;;  %v517_v34 = vld [vmem:[%s866_s0 + $0x14] sm:$0xf0] }
   0xa   :  { %209 = vmatpush.bf16.msra.mxu0 %v535_v6  ;;  %v469_v32 = vor.u32 %v528_v30, %v466_v31  ;;  %v448_v35 = vld [vmem:[%s866_s0 + $0x50] sm:$0xf]  ;;  %v525_v36 = vld [vmem:[%s866_s0 + $0x54] sm:$0xf0]  ;;  %v417_v37 = vor.u32 %v517_v34, %v416_v33  ;;  %v520_v39 = vld [vmem:[%s866_s0 + $0x34] sm:$0xf] }
   0xb   :  { %580 = vmatpush.bf16.msra.mxu2 %v535_v6  ;;  %v449_v38 = vor.u32 %v525_v36, %v448_v35  ;;  %v434_v40 = vld [vmem:[%s866_s0 + $0x38] sm:$0xf0]  ;;  %v424_v42 = vld [vmem:[%s866_s0 + $0x20] sm:$0xf]  ;;  %v519_v43 = vld [vmem:[%s866_s0 + $0x24] sm:$0xf0] }
   0xc   :  { %v437_v41 = vor.u32 %v520_v39, %v434_v40  ;;  %v456_v44 = vld [vmem:[%s866_s0 + $0x60] sm:$0xf]  ;;  %v527_v45 = vld [vmem:[%s866_s0 + $0x64] sm:$0xf0]  ;;  %v425_v46 = vor.u32 %v519_v43, %v424_v42  ;;  %v522_v48 = vld [vmem:[%s866_s0 + $0x44] sm:$0xf] }
   0xd   :  { %v457_v47 = vor.u32 %v527_v45, %v456_v44  ;;  %v442_v49 = vld [vmem:[%s866_s0 + $0x48] sm:$0xf0]  ;;  %v432_v51 = vld [vmem:[%s866_s0 + $0x30] sm:$0xf]  ;;  %v521_v52 = vld [vmem:[%s866_s0 + $0x34] sm:$0xf0] }
   0xe   :  { %210 = vmatpush.bf16.msra.mxu0 %v534_v10  ;;  %v445_v50 = vor.u32 %v522_v48, %v442_v49  ;;  %v464_v53 = vld [vmem:[%s866_s0 + $0x70] sm:$0xf]  ;;  %v529_v54 = vld [vmem:[%s866_s0 + $0x74] sm:$0xf0]  ;;  %v433_v55 = vor.u32 %v521_v52, %v432_v51  ;;  %v747_v61 = vld [vmem:[%s867_s2] ss:$0 sm:$0xff] }
   0xf   :  { %581 = vmatpush.bf16.msra.mxu2 %v534_v10  ;;  %v465_v56 = vor.u32 %v529_v54, %v464_v53  ;;  %v540_v62 = vld [vmem:[%s868_s3] sm:$0xff]  }
  0x10   :  { %v541_v1 = vunpack.c.l.bf16 %v540_v62  ;;  %v542_v10 = vunpack.c.h.bf16 %v540_v62  ;;  %v574_v51 = vld [vmem:[%s868_s3 + $0x20] sm:$0xff]  }
  0x12   :  { %211 = vmatpush.bf16.msra.mxu0 %v533_v11 }
  0x13   :  { %582 = vmatpush.bf16.msra.mxu2 %v533_v11 }
  0x16   :  { %507 = vmatmul.msk.bf16.gmra.mxu1 %vm182_vm0, %v421_v14  ;;  %212 = vmatpush.bf16.msra.mxu0 %v532_v15  ;;  %v571_v14 = vld [vmem:[%s868_s3 + $0x8] sm:$0xff]  }
  0x17   :  { %583 = vmatpush.bf16.msra.mxu2 %v532_v15  ;;  %512 = vmatmul.msk.bf16.gmra.mxu3 %vm182_vm0, %v461_v19  ;;  %v545_v21 = vunpack.c.l.bf16 %v571_v14  ;;  %v546_v33 = vunpack.c.h.bf16 %v571_v14 }
  0x1a   :  { %213 = vmatpush.bf16.msra.mxu0 %v531_v16 }
  0x1b   :  { %584 = vmatpush.bf16.msra.mxu2 %v531_v16 }
  0x1e   :  { %214 = vmatpush.bf16.msra.mxu0 %v530_v20 }
  0x1f   :  { %585 = vmatpush.bf16.msra.mxu2 %v530_v20 }
  0x21   :  { %215 = vmatmul.bf16.vlgmr.msra.gmra.mxu0 %v409_v25  ;;  %v575_v25 = vld [vmem:[%s868_s3 + $0x28] sm:$0xff]  }
  0x22   :  { %235 = vmatmul.bf16.vlgmr.msra.gmra.mxu2 %v441_v26 }
  0x26   :  { %508 = vmatmul.msk.bf16.gmra.mxu1 %vm182_vm0, %v429_v29  ;;  %v561_v29 = vunpack.c.l.bf16 %v575_v25 }
  0x27   :  { %513 = vmatmul.msk.bf16.gmra.mxu3 %vm182_vm0, %v469_v32 }
  0x31   :  { %220 = vmatmul.bf16.gmra.mxu0 %v417_v37 }
  0x32   :  { %240 = vmatmul.bf16.gmra.mxu2 %v449_v38 }
  0x36   :  { %509 = vmatmul.msk.bf16.gmra.mxu1 %vm182_vm0, %v437_v41  ;;  %v572_v41 = vld [vmem:[%s868_s3 + $0x10] sm:$0xff]  }
  0x41   :  { %225 = vmatmul.bf16.gmra.mxu0 %v425_v46  ;;  %v562_v46 = vunpack.c.h.bf16 %v575_v25 }
  0x42   :  { %245 = vmatmul.bf16.gmra.mxu2 %v457_v47 }
  0x46   :  { %510 = vmatmul.msk.bf16.gmra.mxu1 %vm182_vm0, %v445_v50  ;;  %v549_v50 = vunpack.c.l.bf16 %v572_v41 }
  0x51   :  { %230 = vmatmul.bf16.gmra.mxu0 %v433_v55 }
  0x52   :  { %250 = vmatmul.bf16.gmra.mxu2 %v465_v56 }
  0x83   :  { %v265_v57 = vpop.f32.mrf.mxu1 }
  0x8a   :  { %v290_v17 = vpop.f32.mrf.mxu3 }
  0x8b   :  { %v267_v58 = vpop.f32.mrf.mxu1 }
  0x92   :  { %v292_v34 = vpop.f32.mrf.mxu3 }
  0x93   :  { %v270_v59 = vpop.f32.mrf.mxu1 }
  0x9a   :  { %v295_v54 = vpop.f32.mrf.mxu3 }
  0x9b   :  { %v272_v60 = vpop.f32.mrf.mxu1 }
  0x9e   :  { %v216_v63 = vpop.f32.mrf.mxu0 }
  0x9f   :  { %v217_v0 = vadd.f32 %v747_v61, %v216_v63 }
  0xa1   :  { %v266_v2 = vadd.f32 %v265_v57, %v217_v0  ;;  %v557_v57 = vunpack.c.l.bf16 %v574_v51 }
  0xa3   :  { %v337_v3 = vadd.f32 %v541_v1, %v266_v2  ;;  %v275_v4 = vpop.f32.mrf.mxu1 }
  0xa5   :  { %v353_v5 = vmax.f32 %v337_v3, 0.0  ;;  %v236_v6 = vpop.f32.mrf.mxu2 }
  0xa6   :  { %v218_v7 = vpop.f32.mrf.mxu0  ;;  %v237_v55 = vadd.f32 %v747_v61, %v236_v6 }
  0xa7   :  { %v369_v8 = vpack.c.bf16 %v353_v5, %v353_v5  ;;  %v219_v9 = vadd.f32 %v747_v61, %v218_v7 }
  0xa9   :  { %386 = vst.msk [vmem:[%s869_s4] sm:$0xf] %vm385_vm1, %v369_v8  ;;  %v268_v11 = vadd.f32 %v267_v58, %v219_v9  ;;  %v550_v9 = vunpack.c.h.bf16 %v572_v41  ;;  %v577_v41 = vld [vmem:[%s868_s3 + $0x38] sm:$0xff]  }
  0xab   :  { %v338_v12 = vadd.f32 %v542_v10, %v268_v11  ;;  %v758_v13 = vpop.f32.mrf.mxu1 }
  0xad   :  { %v354_v15 = vmax.f32 %v338_v12, 0.0  ;;  %v763_v16 = vpop.f32.mrf.mxu2 }
  0xae   :  { %v221_v18 = vpop.f32.mrf.mxu0  ;;  %v239_v14 = vadd.f32 %v747_v61, %v763_v16 }
  0xaf   :  { %v370_v19 = vpack.c.bf16 %v354_v15, %v354_v15  ;;  %v222_v20 = vadd.f32 %v747_v61, %v221_v18  ;;  %v558_v18 = vunpack.c.h.bf16 %v574_v51 }
  0xb1   :  { %387 = vst.msk [vmem:[%s869_s4 + $0x4] sm:$0xf] %vm385_vm1, %v370_v19  ;;  %v271_v22 = vadd.f32 %v270_v59, %v222_v20  ;;  %v297_v20 = vpop.f32.mrf.mxu3 }
  0xb3   :  { %v339_v23 = vadd.f32 %v545_v21, %v271_v22  ;;  %v770_v24 = vpop.f32.mrf.mxu1 }
  0xb5   :  { %v355_v26 = vmax.f32 %v339_v23, 0.0  ;;  %v241_v27 = vpop.f32.mrf.mxu2 }
  0xb6   :  { %v242_v28 = vadd.f32 %v747_v61, %v241_v27  ;;  %v223_v30 = vpop.f32.mrf.mxu0 }
  0xb7   :  { %v371_v31 = vpack.c.bf16 %v355_v26, %v355_v26  ;;  %v224_v32 = vadd.f32 %v747_v61, %v223_v30 }
  0xb8   :  { %v291_v35 = vadd.f32 %v290_v17, %v242_v28 }
  0xb9   :  { %388 = vst.msk [vmem:[%s869_s4 + $0x8] sm:$0xf] %vm385_vm1, %v371_v31  ;;  %v273_v36 = vadd.f32 %v272_v60, %v224_v32  ;;  %v576_v60 = vld [vmem:[%s868_s3 + $0x30] sm:$0xff]  }
  0xba   :  { %v347_v37 = vadd.f32 %v561_v29, %v291_v35  ;;  %v566_v29 = vunpack.c.h.bf16 %v576_v60 }
  0xbb   :  { %v340_v38 = vadd.f32 %v546_v33, %v273_v36  ;;  %v781_v39 = vpop.f32.mrf.mxu1 }
  0xbc   :  { %v363_v40 = vmax.f32 %v347_v37, 0.0 }
  0xbd   :  { %v356_v42 = vmax.f32 %v340_v38, 0.0  ;;  %v243_v43 = vpop.f32.mrf.mxu2 }
  0xbe   :  { %v379_v44 = vpack.c.bf16 %v363_v40, %v363_v40  ;;  %v244_v45 = vadd.f32 %v747_v61, %v243_v43  ;;  %v226_v47 = vpop.f32.mrf.mxu0 }
  0xbf   :  { %v372_v48 = vpack.c.bf16 %v356_v42, %v356_v42  ;;  %v227_v49 = vadd.f32 %v747_v61, %v226_v47 }
  0xc0   :  { %396 = vst.msk [vmem:[%s869_s4 + $0x28] sm:$0xf] %vm385_vm1, %v379_v44  ;;  %v293_v52 = vadd.f32 %v292_v34, %v244_v45  ;;  %v300_v44 = vpop.f32.mrf.mxu3 }
  0xc1   :  { %389 = vst.msk [vmem:[%s869_s4 + $0xc] sm:$0xf] %vm385_vm1, %v372_v48  ;;  %v276_v53 = vadd.f32 %v275_v4, %v227_v49  ;;  %v565_v4 = vunpack.c.l.bf16 %v576_v60 }
  0xc2   :  { %v348_v56 = vadd.f32 %v562_v46, %v293_v52 }
  0xc3   :  { %v341_v58 = vadd.f32 %v549_v50, %v276_v53  ;;  %v285_v59 = vpop.f32.mrf.mxu1 }
  0xc4   :  { %v364_v62 = vmax.f32 %v348_v56, 0.0  ;;  %v286_v63 = vadd.f32 %v285_v59, %v237_v55 }
  0xc5   :  { %v357_v0 = vmax.f32 %v341_v58, 0.0  ;;  %v246_v1 = vpop.f32.mrf.mxu2 }
  0xc6   :  { %v380_v2 = vpack.c.bf16 %v364_v62, %v364_v62  ;;  %v345_v3 = vadd.f32 %v557_v57, %v286_v63  ;;  %v247_v5 = vadd.f32 %v747_v61, %v246_v1  ;;  %v228_v7 = vpop.f32.mrf.mxu0  ;;  %v570_v62 = vunpack.c.h.bf16 %v577_v41 }
  0xc7   :  { %v373_v8 = vpack.c.bf16 %v357_v0, %v357_v0  ;;  %v229_v6 = vadd.f32 %v747_v61, %v228_v7 }
  0xc8   :  { %397 = vst.msk [vmem:[%s869_s4 + $0x2c] sm:$0xf] %vm385_vm1, %v380_v2  ;;  %v361_v10 = vmax.f32 %v345_v3, 0.0  ;;  %v296_v11 = vadd.f32 %v295_v54, %v247_v5  ;;  %v302_v0 = vpop.f32.mrf.mxu3 }
  0xc9   :  { %390 = vst.msk [vmem:[%s869_s4 + $0x10] sm:$0xf] %vm385_vm1, %v373_v8  ;;  %v278_v12 = vadd.f32 %v758_v13, %v229_v6  ;;  %v573_v13 = vld [vmem:[%s868_s3 + $0x18] sm:$0xff]  }
  0xca   :  { %v377_v15 = vpack.c.bf16 %v361_v10, %v361_v10  ;;  %v349_v17 = vadd.f32 %v565_v4, %v296_v11  ;;  %v553_v33 = vunpack.c.l.bf16 %v573_v13  ;;  %v554_v51 = vunpack.c.h.bf16 %v573_v13 }
  0xcb   :  { %v342_v19 = vadd.f32 %v550_v9, %v278_v12  ;;  %v287_v21 = vpop.f32.mrf.mxu1 }
  0xcc   :  { %394 = vst.msk [vmem:[%s869_s4 + $0x20] sm:$0xf] %vm385_vm1, %v377_v15  ;;  %v365_v22 = vmax.f32 %v349_v17, 0.0  ;;  %v288_v23 = vadd.f32 %v287_v21, %v239_v14 }
  0xcd   :  { %v358_v25 = vmax.f32 %v342_v19, 0.0  ;;  %v248_v26 = vpop.f32.mrf.mxu2 }
  0xce   :  { %v381_v16 = vpack.c.bf16 %v365_v22, %v365_v22  ;;  %v346_v27 = vadd.f32 %v558_v18, %v288_v23  ;;  %v249_v28 = vadd.f32 %v747_v61, %v248_v26  ;;  %v231_v30 = vpop.f32.mrf.mxu0 }
  0xcf   :  { %v374_v31 = vpack.c.bf16 %v358_v25, %v358_v25  ;;  %v232_v32 = vadd.f32 %v747_v61, %v231_v30 }
  0xd0   :  { %398 = vst.msk [vmem:[%s869_s4 + $0x30] sm:$0xf] %vm385_vm1, %v381_v16  ;;  %v362_v34 = vmax.f32 %v346_v27, 0.0  ;;  %v298_v35 = vadd.f32 %v297_v20, %v249_v28 }
  0xd1   :  { %391 = vst.msk [vmem:[%s869_s4 + $0x14] sm:$0xf] %vm385_vm1, %v374_v31  ;;  %v281_v36 = vadd.f32 %v770_v24, %v232_v32  ;;  %v569_v24 = vunpack.c.l.bf16 %v577_v41 }
  0xd2   :  { %v378_v37 = vpack.c.bf16 %v362_v34, %v362_v34  ;;  %v350_v38 = vadd.f32 %v566_v29, %v298_v35 }
  0xd3   :  { %v343_v40 = vadd.f32 %v553_v33, %v281_v36 }
  0xd4   :  { %395 = vst.msk [vmem:[%s869_s4 + $0x24] sm:$0xf] %vm385_vm1, %v378_v37  ;;  %v366_v42 = vmax.f32 %v350_v38, 0.0 }
  0xd5   :  { %v359_v43 = vmax.f32 %v343_v40, 0.0  ;;  %v251_v45 = vpop.f32.mrf.mxu2 }
  0xd6   :  { %v382_v46 = vpack.c.bf16 %v366_v42, %v366_v42  ;;  %v252_v47 = vadd.f32 %v747_v61, %v251_v45  ;;  %v233_v48 = vpop.f32.mrf.mxu0 }
  0xd7   :  { %v375_v49 = vpack.c.bf16 %v359_v43, %v359_v43  ;;  %v234_v50 = vadd.f32 %v747_v61, %v233_v48 }
  0xd8   :  { %399 = vst.msk [vmem:[%s869_s4 + $0x34] sm:$0xf] %vm385_vm1, %v382_v46  ;;  %v301_v52 = vadd.f32 %v300_v44, %v252_v47 }
  0xd9   :  { %392 = vst.msk [vmem:[%s869_s4 + $0x18] sm:$0xf] %vm385_vm1, %v375_v49  ;;  %v283_v53 = vadd.f32 %v781_v39, %v234_v50 }
  0xda   :  { %v351_v54 = vadd.f32 %v569_v24, %v301_v52 }
  0xdb   :  { %v344_v55 = vadd.f32 %v554_v51, %v283_v53 }
  0xdc   :  { %v367_v56 = vmax.f32 %v351_v54, 0.0 }
  0xdd   :  { %v360_v57 = vmax.f32 %v344_v55, 0.0  ;;  %v253_v58 = vpop.f32.mrf.mxu2 }
  0xde   :  { %v383_v59 = vpack.c.bf16 %v367_v56, %v367_v56  ;;  %v254_v60 = vadd.f32 %v747_v61, %v253_v58 }
  0xdf   :  { %v376_v63 = vpack.c.bf16 %v360_v57, %v360_v57 }
  0xe0   :  { %400 = vst.msk [vmem:[%s869_s4 + $0x38] sm:$0xf] %vm385_vm1, %v383_v59  ;;  %v303_v1 = vadd.f32 %v302_v0, %v254_v60 }
  0xe1   :  { %393 = vst.msk [vmem:[%s869_s4 + $0x1c] sm:$0xf] %vm385_vm1, %v376_v63 }
  0xe2   :  { %v352_v39 = vadd.f32 %v570_v62, %v303_v1 }
  0xe4   :  { %v368_v2 = vmax.f32 %v352_v39, 0.0 }
  0xe6   :  { %v384_v3 = vpack.c.bf16 %v368_v2, %v368_v2 }
  0xe8   :  { %401 = vst.msk [vmem:[%s869_s4 + $0x3c] sm:$0xf] %vm385_vm1, %v384_v3 }

// kernel: _lambda_.24
= control target key start
LH: loop header
LB: loop body
LE: loop exit
PB: predicated region body
PF: predicated region fallthrough
CT: control target
= control target key end

     0   :  { %vm179_vm0 = vcmask 130048   ;;  %vm334_vm1 = vcmask 125952   ;;  %s734_s1 = inlined_call_operand.vmem [shape: bf16[144,16], index: 1, kind: input, shape index: {}]   ;;  %s735_s0 = inlined_call_operand.vmem [shape: bf16[128,144], index: 0, kind: input, shape index: {}]   ;;  %s736_s2 = inlined_call_operand.vmem [shape: f32[1,16], index: 2, kind: input, shape index: {}]   ;;  %s737_s3 = inlined_call_operand.vmem [shape: bf16[128,16], index: 3, kind: output, shape index: {}]  }
   0x1   :  { %v486_v0 = vld [vmem:[%s734_s1 + $0x38] sm:$0xff]  ;;  %v487_v1 = vld [vmem:[%s734_s1 + $0x40] sm:$0xff]  ;;  %v359_v3 = vld [vmem:[%s735_s0 + $0x8] sm:$0xf0] }
   0x2   :  { %v463_v2 = vld [vmem:[%s735_s0 + $0x4] sm:$0xf]  ;;  %204 = vmatpush.bf16.msra.mxu0 %v486_v0  ;;  %488 = vmatpush.bf16.msra.mxu2 %v486_v0  ;;  %v485_v5 = vld [vmem:[%s734_s1 + $0x30] sm:$0xff]  ;;  %v484_v6 = vld [vmem:[%s734_s1 + $0x28] sm:$0xff] }
   0x3   :  { %v362_v4 = vor.u32 %v463_v2, %v359_v3  ;;  %260 = vmatpush.bf16.msra.mxu1 %v487_v1  ;;  %496 = vmatpush.bf16.msra.mxu3 %v487_v1  ;;  %v473_v7 = vld [vmem:[%s735_s0 + $0x54] sm:$0xf]  ;;  %v399_v8 = vld [vmem:[%s735_s0 + $0x58] sm:$0xf0]  ;;  %v483_v10 = vld [vmem:[%s734_s1 + $0x20] sm:$0xff] }
   0x4   :  { %v402_v9 = vor.u32 %v473_v7, %v399_v8  ;;  %v482_v11 = vld [vmem:[%s734_s1 + $0x18] sm:$0xff]  ;;  %v465_v12 = vld [vmem:[%s735_s0 + $0x14] sm:$0xf]  ;;  %v480_v16 = vld [vmem:[%s734_s1 + $0x8] sm:$0xff] }
   0x5   :  { %v367_v13 = vld [vmem:[%s735_s0 + $0x18] sm:$0xf0]  ;;  %v481_v15 = vld [vmem:[%s734_s1 + $0x10] sm:$0xff]  ;;  %v475_v17 = vld [vmem:[%s735_s0 + $0x64] sm:$0xf] }
   0x6   :  { %455 = vmatmul.msk.bf16.vlgmr.msra.gmra.mxu1 %vm179_vm0, %v362_v4  ;;  %205 = vmatpush.bf16.msra.mxu0 %v485_v5  ;;  %v370_v14 = vor.u32 %v465_v12, %v367_v13  ;;  %v407_v18 = vld [vmem:[%s735_s0 + $0x68] sm:$0xf0]  ;;  %v479_v20 = vld [vmem:[%s734_s1] sm:$0xff]  ;;  %v464_v22 = vld [vmem:[%s735_s0 + $0x4] sm:$0xf0] }
   0x7   :  { %489 = vmatpush.bf16.msra.mxu2 %v485_v5  ;;  %460 = vmatmul.msk.bf16.vlgmr.msra.gmra.mxu3 %vm179_vm0, %v402_v9  ;;  %v410_v19 = vor.u32 %v475_v17, %v407_v18  ;;  %v357_v21 = vld [vmem:[%s735_s0] sm:$0xf]  ;;  %v472_v24 = vld [vmem:[%s735_s0 + $0x44] sm:$0xf0]  ;;  %v467_v27 = vld [vmem:[%s735_s0 + $0x24] sm:$0xf] }
   0x8   :  { %v389_v23 = vld [vmem:[%s735_s0 + $0x40] sm:$0xf]  ;;  %v358_v25 = vor.u32 %v464_v22, %v357_v21  ;;  %v375_v28 = vld [vmem:[%s735_s0 + $0x28] sm:$0xf0]  ;;  %v477_v30 = vld [vmem:[%s735_s0 + $0x74] sm:$0xf] }
   0x9   :  { %v390_v26 = vor.u32 %v472_v24, %v389_v23  ;;  %v378_v29 = vor.u32 %v467_v27, %v375_v28  ;;  %v415_v31 = vld [vmem:[%s735_s0 + $0x78] sm:$0xf0]  ;;  %v365_v33 = vld [vmem:[%s735_s0 + $0x10] sm:$0xf]  ;;  %v466_v34 = vld [vmem:[%s735_s0 + $0x14] sm:$0xf0] }
   0xa   :  { %206 = vmatpush.bf16.msra.mxu0 %v484_v6  ;;  %v418_v32 = vor.u32 %v477_v30, %v415_v31  ;;  %v397_v35 = vld [vmem:[%s735_s0 + $0x50] sm:$0xf]  ;;  %v474_v36 = vld [vmem:[%s735_s0 + $0x54] sm:$0xf0]  ;;  %v366_v37 = vor.u32 %v466_v34, %v365_v33  ;;  %v469_v39 = vld [vmem:[%s735_s0 + $0x34] sm:$0xf] }
   0xb   :  { %490 = vmatpush.bf16.msra.mxu2 %v484_v6  ;;  %v398_v38 = vor.u32 %v474_v36, %v397_v35  ;;  %v383_v40 = vld [vmem:[%s735_s0 + $0x38] sm:$0xf0]  ;;  %v373_v42 = vld [vmem:[%s735_s0 + $0x20] sm:$0xf]  ;;  %v468_v43 = vld [vmem:[%s735_s0 + $0x24] sm:$0xf0] }
   0xc   :  { %v386_v41 = vor.u32 %v469_v39, %v383_v40  ;;  %v405_v44 = vld [vmem:[%s735_s0 + $0x60] sm:$0xf]  ;;  %v476_v45 = vld [vmem:[%s735_s0 + $0x64] sm:$0xf0]  ;;  %v374_v46 = vor.u32 %v468_v43, %v373_v42  ;;  %v471_v48 = vld [vmem:[%s735_s0 + $0x44] sm:$0xf] }
   0xd   :  { %v406_v47 = vor.u32 %v476_v45, %v405_v44  ;;  %v391_v49 = vld [vmem:[%s735_s0 + $0x48] sm:$0xf0]  ;;  %v381_v51 = vld [vmem:[%s735_s0 + $0x30] sm:$0xf]  ;;  %v470_v52 = vld [vmem:[%s735_s0 + $0x34] sm:$0xf0] }
   0xe   :  { %207 = vmatpush.bf16.msra.mxu0 %v483_v10  ;;  %v394_v50 = vor.u32 %v471_v48, %v391_v49  ;;  %v413_v53 = vld [vmem:[%s735_s0 + $0x70] sm:$0xf]  ;;  %v478_v54 = vld [vmem:[%s735_s0 + $0x74] sm:$0xf0]  ;;  %v382_v55 = vor.u32 %v470_v52, %v381_v51  ;;  %v652_v61 = vld [vmem:[%s736_s2] ss:$0 sm:$0xff] }
   0xf   :  { %491 = vmatpush.bf16.msra.mxu2 %v483_v10  ;;  %v414_v56 = vor.u32 %v478_v54, %v413_v53 }
  0x12   :  { %208 = vmatpush.bf16.msra.mxu0 %v482_v11 }
  0x13   :  { %492 = vmatpush.bf16.msra.mxu2 %v482_v11 }
  0x16   :  { %456 = vmatmul.msk.bf16.gmra.mxu1 %vm179_vm0, %v370_v14  ;;  %209 = vmatpush.bf16.msra.mxu0 %v481_v15 }
  0x17   :  { %493 = vmatpush.bf16.msra.mxu2 %v481_v15  ;;  %461 = vmatmul.msk.bf16.gmra.mxu3 %vm179_vm0, %v410_v19 }
  0x1a   :  { %210 = vmatpush.bf16.msra.mxu0 %v480_v16 }
  0x1b   :  { %494 = vmatpush.bf16.msra.mxu2 %v480_v16 }
  0x1e   :  { %211 = vmatpush.bf16.msra.mxu0 %v479_v20 }
  0x1f   :  { %495 = vmatpush.bf16.msra.mxu2 %v479_v20 }
  0x21   :  { %212 = vmatmul.bf16.vlgmr.msra.gmra.mxu0 %v358_v25 }
  0x22   :  { %232 = vmatmul.bf16.vlgmr.msra.gmra.mxu2 %v390_v26 }
  0x26   :  { %457 = vmatmul.msk.bf16.gmra.mxu1 %vm179_vm0, %v378_v29 }
  0x27   :  { %462 = vmatmul.msk.bf16.gmra.mxu3 %vm179_vm0, %v418_v32 }
  0x31   :  { %217 = vmatmul.bf16.gmra.mxu0 %v366_v37 }
  0x32   :  { %237 = vmatmul.bf16.gmra.mxu2 %v398_v38 }
  0x36   :  { %458 = vmatmul.msk.bf16.gmra.mxu1 %vm179_vm0, %v386_v41 }
  0x41   :  { %222 = vmatmul.bf16.gmra.mxu0 %v374_v46 }
  0x42   :  { %242 = vmatmul.bf16.gmra.mxu2 %v406_v47 }
  0x46   :  { %459 = vmatmul.msk.bf16.gmra.mxu1 %vm179_vm0, %v394_v50 }
  0x51   :  { %227 = vmatmul.bf16.gmra.mxu0 %v382_v55 }
  0x52   :  { %247 = vmatmul.bf16.gmra.mxu2 %v414_v56 }
  0x83   :  { %v262_v57 = vpop.f32.mrf.mxu1 }
  0x8a   :  { %v287_v12 = vpop.f32.mrf.mxu3 }
  0x8b   :  { %v264_v58 = vpop.f32.mrf.mxu1 }
  0x92   :  { %v289_v23 = vpop.f32.mrf.mxu3 }
  0x93   :  { %v267_v59 = vpop.f32.mrf.mxu1 }
  0x9a   :  { %v292_v37 = vpop.f32.mrf.mxu3 }
  0x9b   :  { %v269_v60 = vpop.f32.mrf.mxu1 }
  0x9e   :  { %v213_v62 = vpop.f32.mrf.mxu0 }
  0x9f   :  { %v214_v63 = vadd.f32 %v652_v61, %v213_v62 }
  0xa1   :  { %v263_v0 = vadd.f32 %v262_v57, %v214_v63 }
  0xa2   :  { %v294_v56 = vpop.f32.mrf.mxu3 }
  0xa3   :  { %v302_v1 = vmax.f32 %v263_v0, 0.0  ;;  %v272_v2 = vpop.f32.mrf.mxu1 }
  0xa5   :  { %v318_v3 = vpack.c.bf16 %v302_v1, %v302_v1  ;;  %v233_v4 = vpop.f32.mrf.mxu2 }
  0xa6   :  { %v215_v5 = vpop.f32.mrf.mxu0  ;;  %v234_v38 = vadd.f32 %v652_v61, %v233_v4 }
  0xa7   :  { %335 = vst.msk [vmem:[%s737_s3] sm:$0xf] %vm334_vm1, %v318_v3  ;;  %v216_v6 = vadd.f32 %v652_v61, %v215_v5 }
  0xa9   :  { %v265_v7 = vadd.f32 %v264_v58, %v216_v6 }
  0xab   :  { %v303_v8 = vmax.f32 %v265_v7, 0.0  ;;  %v274_v9 = vpop.f32.mrf.mxu1 }
  0xad   :  { %v319_v10 = vpack.c.bf16 %v303_v8, %v303_v8  ;;  %v235_v11 = vpop.f32.mrf.mxu2 }
  0xae   :  { %v218_v13 = vpop.f32.mrf.mxu0  ;;  %v236_v53 = vadd.f32 %v652_v61, %v235_v11 }
  0xaf   :  { %336 = vst.msk [vmem:[%s737_s3 + $0x4] sm:$0xf] %vm334_vm1, %v319_v10  ;;  %v219_v14 = vadd.f32 %v652_v61, %v218_v13  ;;  %v297_v10 = vpop.f32.mrf.mxu3 }
  0xb1   :  { %v268_v15 = vadd.f32 %v267_v59, %v219_v14 }
  0xb3   :  { %v304_v16 = vmax.f32 %v268_v15, 0.0  ;;  %v277_v17 = vpop.f32.mrf.mxu1 }
  0xb5   :  { %v320_v18 = vpack.c.bf16 %v304_v16, %v304_v16  ;;  %v238_v19 = vpop.f32.mrf.mxu2 }
  0xb6   :  { %v239_v20 = vadd.f32 %v652_v61, %v238_v19  ;;  %v220_v21 = vpop.f32.mrf.mxu0 }
  0xb7   :  { %337 = vst.msk [vmem:[%s737_s3 + $0x8] sm:$0xf] %vm334_vm1, %v320_v18  ;;  %v221_v22 = vadd.f32 %v652_v61, %v220_v21 }
  0xb8   :  { %v288_v24 = vadd.f32 %v287_v12, %v239_v20 }
  0xb9   :  { %v270_v25 = vadd.f32 %v269_v60, %v221_v22 }
  0xba   :  { %v312_v26 = vmax.f32 %v288_v24, 0.0 }
  0xbb   :  { %v305_v27 = vmax.f32 %v270_v25, 0.0  ;;  %v279_v28 = vpop.f32.mrf.mxu1 }
  0xbc   :  { %v328_v29 = vpack.c.bf16 %v312_v26, %v312_v26 }
  0xbd   :  { %v321_v30 = vpack.c.bf16 %v305_v27, %v305_v27  ;;  %v240_v31 = vpop.f32.mrf.mxu2 }
  0xbe   :  { %345 = vst.msk [vmem:[%s737_s3 + $0x28] sm:$0xf] %vm334_vm1, %v328_v29  ;;  %v241_v32 = vadd.f32 %v652_v61, %v240_v31  ;;  %v223_v33 = vpop.f32.mrf.mxu0 }
  0xbf   :  { %338 = vst.msk [vmem:[%s737_s3 + $0xc] sm:$0xf] %vm334_vm1, %v321_v30  ;;  %v224_v34 = vadd.f32 %v652_v61, %v223_v33 }
  0xc0   :  { %v290_v35 = vadd.f32 %v289_v23, %v241_v32  ;;  %v299_v23 = vpop.f32.mrf.mxu3 }
  0xc1   :  { %v273_v36 = vadd.f32 %v272_v2, %v224_v34 }
  0xc2   :  { %v313_v39 = vmax.f32 %v290_v35, 0.0 }
  0xc3   :  { %v306_v40 = vmax.f32 %v273_v36, 0.0  ;;  %v282_v41 = vpop.f32.mrf.mxu1 }
  0xc4   :  { %v329_v42 = vpack.c.bf16 %v313_v39, %v313_v39  ;;  %v283_v43 = vadd.f32 %v282_v41, %v234_v38 }
  0xc5   :  { %v322_v44 = vpack.c.bf16 %v306_v40, %v306_v40  ;;  %v243_v45 = vpop.f32.mrf.mxu2 }
  0xc6   :  { %346 = vst.msk [vmem:[%s737_s3 + $0x2c] sm:$0xf] %vm334_vm1, %v329_v42  ;;  %v310_v46 = vmax.f32 %v283_v43, 0.0  ;;  %v244_v47 = vadd.f32 %v652_v61, %v243_v45  ;;  %v225_v48 = vpop.f32.mrf.mxu0 }
  0xc7   :  { %339 = vst.msk [vmem:[%s737_s3 + $0x10] sm:$0xf] %vm334_vm1, %v322_v44  ;;  %v226_v49 = vadd.f32 %v652_v61, %v225_v48 }
  0xc8   :  { %v326_v50 = vpack.c.bf16 %v310_v46, %v310_v46  ;;  %v293_v51 = vadd.f32 %v292_v37, %v244_v47 }
  0xc9   :  { %v275_v52 = vadd.f32 %v274_v9, %v226_v49 }
  0xca   :  { %343 = vst.msk [vmem:[%s737_s3 + $0x20] sm:$0xf] %vm334_vm1, %v326_v50  ;;  %v314_v54 = vmax.f32 %v293_v51, 0.0 }
  0xcb   :  { %v307_v55 = vmax.f32 %v275_v52, 0.0  ;;  %v284_v57 = vpop.f32.mrf.mxu1 }
  0xcc   :  { %v330_v58 = vpack.c.bf16 %v314_v54, %v314_v54  ;;  %v285_v59 = vadd.f32 %v284_v57, %v236_v53 }
  0xcd   :  { %v323_v60 = vpack.c.bf16 %v307_v55, %v307_v55  ;;  %v245_v62 = vpop.f32.mrf.mxu2 }
  0xce   :  { %347 = vst.msk [vmem:[%s737_s3 + $0x30] sm:$0xf] %vm334_vm1, %v330_v58  ;;  %v311_v63 = vmax.f32 %v285_v59, 0.0  ;;  %v246_v0 = vadd.f32 %v652_v61, %v245_v62  ;;  %v228_v1 = vpop.f32.mrf.mxu0 }
  0xcf   :  { %340 = vst.msk [vmem:[%s737_s3 + $0x14] sm:$0xf] %vm334_vm1, %v323_v60  ;;  %v229_v2 = vadd.f32 %v652_v61, %v228_v1 }
  0xd0   :  { %v327_v3 = vpack.c.bf16 %v311_v63, %v311_v63  ;;  %v295_v4 = vadd.f32 %v294_v56, %v246_v0 }
  0xd1   :  { %v278_v5 = vadd.f32 %v277_v17, %v229_v2 }
  0xd2   :  { %344 = vst.msk [vmem:[%s737_s3 + $0x24] sm:$0xf] %vm334_vm1, %v327_v3  ;;  %v315_v6 = vmax.f32 %v295_v4, 0.0 }
  0xd3   :  { %v308_v7 = vmax.f32 %v278_v5, 0.0 }
  0xd4   :  { %v331_v8 = vpack.c.bf16 %v315_v6, %v315_v6 }
  0xd5   :  { %v324_v9 = vpack.c.bf16 %v308_v7, %v308_v7  ;;  %v248_v11 = vpop.f32.mrf.mxu2 }
  0xd6   :  { %348 = vst.msk [vmem:[%s737_s3 + $0x34] sm:$0xf] %vm334_vm1, %v331_v8  ;;  %v249_v12 = vadd.f32 %v652_v61, %v248_v11  ;;  %v230_v13 = vpop.f32.mrf.mxu0 }
  0xd7   :  { %341 = vst.msk [vmem:[%s737_s3 + $0x18] sm:$0xf] %vm334_vm1, %v324_v9  ;;  %v231_v14 = vadd.f32 %v652_v61, %v230_v13 }
  0xd8   :  { %v298_v15 = vadd.f32 %v297_v10, %v249_v12 }
  0xd9   :  { %v280_v16 = vadd.f32 %v279_v28, %v231_v14 }
  0xda   :  { %v316_v17 = vmax.f32 %v298_v15, 0.0 }
  0xdb   :  { %v309_v18 = vmax.f32 %v280_v16, 0.0 }
  0xdc   :  { %v332_v19 = vpack.c.bf16 %v316_v17, %v316_v17 }
  0xdd   :  { %v325_v20 = vpack.c.bf16 %v309_v18, %v309_v18  ;;  %v250_v21 = vpop.f32.mrf.mxu2 }
  0xde   :  { %349 = vst.msk [vmem:[%s737_s3 + $0x38] sm:$0xf] %vm334_vm1, %v332_v19  ;;  %v251_v22 = vadd.f32 %v652_v61, %v250_v21 }
  0xdf   :  { %342 = vst.msk [vmem:[%s737_s3 + $0x1c] sm:$0xf] %vm334_vm1, %v325_v20 }
  0xe0   :  { %v300_v24 = vadd.f32 %v299_v23, %v251_v22 }
  0xe2   :  { %v317_v25 = vmax.f32 %v300_v24, 0.0 }
  0xe4   :  { %v333_v26 = vpack.c.bf16 %v317_v25, %v317_v25 }
  0xe6   :  { %350 = vst.msk [vmem:[%s737_s3 + $0x3c] sm:$0xf] %vm334_vm1, %v333_v26 }

// kernel: _lambda_.26
= control target key start
LH: loop header
LB: loop body
LE: loop exit
PB: predicated region body
PF: predicated region fallthrough
CT: control target
= control target key end

     0   :  { %vm116_vm0 = vcmask 130048   ;;  %v264_v25 = vmov 0   ;;  %vm178_vm3 = vcmask 519168   ;;  %s377_s1 = inlined_call_operand.vmem [shape: bf16[144,64], index: 1, kind: input, shape index: {}]   ;;  %s378_s0 = inlined_call_operand.vmem [shape: bf16[32,144], index: 0, kind: input, shape index: {}]   ;;  %s379_s2 = inlined_call_operand.vmem [shape: f32[1,64], index: 2, kind: input, shape index: {}]   ;;  %s380_s3 = inlined_call_operand.vmem [shape: f32[1,64], index: 3, kind: input, shape index: {}]   ;;  %s381_s4 = inlined_call_operand.vmem [shape: bf16[32,64], index: 4, kind: output, shape index: {}]  }
   0x1   :  { %v252_v0 = vld [vmem:[%s377_s1 + $0x38] sm:$0xff]  ;;  %v253_v1 = vld [vmem:[%s377_s1 + $0x40] sm:$0xff]  ;;  %v251_v3 = vld [vmem:[%s377_s1 + $0x30] sm:$0xff] }
   0x2   :  { %v241_v2 = vld [vmem:[%s378_s0 + $0x4] sm:$0xf]  ;;  %123 = vmatpush.bf16.msra.mxu0 %v252_v0  ;;  %254 = vmatpush.bf16.msra.mxu2 %v252_v0  ;;  %v191_v4 = vld [vmem:[%s378_s0 + $0x8] sm:$0xf0]  ;;  %v248_v8 = vld [vmem:[%s377_s1 + $0x18] sm:$0xff] }
   0x3   :  { %149 = vmatpush.bf16.msra.mxu1 %v253_v1  ;;  %v194_v5 = vor.u32 %v241_v2, %v191_v4  ;;  %v250_v6 = vld [vmem:[%s377_s1 + $0x28] sm:$0xff]  ;;  %v249_v7 = vld [vmem:[%s377_s1 + $0x20] sm:$0xff]  ;;  %v243_v9 = vld [vmem:[%s378_s0 + $0x14] sm:$0xf] }
   0x4   :  { %v199_v10 = vld [vmem:[%s378_s0 + $0x18] sm:$0xf0]  ;;  %v247_v11 = vld [vmem:[%s377_s1 + $0x10] sm:$0xff]  ;;  %v246_v13 = vld [vmem:[%s377_s1 + $0x8] sm:$0xff] }
   0x5   :  { %v202_v12 = vor.u32 %v243_v9, %v199_v10  ;;  %v245_v14 = vld [vmem:[%s377_s1] sm:$0xff]  ;;  %v242_v16 = vld [vmem:[%s378_s0 + $0x4] sm:$0xf0]  ;;  %v197_v17 = vld [vmem:[%s378_s0 + $0x10] sm:$0xf] }
   0x6   :  { %124 = vmatpush.bf16.msra.mxu0 %v251_v3  ;;  %255 = vmatpush.bf16.msra.mxu2 %v251_v3  ;;  %v189_v15 = vld [vmem:[%s378_s0] sm:$0xf]  ;;  %v244_v18 = vld [vmem:[%s378_s0 + $0x14] sm:$0xf0] }
   0x7   :  { %239 = vmatmul.msk.bf16.vlgmr.msra.gmra.mxu1 %vm116_vm0, %v194_v5  ;;  %v190_v19 = vor.u32 %v242_v16, %v189_v15  ;;  %v198_v20 = vor.u32 %v244_v18, %v197_v17  ;;  %v161_v22 = vld [vmem:[%s380_s3] sm:$0x1] }
   0x8   :  { %vm162_vm1 = vcmp.gt.f32.partialorder %v161_v22, 0.0  ;;  %v263_v24 = vld [vmem:[%s379_s2] ss:$0 sm:$0xff] }
   0x9   :  { %v167_v26 = vsel %vm162_vm1, 1, %v264_v25 }
   0xa   :  { %125 = vmatpush.bf16.msra.mxu0 %v250_v6  ;;  %256 = vmatpush.bf16.msra.mxu2 %v250_v6  ;;  %v168_v28 = vperm.slane %v167_v26, 0 }
   0xc   :  { %vm349_vm2 = vcmp.eq.s32.totalorder %v168_v28, 1 }
   0xe   :  { %126 = vmatpush.bf16.msra.mxu0 %v249_v7  ;;  %257 = vmatpush.bf16.msra.mxu2 %v249_v7 }
  0x12   :  { %127 = vmatpush.bf16.msra.mxu0 %v248_v8  ;;  %258 = vmatpush.bf16.msra.mxu2 %v248_v8 }
  0x16   :  { %128 = vmatpush.bf16.msra.mxu0 %v247_v11  ;;  %259 = vmatpush.bf16.msra.mxu2 %v247_v11 }
  0x17   :  { %240 = vmatmul.msk.bf16.gmra.mxu1 %vm116_vm0, %v202_v12 }
  0x1a   :  { %129 = vmatpush.bf16.msra.mxu0 %v246_v13  ;;  %260 = vmatpush.bf16.msra.mxu2 %v246_v13 }
  0x1e   :  { %130 = vmatpush.bf16.msra.mxu0 %v245_v14  ;;  %261 = vmatpush.bf16.msra.mxu2 %v245_v14 }
  0x21   :  { %131 = vmatmul.bf16.vlgmr.msra.gmra.mxu0 %v190_v19  ;;  %136 = vmatmul.bf16.vlgmr.msra.gmra.mxu2 %v198_v20 }
  0x84   :  { %v151_v21 = vpop.f32.mrf.mxu1 }
  0x8c   :  { %v153_v23 = vpop.f32.mrf.mxu1 }
  0x94   :  { %v156_v33 = vpop.f32.mrf.mxu1 }
  0x9c   :  { %v158_v50 = vpop.f32.mrf.mxu1 }
  0x9e   :  { %v132_v27 = vpop.f32.mrf.mxu0 }
  0x9f   :  { %v133_v29 = vadd.f32 %v263_v24, %v132_v27 }
  0xa1   :  { %v152_v30 = vadd.f32 %v151_v21, %v133_v29 }
  0xa3   :  { %v163_v32 = vmax.f32 %v152_v30, 0.0 }
  0xa4   :  { %v137_v34 = vpop.f32.mrf.mxu2 }
  0xa5   :  { %v170_v35 = vsel %vm349_vm2, %v163_v32, %v152_v30  ;;  %v138_v36 = vadd.f32 %v263_v24, %v137_v34 }
  0xa6   :  { %v174_v37 = vpack.c.bf16 %v170_v35, %v170_v35  ;;  %v134_v38 = vpop.f32.mrf.mxu0 }
  0xa7   :  { %v157_v39 = vadd.f32 %v156_v33, %v138_v36  ;;  %v135_v40 = vadd.f32 %v263_v24, %v134_v38 }
  0xa8   :  { %179 = vst.msk [vmem:[%s381_s4] sm:$0xf] %vm178_vm3, %v174_v37 }
  0xa9   :  { %v165_v41 = vmax.f32 %v157_v39, 0.0  ;;  %v154_v42 = vadd.f32 %v153_v23, %v135_v40 }
  0xab   :  { %v172_v43 = vsel %vm349_vm2, %v165_v41, %v157_v39  ;;  %v164_v44 = vmax.f32 %v154_v42, 0.0 }
  0xac   :  { %v176_v45 = vpack.c.bf16 %v172_v43, %v172_v43  ;;  %v139_v46 = vpop.f32.mrf.mxu2 }
  0xad   :  { %v171_v47 = vsel %vm349_vm2, %v164_v44, %v154_v42  ;;  %v140_v48 = vadd.f32 %v263_v24, %v139_v46 }
  0xae   :  { %181 = vst.msk [vmem:[%s381_s4 + $0x8] sm:$0xf] %vm178_vm3, %v176_v45  ;;  %v175_v49 = vpack.c.bf16 %v171_v47, %v171_v47 }
  0xaf   :  { %v159_v51 = vadd.f32 %v158_v50, %v140_v48 }
  0xb0   :  { %180 = vst.msk [vmem:[%s381_s4 + $0x4] sm:$0xf] %vm178_vm3, %v175_v49 }
  0xb1   :  { %v166_v52 = vmax.f32 %v159_v51, 0.0 }
  0xb3   :  { %v173_v53 = vsel %vm349_vm2, %v166_v52, %v159_v51 }
  0xb4   :  { %v177_v54 = vpack.c.bf16 %v173_v53, %v173_v53 }
  0xb6   :  { %182 = vst.msk [vmem:[%s381_s4 + $0xc] sm:$0xf] %vm178_vm3, %v177_v54 }

// kernel: _lambda_.27
= control target key start
LH: loop header
LB: loop body
LE: loop exit
PB: predicated region body
PF: predicated region fallthrough
CT: control target
= control target key end

     0   :  { %vm204_vm0 = vcmask 261120   ;;  %vm288_vm1 = vcmask 257024   ;;  %s579_s1 = inlined_call_operand.vmem [shape: bf16[288,32], index: 1, kind: input, shape index: {}]   ;;  %s580_s0 = inlined_call_operand.vmem [shape: bf16[32,288], index: 0, kind: input, shape index: {}]   ;;  %s581_s2 = inlined_call_operand.vmem [shape: f32[1,32], index: 2, kind: input, shape index: {}]   ;;  %s582_s3 = inlined_call_operand.vmem [shape: bf16[32,32], index: 3, kind: input, shape index: {}]   ;;  %s583_s4 = inlined_call_operand.vmem [shape: bf16[32,32], index: 4, kind: output, shape index: {}]  }
   0x1   :  { %v408_v0 = vld [vmem:[%s579_s1 + $0x38] sm:$0xff]  ;;  %v407_v2 = vld [vmem:[%s579_s1 + $0x30] sm:$0xff]  ;;  %v418_v3 = vld [vmem:[%s579_s1 + $0x88] sm:$0xff] }
   0x2   :  { %v416_v1 = vld [vmem:[%s579_s1 + $0x78] sm:$0xff]  ;;  %211 = vmatpush.bf16.msra.mxu0 %v408_v0  ;;  %428 = vmatpush.bf16.msra.mxu3 %v408_v0  ;;  %v415_v4 = vld [vmem:[%s579_s1 + $0x70] sm:$0xff]  ;;  %v417_v5 = vld [vmem:[%s579_s1 + $0x80] sm:$0xff] }
   0x3   :  { %230 = vmatpush.bf16.msra.mxu1 %v416_v1  ;;  %255 = vmatpush.bf16.msra.mxu2 %v418_v3  ;;  %v307_v6 = vld [vmem:[%s580_s0 + $0x8] sm:$0xf]  ;;  %v397_v7 = vld [vmem:[%s580_s0 + $0x10] sm:$0xf0]  ;;  %v405_v11 = vld [vmem:[%s579_s1 + $0x20] sm:$0xff] }
   0x4   :  { %v406_v8 = vld [vmem:[%s579_s1 + $0x28] sm:$0xff]  ;;  %v308_v10 = vor.u32 %v397_v7, %v307_v6  ;;  %v413_v12 = vld [vmem:[%s579_s1 + $0x60] sm:$0xff]  ;;  %v404_v13 = vld [vmem:[%s579_s1 + $0x18] sm:$0xff] }
   0x5   :  { %v414_v9 = vld [vmem:[%s579_s1 + $0x68] sm:$0xff]  ;;  %v412_v14 = vld [vmem:[%s579_s1 + $0x58] sm:$0xff]  ;;  %v403_v15 = vld [vmem:[%s579_s1 + $0x10] sm:$0xff] }
   0x6   :  { %212 = vmatpush.bf16.msra.mxu0 %v407_v2  ;;  %429 = vmatpush.bf16.msra.mxu3 %v407_v2  ;;  %v411_v16 = vld [vmem:[%s579_s1 + $0x50] sm:$0xff]  ;;  %v319_v17 = vld [vmem:[%s580_s0 + $0x20] sm:$0xf]  ;;  %v400_v18 = vld [vmem:[%s580_s0 + $0x28] sm:$0xf0] }
   0x7   :  { %231 = vmatpush.bf16.msra.mxu1 %v415_v4  ;;  %256 = vmatpush.bf16.msra.mxu2 %v417_v5  ;;  %v402_v19 = vld [vmem:[%s579_s1 + $0x8] sm:$0xff]  ;;  %v320_v21 = vor.u32 %v400_v18, %v319_v17  ;;  %v401_v22 = vld [vmem:[%s579_s1] sm:$0xff]  ;;  %v311_v25 = vld [vmem:[%s580_s0 + $0x18] sm:$0xf] }
   0x8   :  { %v410_v20 = vld [vmem:[%s579_s1 + $0x48] sm:$0xff]  ;;  %v299_v23 = vld [vmem:[%s580_s0] sm:$0xf]  ;;  %v399_v26 = vld [vmem:[%s580_s0 + $0x20] sm:$0xf0] }
   0x9   :  { %v396_v24 = vld [vmem:[%s580_s0 + $0x8] sm:$0xf0]  ;;  %v409_v27 = vld [vmem:[%s579_s1 + $0x40] sm:$0xff]  ;;  %v301_v29 = vld [vmem:[%s580_s0 + $0xc] sm:$0xf0]  ;;  %v312_v31 = vor.u32 %v399_v26, %v311_v25 }
   0xa   :  { %213 = vmatpush.bf16.msra.mxu0 %v406_v8  ;;  %430 = vmatpush.bf16.msra.mxu3 %v406_v8  ;;  %v395_v28 = vld [vmem:[%s580_s0 + $0x4] sm:$0xf]  ;;  %v300_v30 = vor.u32 %v396_v24, %v299_v23  ;;  %v398_v33 = vld [vmem:[%s580_s0 + $0x1c] sm:$0xf]  ;;  %v313_v34 = vld [vmem:[%s580_s0 + $0x24] sm:$0xf0] }
   0xb   :  { %232 = vmatpush.bf16.msra.mxu1 %v414_v9  ;;  %393 = vmatmul.msk.bf16.vlgmr.msra.gmra.mxu2 %vm204_vm0, %v308_v10  ;;  %v304_v32 = vor.u32 %v395_v28, %v301_v29  ;;  %v316_v35 = vor.u32 %v398_v33, %v313_v34  ;;  %v436_v37 = vld [vmem:[%s581_s2] ss:$0 sm:$0xff]  ;;  %v427_v58 = vld [vmem:[%s582_s3 + $0x8] sm:$0xff]  }
   0xc   :  { %v420_v39 = vld [vmem:[%s582_s3] sm:$0xff]   ;;  %v425_v63 = vunpack.c.l.bf16 %v427_v58  ;;  %v426_v9 = vunpack.c.h.bf16 %v427_v58 }
   0xd   :  { %v421_v43 = vunpack.c.l.bf16 %v420_v39  ;;  %v422_v54 = vunpack.c.h.bf16 %v420_v39 }
   0xe   :  { %214 = vmatpush.bf16.msra.mxu0 %v405_v11  ;;  %431 = vmatpush.bf16.msra.mxu3 %v405_v11 }
   0xf   :  { %233 = vmatpush.bf16.msra.mxu1 %v413_v12 }
  0x12   :  { %215 = vmatpush.bf16.msra.mxu0 %v404_v13  ;;  %432 = vmatpush.bf16.msra.mxu3 %v404_v13 }
  0x13   :  { %234 = vmatpush.bf16.msra.mxu1 %v412_v14 }
  0x16   :  { %216 = vmatpush.bf16.msra.mxu0 %v403_v15  ;;  %433 = vmatpush.bf16.msra.mxu3 %v403_v15 }
  0x17   :  { %235 = vmatpush.bf16.msra.mxu1 %v411_v16 }
  0x1a   :  { %217 = vmatpush.bf16.msra.mxu0 %v402_v19  ;;  %434 = vmatpush.bf16.msra.mxu3 %v402_v19 }
  0x1b   :  { %236 = vmatpush.bf16.msra.mxu1 %v410_v20  ;;  %394 = vmatmul.msk.bf16.gmra.mxu2 %vm204_vm0, %v320_v21 }
  0x1e   :  { %218 = vmatpush.bf16.msra.mxu0 %v401_v22  ;;  %435 = vmatpush.bf16.msra.mxu3 %v401_v22 }
  0x1f   :  { %237 = vmatpush.bf16.msra.mxu1 %v409_v27 }
  0x21   :  { %219 = vmatmul.bf16.vlgmr.msra.gmra.mxu0 %v300_v30  ;;  %224 = vmatmul.bf16.vlgmr.msra.gmra.mxu3 %v312_v31 }
  0x22   :  { %238 = vmatmul.bf16.vlgmr.msra.gmra.mxu1 %v304_v32 }
  0x32   :  { %243 = vmatmul.bf16.gmra.mxu1 %v316_v35 }
  0x8e   :  { %v258_v36 = vpop.f32.mrf.mxu2 }
  0x96   :  { %v260_v46 = vpop.f32.mrf.mxu2 }
  0x9e   :  { %v220_v38 = vpop.f32.mrf.mxu0  ;;  %v263_v60 = vpop.f32.mrf.mxu2 }
  0x9f   :  { %v221_v40 = vadd.f32 %v436_v37, %v220_v38  ;;  %v239_v41 = vpop.f32.mrf.mxu1 }
  0xa1   :  { %v240_v42 = vadd.f32 %v239_v41, %v221_v40 }
  0xa3   :  { %v259_v44 = vadd.f32 %v258_v36, %v240_v42 }
  0xa4   :  { %v225_v52 = vpop.f32.mrf.mxu3 }
  0xa5   :  { %v276_v45 = vadd.f32 %v421_v43, %v259_v44  ;;  %v226_v56 = vadd.f32 %v436_v37, %v225_v52 }
  0xa6   :  { %v222_v47 = vpop.f32.mrf.mxu0  ;;  %v265_v10 = vpop.f32.mrf.mxu2 }
  0xa7   :  { %v280_v48 = vmax.f32 %v276_v45, 0.0  ;;  %v223_v49 = vadd.f32 %v436_v37, %v222_v47  ;;  %v241_v50 = vpop.f32.mrf.mxu1 }
  0xa9   :  { %v284_v51 = vpack.c.bf16 %v280_v48, %v280_v48  ;;  %v242_v53 = vadd.f32 %v241_v50, %v223_v49 }
  0xab   :  { %289 = vst.msk [vmem:[%s583_s4] sm:$0xf] %vm288_vm1, %v284_v51  ;;  %v261_v55 = vadd.f32 %v260_v46, %v242_v53 }
  0xac   :  { %v227_v2 = vpop.f32.mrf.mxu3 }
  0xad   :  { %v277_v57 = vadd.f32 %v422_v54, %v261_v55  ;;  %v228_v4 = vadd.f32 %v436_v37, %v227_v2 }
  0xaf   :  { %v281_v59 = vmax.f32 %v277_v57, 0.0  ;;  %v244_v61 = vpop.f32.mrf.mxu1 }
  0xb0   :  { %v245_v62 = vadd.f32 %v244_v61, %v226_v56 }
  0xb1   :  { %v285_v0 = vpack.c.bf16 %v281_v59, %v281_v59 }
  0xb2   :  { %v264_v1 = vadd.f32 %v263_v60, %v245_v62 }
  0xb3   :  { %290 = vst.msk [vmem:[%s583_s4 + $0x4] sm:$0xf] %vm288_vm1, %v285_v0 }
  0xb4   :  { %v278_v3 = vadd.f32 %v425_v63, %v264_v1 }
  0xb6   :  { %v282_v5 = vmax.f32 %v278_v3, 0.0 }
  0xb7   :  { %v246_v6 = vpop.f32.mrf.mxu1 }
  0xb8   :  { %v286_v7 = vpack.c.bf16 %v282_v5, %v282_v5  ;;  %v247_v8 = vadd.f32 %v246_v6, %v228_v4 }
  0xba   :  { %291 = vst.msk [vmem:[%s583_s4 + $0x8] sm:$0xf] %vm288_vm1, %v286_v7  ;;  %v266_v11 = vadd.f32 %v265_v10, %v247_v8 }
  0xbc   :  { %v279_v12 = vadd.f32 %v426_v9, %v266_v11 }
  0xbe   :  { %v283_v13 = vmax.f32 %v279_v12, 0.0 }
  0xc0   :  { %v287_v14 = vpack.c.bf16 %v283_v13, %v283_v13 }
  0xc2   :  { %292 = vst.msk [vmem:[%s583_s4 + $0xc] sm:$0xf] %vm288_vm1, %v287_v14 }

// kernel: _lambda_.30
= control target key start
LH: loop header
LB: loop body
LE: loop exit
PB: predicated region body
PF: predicated region fallthrough
CT: control target
= control target key end

     0   :  { %vm201_vm0 = vcmask 261120   ;;  %vm273_vm1 = vcmask 519168   ;;  %s544_s1 = inlined_call_operand.vmem [shape: bf16[288,64], index: 1, kind: input, shape index: {}]   ;;  %s545_s0 = inlined_call_operand.vmem [shape: bf16[32,288], index: 0, kind: input, shape index: {}]   ;;  %s546_s2 = inlined_call_operand.vmem [shape: f32[1,64], index: 2, kind: input, shape index: {}]   ;;  %s547_s3 = inlined_call_operand.vmem [shape: bf16[32,64], index: 3, kind: output, shape index: {}]  }
   0x1   :  { %v393_v0 = vld [vmem:[%s544_s1 + $0x38] sm:$0xff]  ;;  %v392_v2 = vld [vmem:[%s544_s1 + $0x30] sm:$0xff]  ;;  %v403_v3 = vld [vmem:[%s544_s1 + $0x88] sm:$0xff] }
   0x2   :  { %v401_v1 = vld [vmem:[%s544_s1 + $0x78] sm:$0xff]  ;;  %208 = vmatpush.bf16.msra.mxu0 %v393_v0  ;;  %404 = vmatpush.bf16.msra.mxu3 %v393_v0  ;;  %v400_v4 = vld [vmem:[%s544_s1 + $0x70] sm:$0xff]  ;;  %v402_v5 = vld [vmem:[%s544_s1 + $0x80] sm:$0xff] }
   0x3   :  { %227 = vmatpush.bf16.msra.mxu1 %v401_v1  ;;  %252 = vmatpush.bf16.msra.mxu2 %v403_v3  ;;  %v292_v6 = vld [vmem:[%s545_s0 + $0x8] sm:$0xf]  ;;  %v382_v7 = vld [vmem:[%s545_s0 + $0x10] sm:$0xf0]  ;;  %v390_v11 = vld [vmem:[%s544_s1 + $0x20] sm:$0xff] }
   0x4   :  { %v391_v8 = vld [vmem:[%s544_s1 + $0x28] sm:$0xff]  ;;  %v293_v10 = vor.u32 %v382_v7, %v292_v6  ;;  %v398_v12 = vld [vmem:[%s544_s1 + $0x60] sm:$0xff]  ;;  %v389_v13 = vld [vmem:[%s544_s1 + $0x18] sm:$0xff] }
   0x5   :  { %v399_v9 = vld [vmem:[%s544_s1 + $0x68] sm:$0xff]  ;;  %v397_v14 = vld [vmem:[%s544_s1 + $0x58] sm:$0xff]  ;;  %v388_v15 = vld [vmem:[%s544_s1 + $0x10] sm:$0xff] }
   0x6   :  { %209 = vmatpush.bf16.msra.mxu0 %v392_v2  ;;  %405 = vmatpush.bf16.msra.mxu3 %v392_v2  ;;  %v396_v16 = vld [vmem:[%s544_s1 + $0x50] sm:$0xff]  ;;  %v304_v17 = vld [vmem:[%s545_s0 + $0x20] sm:$0xf]  ;;  %v385_v18 = vld [vmem:[%s545_s0 + $0x28] sm:$0xf0] }
   0x7   :  { %228 = vmatpush.bf16.msra.mxu1 %v400_v4  ;;  %253 = vmatpush.bf16.msra.mxu2 %v402_v5  ;;  %v387_v19 = vld [vmem:[%s544_s1 + $0x8] sm:$0xff]  ;;  %v305_v21 = vor.u32 %v385_v18, %v304_v17  ;;  %v386_v22 = vld [vmem:[%s544_s1] sm:$0xff]  ;;  %v296_v25 = vld [vmem:[%s545_s0 + $0x18] sm:$0xf] }
   0x8   :  { %v395_v20 = vld [vmem:[%s544_s1 + $0x48] sm:$0xff]  ;;  %v284_v23 = vld [vmem:[%s545_s0] sm:$0xf]  ;;  %v384_v26 = vld [vmem:[%s545_s0 + $0x20] sm:$0xf0] }
   0x9   :  { %v381_v24 = vld [vmem:[%s545_s0 + $0x8] sm:$0xf0]  ;;  %v394_v27 = vld [vmem:[%s544_s1 + $0x40] sm:$0xff]  ;;  %v286_v29 = vld [vmem:[%s545_s0 + $0xc] sm:$0xf0]  ;;  %v297_v31 = vor.u32 %v384_v26, %v296_v25 }
   0xa   :  { %210 = vmatpush.bf16.msra.mxu0 %v391_v8  ;;  %406 = vmatpush.bf16.msra.mxu3 %v391_v8  ;;  %v380_v28 = vld [vmem:[%s545_s0 + $0x4] sm:$0xf]  ;;  %v285_v30 = vor.u32 %v381_v24, %v284_v23  ;;  %v383_v33 = vld [vmem:[%s545_s0 + $0x1c] sm:$0xf]  ;;  %v298_v34 = vld [vmem:[%s545_s0 + $0x24] sm:$0xf0] }
   0xb   :  { %229 = vmatpush.bf16.msra.mxu1 %v399_v9  ;;  %378 = vmatmul.msk.bf16.vlgmr.msra.gmra.mxu2 %vm201_vm0, %v293_v10  ;;  %v289_v32 = vor.u32 %v380_v28, %v286_v29  ;;  %v301_v35 = vor.u32 %v383_v33, %v298_v34  ;;  %v412_v37 = vld [vmem:[%s546_s2] ss:$0 sm:$0xff] }
   0xe   :  { %211 = vmatpush.bf16.msra.mxu0 %v390_v11  ;;  %407 = vmatpush.bf16.msra.mxu3 %v390_v11 }
   0xf   :  { %230 = vmatpush.bf16.msra.mxu1 %v398_v12 }
  0x12   :  { %212 = vmatpush.bf16.msra.mxu0 %v389_v13  ;;  %408 = vmatpush.bf16.msra.mxu3 %v389_v13 }
  0x13   :  { %231 = vmatpush.bf16.msra.mxu1 %v397_v14 }
  0x16   :  { %213 = vmatpush.bf16.msra.mxu0 %v388_v15  ;;  %409 = vmatpush.bf16.msra.mxu3 %v388_v15 }
  0x17   :  { %232 = vmatpush.bf16.msra.mxu1 %v396_v16 }
  0x1a   :  { %214 = vmatpush.bf16.msra.mxu0 %v387_v19  ;;  %410 = vmatpush.bf16.msra.mxu3 %v387_v19 }
  0x1b   :  { %233 = vmatpush.bf16.msra.mxu1 %v395_v20  ;;  %379 = vmatmul.msk.bf16.gmra.mxu2 %vm201_vm0, %v305_v21 }
  0x1e   :  { %215 = vmatpush.bf16.msra.mxu0 %v386_v22  ;;  %411 = vmatpush.bf16.msra.mxu3 %v386_v22 }
  0x1f   :  { %234 = vmatpush.bf16.msra.mxu1 %v394_v27 }
  0x21   :  { %216 = vmatmul.bf16.vlgmr.msra.gmra.mxu0 %v285_v30  ;;  %221 = vmatmul.bf16.vlgmr.msra.gmra.mxu3 %v297_v31 }
  0x22   :  { %235 = vmatmul.bf16.vlgmr.msra.gmra.mxu1 %v289_v32 }
  0x32   :  { %240 = vmatmul.bf16.gmra.mxu1 %v301_v35 }
  0x8e   :  { %v255_v36 = vpop.f32.mrf.mxu2 }
  0x96   :  { %v257_v44 = vpop.f32.mrf.mxu2 }
  0x9e   :  { %v217_v38 = vpop.f32.mrf.mxu0  ;;  %v260_v55 = vpop.f32.mrf.mxu2 }
  0x9f   :  { %v218_v39 = vadd.f32 %v412_v37, %v217_v38  ;;  %v236_v40 = vpop.f32.mrf.mxu1 }
  0xa1   :  { %v237_v41 = vadd.f32 %v236_v40, %v218_v39 }
  0xa3   :  { %v256_v42 = vadd.f32 %v255_v36, %v237_v41 }
  0xa4   :  { %v222_v49 = vpop.f32.mrf.mxu3 }
  0xa5   :  { %v265_v43 = vmax.f32 %v256_v42, 0.0  ;;  %v223_v52 = vadd.f32 %v412_v37, %v222_v49 }
  0xa6   :  { %v219_v45 = vpop.f32.mrf.mxu0  ;;  %v262_v1 = vpop.f32.mrf.mxu2 }
  0xa7   :  { %v269_v46 = vpack.c.bf16 %v265_v43, %v265_v43  ;;  %v220_v47 = vadd.f32 %v412_v37, %v219_v45  ;;  %v238_v48 = vpop.f32.mrf.mxu1 }
  0xa9   :  { %274 = vst.msk [vmem:[%s547_s3] sm:$0xf] %vm273_vm1, %v269_v46  ;;  %v239_v50 = vadd.f32 %v238_v48, %v220_v47 }
  0xab   :  { %v258_v51 = vadd.f32 %v257_v44, %v239_v50 }
  0xac   :  { %v224_v59 = vpop.f32.mrf.mxu3 }
  0xad   :  { %v266_v53 = vmax.f32 %v258_v51, 0.0  ;;  %v225_v61 = vadd.f32 %v412_v37, %v224_v59 }
  0xaf   :  { %v270_v54 = vpack.c.bf16 %v266_v53, %v266_v53  ;;  %v241_v56 = vpop.f32.mrf.mxu1 }
  0xb0   :  { %v242_v57 = vadd.f32 %v241_v56, %v223_v52 }
  0xb1   :  { %275 = vst.msk [vmem:[%s547_s3 + $0x4] sm:$0xf] %vm273_vm1, %v270_v54 }
  0xb2   :  { %v261_v58 = vadd.f32 %v260_v55, %v242_v57 }
  0xb4   :  { %v267_v60 = vmax.f32 %v261_v58, 0.0 }
  0xb6   :  { %v271_v62 = vpack.c.bf16 %v267_v60, %v267_v60 }
  0xb7   :  { %v243_v63 = vpop.f32.mrf.mxu1 }
  0xb8   :  { %276 = vst.msk [vmem:[%s547_s3 + $0x8] sm:$0xf] %vm273_vm1, %v271_v62  ;;  %v244_v0 = vadd.f32 %v243_v63, %v225_v61 }
  0xba   :  { %v263_v2 = vadd.f32 %v262_v1, %v244_v0 }
  0xbc   :  { %v268_v3 = vmax.f32 %v263_v2, 0.0 }
  0xbe   :  { %v272_v4 = vpack.c.bf16 %v268_v3, %v268_v3 }
  0xc0   :  { %277 = vst.msk [vmem:[%s547_s3 + $0xc] sm:$0xf] %vm273_vm1, %v272_v4 }

// kernel: _lambda_.28
= control target key start
LH: loop header
LB: loop body
LE: loop exit
PB: predicated region body
PF: predicated region fallthrough
CT: control target
= control target key end

     0   :  { %vm201_vm0 = vcmask 261120   ;;  %vm273_vm1 = vcmask 257024   ;;  %s544_s1 = inlined_call_operand.vmem [shape: bf16[288,32], index: 1, kind: input, shape index: {}]   ;;  %s545_s0 = inlined_call_operand.vmem [shape: bf16[32,288], index: 0, kind: input, shape index: {}]   ;;  %s546_s2 = inlined_call_operand.vmem [shape: f32[1,32], index: 2, kind: input, shape index: {}]   ;;  %s547_s3 = inlined_call_operand.vmem [shape: bf16[32,32], index: 3, kind: output, shape index: {}]  }
   0x1   :  { %v393_v0 = vld [vmem:[%s544_s1 + $0x38] sm:$0xff]  ;;  %v392_v2 = vld [vmem:[%s544_s1 + $0x30] sm:$0xff]  ;;  %v403_v3 = vld [vmem:[%s544_s1 + $0x88] sm:$0xff] }
   0x2   :  { %v401_v1 = vld [vmem:[%s544_s1 + $0x78] sm:$0xff]  ;;  %208 = vmatpush.bf16.msra.mxu0 %v393_v0  ;;  %404 = vmatpush.bf16.msra.mxu3 %v393_v0  ;;  %v400_v4 = vld [vmem:[%s544_s1 + $0x70] sm:$0xff]  ;;  %v402_v5 = vld [vmem:[%s544_s1 + $0x80] sm:$0xff] }
   0x3   :  { %227 = vmatpush.bf16.msra.mxu1 %v401_v1  ;;  %252 = vmatpush.bf16.msra.mxu2 %v403_v3  ;;  %v292_v6 = vld [vmem:[%s545_s0 + $0x8] sm:$0xf]  ;;  %v382_v7 = vld [vmem:[%s545_s0 + $0x10] sm:$0xf0]  ;;  %v390_v11 = vld [vmem:[%s544_s1 + $0x20] sm:$0xff] }
   0x4   :  { %v391_v8 = vld [vmem:[%s544_s1 + $0x28] sm:$0xff]  ;;  %v293_v10 = vor.u32 %v382_v7, %v292_v6  ;;  %v398_v12 = vld [vmem:[%s544_s1 + $0x60] sm:$0xff]  ;;  %v389_v13 = vld [vmem:[%s544_s1 + $0x18] sm:$0xff] }
   0x5   :  { %v399_v9 = vld [vmem:[%s544_s1 + $0x68] sm:$0xff]  ;;  %v397_v14 = vld [vmem:[%s544_s1 + $0x58] sm:$0xff]  ;;  %v388_v15 = vld [vmem:[%s544_s1 + $0x10] sm:$0xff] }
   0x6   :  { %209 = vmatpush.bf16.msra.mxu0 %v392_v2  ;;  %405 = vmatpush.bf16.msra.mxu3 %v392_v2  ;;  %v396_v16 = vld [vmem:[%s544_s1 + $0x50] sm:$0xff]  ;;  %v304_v17 = vld [vmem:[%s545_s0 + $0x20] sm:$0xf]  ;;  %v385_v18 = vld [vmem:[%s545_s0 + $0x28] sm:$0xf0] }
   0x7   :  { %228 = vmatpush.bf16.msra.mxu1 %v400_v4  ;;  %253 = vmatpush.bf16.msra.mxu2 %v402_v5  ;;  %v387_v19 = vld [vmem:[%s544_s1 + $0x8] sm:$0xff]  ;;  %v305_v21 = vor.u32 %v385_v18, %v304_v17  ;;  %v386_v22 = vld [vmem:[%s544_s1] sm:$0xff]  ;;  %v296_v25 = vld [vmem:[%s545_s0 + $0x18] sm:$0xf] }
   0x8   :  { %v395_v20 = vld [vmem:[%s544_s1 + $0x48] sm:$0xff]  ;;  %v284_v23 = vld [vmem:[%s545_s0] sm:$0xf]  ;;  %v384_v26 = vld [vmem:[%s545_s0 + $0x20] sm:$0xf0] }
   0x9   :  { %v381_v24 = vld [vmem:[%s545_s0 + $0x8] sm:$0xf0]  ;;  %v394_v27 = vld [vmem:[%s544_s1 + $0x40] sm:$0xff]  ;;  %v286_v29 = vld [vmem:[%s545_s0 + $0xc] sm:$0xf0]  ;;  %v297_v31 = vor.u32 %v384_v26, %v296_v25 }
   0xa   :  { %210 = vmatpush.bf16.msra.mxu0 %v391_v8  ;;  %406 = vmatpush.bf16.msra.mxu3 %v391_v8  ;;  %v380_v28 = vld [vmem:[%s545_s0 + $0x4] sm:$0xf]  ;;  %v285_v30 = vor.u32 %v381_v24, %v284_v23  ;;  %v383_v33 = vld [vmem:[%s545_s0 + $0x1c] sm:$0xf]  ;;  %v298_v34 = vld [vmem:[%s545_s0 + $0x24] sm:$0xf0] }
   0xb   :  { %229 = vmatpush.bf16.msra.mxu1 %v399_v9  ;;  %378 = vmatmul.msk.bf16.vlgmr.msra.gmra.mxu2 %vm201_vm0, %v293_v10  ;;  %v289_v32 = vor.u32 %v380_v28, %v286_v29  ;;  %v301_v35 = vor.u32 %v383_v33, %v298_v34  ;;  %v412_v37 = vld [vmem:[%s546_s2] ss:$0 sm:$0xff] }
   0xe   :  { %211 = vmatpush.bf16.msra.mxu0 %v390_v11  ;;  %407 = vmatpush.bf16.msra.mxu3 %v390_v11 }
   0xf   :  { %230 = vmatpush.bf16.msra.mxu1 %v398_v12 }
  0x12   :  { %212 = vmatpush.bf16.msra.mxu0 %v389_v13  ;;  %408 = vmatpush.bf16.msra.mxu3 %v389_v13 }
  0x13   :  { %231 = vmatpush.bf16.msra.mxu1 %v397_v14 }
  0x16   :  { %213 = vmatpush.bf16.msra.mxu0 %v388_v15  ;;  %409 = vmatpush.bf16.msra.mxu3 %v388_v15 }
  0x17   :  { %232 = vmatpush.bf16.msra.mxu1 %v396_v16 }
  0x1a   :  { %214 = vmatpush.bf16.msra.mxu0 %v387_v19  ;;  %410 = vmatpush.bf16.msra.mxu3 %v387_v19 }
  0x1b   :  { %233 = vmatpush.bf16.msra.mxu1 %v395_v20  ;;  %379 = vmatmul.msk.bf16.gmra.mxu2 %vm201_vm0, %v305_v21 }
  0x1e   :  { %215 = vmatpush.bf16.msra.mxu0 %v386_v22  ;;  %411 = vmatpush.bf16.msra.mxu3 %v386_v22 }
  0x1f   :  { %234 = vmatpush.bf16.msra.mxu1 %v394_v27 }
  0x21   :  { %216 = vmatmul.bf16.vlgmr.msra.gmra.mxu0 %v285_v30  ;;  %221 = vmatmul.bf16.vlgmr.msra.gmra.mxu3 %v297_v31 }
  0x22   :  { %235 = vmatmul.bf16.vlgmr.msra.gmra.mxu1 %v289_v32 }
  0x32   :  { %240 = vmatmul.bf16.gmra.mxu1 %v301_v35 }
  0x8e   :  { %v255_v36 = vpop.f32.mrf.mxu2 }
  0x96   :  { %v257_v44 = vpop.f32.mrf.mxu2 }
  0x9e   :  { %v217_v38 = vpop.f32.mrf.mxu0  ;;  %v260_v55 = vpop.f32.mrf.mxu2 }
  0x9f   :  { %v218_v39 = vadd.f32 %v412_v37, %v217_v38  ;;  %v236_v40 = vpop.f32.mrf.mxu1 }
  0xa1   :  { %v237_v41 = vadd.f32 %v236_v40, %v218_v39 }
  0xa3   :  { %v256_v42 = vadd.f32 %v255_v36, %v237_v41 }
  0xa4   :  { %v222_v49 = vpop.f32.mrf.mxu3 }
  0xa5   :  { %v265_v43 = vmax.f32 %v256_v42, 0.0  ;;  %v223_v52 = vadd.f32 %v412_v37, %v222_v49 }
  0xa6   :  { %v219_v45 = vpop.f32.mrf.mxu0  ;;  %v262_v1 = vpop.f32.mrf.mxu2 }
  0xa7   :  { %v269_v46 = vpack.c.bf16 %v265_v43, %v265_v43  ;;  %v220_v47 = vadd.f32 %v412_v37, %v219_v45  ;;  %v238_v48 = vpop.f32.mrf.mxu1 }
  0xa9   :  { %274 = vst.msk [vmem:[%s547_s3] sm:$0xf] %vm273_vm1, %v269_v46  ;;  %v239_v50 = vadd.f32 %v238_v48, %v220_v47 }
  0xab   :  { %v258_v51 = vadd.f32 %v257_v44, %v239_v50 }
  0xac   :  { %v224_v59 = vpop.f32.mrf.mxu3 }
  0xad   :  { %v266_v53 = vmax.f32 %v258_v51, 0.0  ;;  %v225_v61 = vadd.f32 %v412_v37, %v224_v59 }
  0xaf   :  { %v270_v54 = vpack.c.bf16 %v266_v53, %v266_v53  ;;  %v241_v56 = vpop.f32.mrf.mxu1 }
  0xb0   :  { %v242_v57 = vadd.f32 %v241_v56, %v223_v52 }
  0xb1   :  { %275 = vst.msk [vmem:[%s547_s3 + $0x4] sm:$0xf] %vm273_vm1, %v270_v54 }
  0xb2   :  { %v261_v58 = vadd.f32 %v260_v55, %v242_v57 }
  0xb4   :  { %v267_v60 = vmax.f32 %v261_v58, 0.0 }
  0xb6   :  { %v271_v62 = vpack.c.bf16 %v267_v60, %v267_v60 }
  0xb7   :  { %v243_v63 = vpop.f32.mrf.mxu1 }
  0xb8   :  { %276 = vst.msk [vmem:[%s547_s3 + $0x8] sm:$0xf] %vm273_vm1, %v271_v62  ;;  %v244_v0 = vadd.f32 %v243_v63, %v225_v61 }
  0xba   :  { %v263_v2 = vadd.f32 %v262_v1, %v244_v0 }
  0xbc   :  { %v268_v3 = vmax.f32 %v263_v2, 0.0 }
  0xbe   :  { %v272_v4 = vpack.c.bf16 %v268_v3, %v268_v3 }
  0xc0   :  { %277 = vst.msk [vmem:[%s547_s3 + $0xc] sm:$0xf] %vm273_vm1, %v272_v4 }

// kernel: _lambda_.32
= control target key start
LH: loop header
LB: loop body
LE: loop exit
PB: predicated region body
PF: predicated region fallthrough
CT: control target
= control target key end

     0   :  { %vm179_vm0 = vcmask 130048   ;;  %vm334_vm1 = vcmask 257024   ;;  %s734_s1 = inlined_call_operand.vmem [shape: bf16[144,32], index: 1, kind: input, shape index: {}]   ;;  %s735_s0 = inlined_call_operand.vmem [shape: bf16[128,144], index: 0, kind: input, shape index: {}]   ;;  %s736_s2 = inlined_call_operand.vmem [shape: f32[1,32], index: 2, kind: input, shape index: {}]   ;;  %s737_s3 = inlined_call_operand.vmem [shape: bf16[128,32], index: 3, kind: output, shape index: {}]  }
   0x1   :  { %v486_v0 = vld [vmem:[%s734_s1 + $0x38] sm:$0xff]  ;;  %v487_v1 = vld [vmem:[%s734_s1 + $0x40] sm:$0xff]  ;;  %v359_v3 = vld [vmem:[%s735_s0 + $0x8] sm:$0xf0] }
   0x2   :  { %v463_v2 = vld [vmem:[%s735_s0 + $0x4] sm:$0xf]  ;;  %204 = vmatpush.bf16.msra.mxu0 %v486_v0  ;;  %488 = vmatpush.bf16.msra.mxu2 %v486_v0  ;;  %v485_v5 = vld [vmem:[%s734_s1 + $0x30] sm:$0xff]  ;;  %v484_v6 = vld [vmem:[%s734_s1 + $0x28] sm:$0xff] }
   0x3   :  { %v362_v4 = vor.u32 %v463_v2, %v359_v3  ;;  %260 = vmatpush.bf16.msra.mxu1 %v487_v1  ;;  %496 = vmatpush.bf16.msra.mxu3 %v487_v1  ;;  %v473_v7 = vld [vmem:[%s735_s0 + $0x54] sm:$0xf]  ;;  %v399_v8 = vld [vmem:[%s735_s0 + $0x58] sm:$0xf0]  ;;  %v483_v10 = vld [vmem:[%s734_s1 + $0x20] sm:$0xff] }
   0x4   :  { %v402_v9 = vor.u32 %v473_v7, %v399_v8  ;;  %v482_v11 = vld [vmem:[%s734_s1 + $0x18] sm:$0xff]  ;;  %v465_v12 = vld [vmem:[%s735_s0 + $0x14] sm:$0xf]  ;;  %v480_v16 = vld [vmem:[%s734_s1 + $0x8] sm:$0xff] }
   0x5   :  { %v367_v13 = vld [vmem:[%s735_s0 + $0x18] sm:$0xf0]  ;;  %v481_v15 = vld [vmem:[%s734_s1 + $0x10] sm:$0xff]  ;;  %v475_v17 = vld [vmem:[%s735_s0 + $0x64] sm:$0xf] }
   0x6   :  { %455 = vmatmul.msk.bf16.vlgmr.msra.gmra.mxu1 %vm179_vm0, %v362_v4  ;;  %205 = vmatpush.bf16.msra.mxu0 %v485_v5  ;;  %v370_v14 = vor.u32 %v465_v12, %v367_v13  ;;  %v407_v18 = vld [vmem:[%s735_s0 + $0x68] sm:$0xf0]  ;;  %v479_v20 = vld [vmem:[%s734_s1] sm:$0xff]  ;;  %v464_v22 = vld [vmem:[%s735_s0 + $0x4] sm:$0xf0] }
   0x7   :  { %489 = vmatpush.bf16.msra.mxu2 %v485_v5  ;;  %460 = vmatmul.msk.bf16.vlgmr.msra.gmra.mxu3 %vm179_vm0, %v402_v9  ;;  %v410_v19 = vor.u32 %v475_v17, %v407_v18  ;;  %v357_v21 = vld [vmem:[%s735_s0] sm:$0xf]  ;;  %v472_v24 = vld [vmem:[%s735_s0 + $0x44] sm:$0xf0]  ;;  %v467_v27 = vld [vmem:[%s735_s0 + $0x24] sm:$0xf] }
   0x8   :  { %v389_v23 = vld [vmem:[%s735_s0 + $0x40] sm:$0xf]  ;;  %v358_v25 = vor.u32 %v464_v22, %v357_v21  ;;  %v375_v28 = vld [vmem:[%s735_s0 + $0x28] sm:$0xf0]  ;;  %v477_v30 = vld [vmem:[%s735_s0 + $0x74] sm:$0xf] }
   0x9   :  { %v390_v26 = vor.u32 %v472_v24, %v389_v23  ;;  %v378_v29 = vor.u32 %v467_v27, %v375_v28  ;;  %v415_v31 = vld [vmem:[%s735_s0 + $0x78] sm:$0xf0]  ;;  %v365_v33 = vld [vmem:[%s735_s0 + $0x10] sm:$0xf]  ;;  %v466_v34 = vld [vmem:[%s735_s0 + $0x14] sm:$0xf0] }
   0xa   :  { %206 = vmatpush.bf16.msra.mxu0 %v484_v6  ;;  %v418_v32 = vor.u32 %v477_v30, %v415_v31  ;;  %v397_v35 = vld [vmem:[%s735_s0 + $0x50] sm:$0xf]  ;;  %v474_v36 = vld [vmem:[%s735_s0 + $0x54] sm:$0xf0]  ;;  %v366_v37 = vor.u32 %v466_v34, %v365_v33  ;;  %v469_v39 = vld [vmem:[%s735_s0 + $0x34] sm:$0xf] }
   0xb   :  { %490 = vmatpush.bf16.msra.mxu2 %v484_v6  ;;  %v398_v38 = vor.u32 %v474_v36, %v397_v35  ;;  %v383_v40 = vld [vmem:[%s735_s0 + $0x38] sm:$0xf0]  ;;  %v373_v42 = vld [vmem:[%s735_s0 + $0x20] sm:$0xf]  ;;  %v468_v43 = vld [vmem:[%s735_s0 + $0x24] sm:$0xf0] }
   0xc   :  { %v386_v41 = vor.u32 %v469_v39, %v383_v40  ;;  %v405_v44 = vld [vmem:[%s735_s0 + $0x60] sm:$0xf]  ;;  %v476_v45 = vld [vmem:[%s735_s0 + $0x64] sm:$0xf0]  ;;  %v374_v46 = vor.u32 %v468_v43, %v373_v42  ;;  %v471_v48 = vld [vmem:[%s735_s0 + $0x44] sm:$0xf] }
   0xd   :  { %v406_v47 = vor.u32 %v476_v45, %v405_v44  ;;  %v391_v49 = vld [vmem:[%s735_s0 + $0x48] sm:$0xf0]  ;;  %v381_v51 = vld [vmem:[%s735_s0 + $0x30] sm:$0xf]  ;;  %v470_v52 = vld [vmem:[%s735_s0 + $0x34] sm:$0xf0] }
   0xe   :  { %207 = vmatpush.bf16.msra.mxu0 %v483_v10  ;;  %v394_v50 = vor.u32 %v471_v48, %v391_v49  ;;  %v413_v53 = vld [vmem:[%s735_s0 + $0x70] sm:$0xf]  ;;  %v478_v54 = vld [vmem:[%s735_s0 + $0x74] sm:$0xf0]  ;;  %v382_v55 = vor.u32 %v470_v52, %v381_v51  ;;  %v652_v61 = vld [vmem:[%s736_s2] ss:$0 sm:$0xff] }
   0xf   :  { %491 = vmatpush.bf16.msra.mxu2 %v483_v10  ;;  %v414_v56 = vor.u32 %v478_v54, %v413_v53 }
  0x12   :  { %208 = vmatpush.bf16.msra.mxu0 %v482_v11 }
  0x13   :  { %492 = vmatpush.bf16.msra.mxu2 %v482_v11 }
  0x16   :  { %456 = vmatmul.msk.bf16.gmra.mxu1 %vm179_vm0, %v370_v14  ;;  %209 = vmatpush.bf16.msra.mxu0 %v481_v15 }
  0x17   :  { %493 = vmatpush.bf16.msra.mxu2 %v481_v15  ;;  %461 = vmatmul.msk.bf16.gmra.mxu3 %vm179_vm0, %v410_v19 }
  0x1a   :  { %210 = vmatpush.bf16.msra.mxu0 %v480_v16 }
  0x1b   :  { %494 = vmatpush.bf16.msra.mxu2 %v480_v16 }
  0x1e   :  { %211 = vmatpush.bf16.msra.mxu0 %v479_v20 }
  0x1f   :  { %495 = vmatpush.bf16.msra.mxu2 %v479_v20 }
  0x21   :  { %212 = vmatmul.bf16.vlgmr.msra.gmra.mxu0 %v358_v25 }
  0x22   :  { %232 = vmatmul.bf16.vlgmr.msra.gmra.mxu2 %v390_v26 }
  0x26   :  { %457 = vmatmul.msk.bf16.gmra.mxu1 %vm179_vm0, %v378_v29 }
  0x27   :  { %462 = vmatmul.msk.bf16.gmra.mxu3 %vm179_vm0, %v418_v32 }
  0x31   :  { %217 = vmatmul.bf16.gmra.mxu0 %v366_v37 }
  0x32   :  { %237 = vmatmul.bf16.gmra.mxu2 %v398_v38 }
  0x36   :  { %458 = vmatmul.msk.bf16.gmra.mxu1 %vm179_vm0, %v386_v41 }
  0x41   :  { %222 = vmatmul.bf16.gmra.mxu0 %v374_v46 }
  0x42   :  { %242 = vmatmul.bf16.gmra.mxu2 %v406_v47 }
  0x46   :  { %459 = vmatmul.msk.bf16.gmra.mxu1 %vm179_vm0, %v394_v50 }
  0x51   :  { %227 = vmatmul.bf16.gmra.mxu0 %v382_v55 }
  0x52   :  { %247 = vmatmul.bf16.gmra.mxu2 %v414_v56 }
  0x83   :  { %v262_v57 = vpop.f32.mrf.mxu1 }
  0x8a   :  { %v287_v12 = vpop.f32.mrf.mxu3 }
  0x8b   :  { %v264_v58 = vpop.f32.mrf.mxu1 }
  0x92   :  { %v289_v23 = vpop.f32.mrf.mxu3 }
  0x93   :  { %v267_v59 = vpop.f32.mrf.mxu1 }
  0x9a   :  { %v292_v37 = vpop.f32.mrf.mxu3 }
  0x9b   :  { %v269_v60 = vpop.f32.mrf.mxu1 }
  0x9e   :  { %v213_v62 = vpop.f32.mrf.mxu0 }
  0x9f   :  { %v214_v63 = vadd.f32 %v652_v61, %v213_v62 }
  0xa1   :  { %v263_v0 = vadd.f32 %v262_v57, %v214_v63 }
  0xa2   :  { %v294_v56 = vpop.f32.mrf.mxu3 }
  0xa3   :  { %v302_v1 = vmax.f32 %v263_v0, 0.0  ;;  %v272_v2 = vpop.f32.mrf.mxu1 }
  0xa5   :  { %v318_v3 = vpack.c.bf16 %v302_v1, %v302_v1  ;;  %v233_v4 = vpop.f32.mrf.mxu2 }
  0xa6   :  { %v215_v5 = vpop.f32.mrf.mxu0  ;;  %v234_v38 = vadd.f32 %v652_v61, %v233_v4 }
  0xa7   :  { %335 = vst.msk [vmem:[%s737_s3] sm:$0xf] %vm334_vm1, %v318_v3  ;;  %v216_v6 = vadd.f32 %v652_v61, %v215_v5 }
  0xa9   :  { %v265_v7 = vadd.f32 %v264_v58, %v216_v6 }
  0xab   :  { %v303_v8 = vmax.f32 %v265_v7, 0.0  ;;  %v274_v9 = vpop.f32.mrf.mxu1 }
  0xad   :  { %v319_v10 = vpack.c.bf16 %v303_v8, %v303_v8  ;;  %v235_v11 = vpop.f32.mrf.mxu2 }
  0xae   :  { %v218_v13 = vpop.f32.mrf.mxu0  ;;  %v236_v53 = vadd.f32 %v652_v61, %v235_v11 }
  0xaf   :  { %336 = vst.msk [vmem:[%s737_s3 + $0x4] sm:$0xf] %vm334_vm1, %v319_v10  ;;  %v219_v14 = vadd.f32 %v652_v61, %v218_v13  ;;  %v297_v10 = vpop.f32.mrf.mxu3 }
  0xb1   :  { %v268_v15 = vadd.f32 %v267_v59, %v219_v14 }
  0xb3   :  { %v304_v16 = vmax.f32 %v268_v15, 0.0  ;;  %v277_v17 = vpop.f32.mrf.mxu1 }
  0xb5   :  { %v320_v18 = vpack.c.bf16 %v304_v16, %v304_v16  ;;  %v238_v19 = vpop.f32.mrf.mxu2 }
  0xb6   :  { %v239_v20 = vadd.f32 %v652_v61, %v238_v19  ;;  %v220_v21 = vpop.f32.mrf.mxu0 }
  0xb7   :  { %337 = vst.msk [vmem:[%s737_s3 + $0x8] sm:$0xf] %vm334_vm1, %v320_v18  ;;  %v221_v22 = vadd.f32 %v652_v61, %v220_v21 }
  0xb8   :  { %v288_v24 = vadd.f32 %v287_v12, %v239_v20 }
  0xb9   :  { %v270_v25 = vadd.f32 %v269_v60, %v221_v22 }
  0xba   :  { %v312_v26 = vmax.f32 %v288_v24, 0.0 }
  0xbb   :  { %v305_v27 = vmax.f32 %v270_v25, 0.0  ;;  %v279_v28 = vpop.f32.mrf.mxu1 }
  0xbc   :  { %v328_v29 = vpack.c.bf16 %v312_v26, %v312_v26 }
  0xbd   :  { %v321_v30 = vpack.c.bf16 %v305_v27, %v305_v27  ;;  %v240_v31 = vpop.f32.mrf.mxu2 }
  0xbe   :  { %345 = vst.msk [vmem:[%s737_s3 + $0x28] sm:$0xf] %vm334_vm1, %v328_v29  ;;  %v241_v32 = vadd.f32 %v652_v61, %v240_v31  ;;  %v223_v33 = vpop.f32.mrf.mxu0 }
  0xbf   :  { %338 = vst.msk [vmem:[%s737_s3 + $0xc] sm:$0xf] %vm334_vm1, %v321_v30  ;;  %v224_v34 = vadd.f32 %v652_v61, %v223_v33 }
  0xc0   :  { %v290_v35 = vadd.f32 %v289_v23, %v241_v32  ;;  %v299_v23 = vpop.f32.mrf.mxu3 }
  0xc1   :  { %v273_v36 = vadd.f32 %v272_v2, %v224_v34 }
  0xc2   :  { %v313_v39 = vmax.f32 %v290_v35, 0.0 }
  0xc3   :  { %v306_v40 = vmax.f32 %v273_v36, 0.0  ;;  %v282_v41 = vpop.f32.mrf.mxu1 }
  0xc4   :  { %v329_v42 = vpack.c.bf16 %v313_v39, %v313_v39  ;;  %v283_v43 = vadd.f32 %v282_v41, %v234_v38 }
  0xc5   :  { %v322_v44 = vpack.c.bf16 %v306_v40, %v306_v40  ;;  %v243_v45 = vpop.f32.mrf.mxu2 }
  0xc6   :  { %346 = vst.msk [vmem:[%s737_s3 + $0x2c] sm:$0xf] %vm334_vm1, %v329_v42  ;;  %v310_v46 = vmax.f32 %v283_v43, 0.0  ;;  %v244_v47 = vadd.f32 %v652_v61, %v243_v45  ;;  %v225_v48 = vpop.f32.mrf.mxu0 }
  0xc7   :  { %339 = vst.msk [vmem:[%s737_s3 + $0x10] sm:$0xf] %vm334_vm1, %v322_v44  ;;  %v226_v49 = vadd.f32 %v652_v61, %v225_v48 }
  0xc8   :  { %v326_v50 = vpack.c.bf16 %v310_v46, %v310_v46  ;;  %v293_v51 = vadd.f32 %v292_v37, %v244_v47 }
  0xc9   :  { %v275_v52 = vadd.f32 %v274_v9, %v226_v49 }
  0xca   :  { %343 = vst.msk [vmem:[%s737_s3 + $0x20] sm:$0xf] %vm334_vm1, %v326_v50  ;;  %v314_v54 = vmax.f32 %v293_v51, 0.0 }
  0xcb   :  { %v307_v55 = vmax.f32 %v275_v52, 0.0  ;;  %v284_v57 = vpop.f32.mrf.mxu1 }
  0xcc   :  { %v330_v58 = vpack.c.bf16 %v314_v54, %v314_v54  ;;  %v285_v59 = vadd.f32 %v284_v57, %v236_v53 }
  0xcd   :  { %v323_v60 = vpack.c.bf16 %v307_v55, %v307_v55  ;;  %v245_v62 = vpop.f32.mrf.mxu2 }
  0xce   :  { %347 = vst.msk [vmem:[%s737_s3 + $0x30] sm:$0xf] %vm334_vm1, %v330_v58  ;;  %v311_v63 = vmax.f32 %v285_v59, 0.0  ;;  %v246_v0 = vadd.f32 %v652_v61, %v245_v62  ;;  %v228_v1 = vpop.f32.mrf.mxu0 }
  0xcf   :  { %340 = vst.msk [vmem:[%s737_s3 + $0x14] sm:$0xf] %vm334_vm1, %v323_v60  ;;  %v229_v2 = vadd.f32 %v652_v61, %v228_v1 }
  0xd0   :  { %v327_v3 = vpack.c.bf16 %v311_v63, %v311_v63  ;;  %v295_v4 = vadd.f32 %v294_v56, %v246_v0 }
  0xd1   :  { %v278_v5 = vadd.f32 %v277_v17, %v229_v2 }
  0xd2   :  { %344 = vst.msk [vmem:[%s737_s3 + $0x24] sm:$0xf] %vm334_vm1, %v327_v3  ;;  %v315_v6 = vmax.f32 %v295_v4, 0.0 }
  0xd3   :  { %v308_v7 = vmax.f32 %v278_v5, 0.0 }
  0xd4   :  { %v331_v8 = vpack.c.bf16 %v315_v6, %v315_v6 }
  0xd5   :  { %v324_v9 = vpack.c.bf16 %v308_v7, %v308_v7  ;;  %v248_v11 = vpop.f32.mrf.mxu2 }
  0xd6   :  { %348 = vst.msk [vmem:[%s737_s3 + $0x34] sm:$0xf] %vm334_vm1, %v331_v8  ;;  %v249_v12 = vadd.f32 %v652_v61, %v248_v11  ;;  %v230_v13 = vpop.f32.mrf.mxu0 }
  0xd7   :  { %341 = vst.msk [vmem:[%s737_s3 + $0x18] sm:$0xf] %vm334_vm1, %v324_v9  ;;  %v231_v14 = vadd.f32 %v652_v61, %v230_v13 }
  0xd8   :  { %v298_v15 = vadd.f32 %v297_v10, %v249_v12 }
  0xd9   :  { %v280_v16 = vadd.f32 %v279_v28, %v231_v14 }
  0xda   :  { %v316_v17 = vmax.f32 %v298_v15, 0.0 }
  0xdb   :  { %v309_v18 = vmax.f32 %v280_v16, 0.0 }
  0xdc   :  { %v332_v19 = vpack.c.bf16 %v316_v17, %v316_v17 }
  0xdd   :  { %v325_v20 = vpack.c.bf16 %v309_v18, %v309_v18  ;;  %v250_v21 = vpop.f32.mrf.mxu2 }
  0xde   :  { %349 = vst.msk [vmem:[%s737_s3 + $0x38] sm:$0xf] %vm334_vm1, %v332_v19  ;;  %v251_v22 = vadd.f32 %v652_v61, %v250_v21 }
  0xdf   :  { %342 = vst.msk [vmem:[%s737_s3 + $0x1c] sm:$0xf] %vm334_vm1, %v325_v20 }
  0xe0   :  { %v300_v24 = vadd.f32 %v299_v23, %v251_v22 }
  0xe2   :  { %v317_v25 = vmax.f32 %v300_v24, 0.0 }
  0xe4   :  { %v333_v26 = vpack.c.bf16 %v317_v25, %v317_v25 }
  0xe6   :  { %350 = vst.msk [vmem:[%s737_s3 + $0x3c] sm:$0xf] %vm334_vm1, %v333_v26 }

// kernel: _lambda_.31
= control target key start
LH: loop header
LB: loop body
LE: loop exit
PB: predicated region body
PF: predicated region fallthrough
CT: control target
= control target key end

     0   :  { %vm315_vm0 = vcmask 261120   ;;  %vm519_vm1 = vcmask 125952   ;;  %s1086_s1 = inlined_call_operand.vmem [shape: bf16[288,16], index: 1, kind: input, shape index: {}]   ;;  %s1087_s0 = inlined_call_operand.vmem [shape: bf16[128,288], index: 0, kind: input, shape index: {}]   ;;  %s1088_s2 = inlined_call_operand.vmem [shape: f32[1,16], index: 2, kind: input, shape index: {}]   ;;  %s1089_s3 = inlined_call_operand.vmem [shape: bf16[128,16], index: 3, kind: output, shape index: {}]  }
   0x1   :  { %v747_v0 = vld [vmem:[%s1086_s1 + $0x38] sm:$0xff]  ;;  %v757_v1 = vld [vmem:[%s1086_s1 + $0x88] sm:$0xff]  ;;  %v746_v3 = vld [vmem:[%s1086_s1 + $0x30] sm:$0xff] }
   0x2   :  { %v755_v2 = vld [vmem:[%s1086_s1 + $0x78] sm:$0xff]  ;;  %340 = vmatpush.bf16.msra.mxu0 %v747_v0  ;;  %758 = vmatpush.bf16.msra.mxu3 %v747_v0  ;;  %v756_v4 = vld [vmem:[%s1086_s1 + $0x80] sm:$0xff]  ;;  %v754_v5 = vld [vmem:[%s1086_s1 + $0x70] sm:$0xff] }
   0x3   :  { %444 = vmatpush.bf16.msra.mxu2 %v757_v1  ;;  %389 = vmatpush.bf16.msra.mxu1 %v755_v2  ;;  %v550_v6 = vld [vmem:[%s1087_s0 + $0x8] sm:$0xf]  ;;  %v718_v7 = vld [vmem:[%s1087_s0 + $0x10] sm:$0xf0]  ;;  %v744_v11 = vld [vmem:[%s1086_s1 + $0x20] sm:$0xff] }
   0x4   :  { %v551_v8 = vor.u32 %v718_v7, %v550_v6  ;;  %v745_v9 = vld [vmem:[%s1086_s1 + $0x28] sm:$0xff]  ;;  %v752_v12 = vld [vmem:[%s1086_s1 + $0x60] sm:$0xff]  ;;  %v743_v13 = vld [vmem:[%s1086_s1 + $0x18] sm:$0xff] }
   0x5   :  { %v753_v10 = vld [vmem:[%s1086_s1 + $0x68] sm:$0xff]  ;;  %v751_v14 = vld [vmem:[%s1086_s1 + $0x58] sm:$0xff]  ;;  %v742_v15 = vld [vmem:[%s1086_s1 + $0x10] sm:$0xff] }
   0x6   :  { %341 = vmatpush.bf16.msra.mxu0 %v746_v3  ;;  %759 = vmatpush.bf16.msra.mxu3 %v746_v3  ;;  %v750_v16 = vld [vmem:[%s1086_s1 + $0x50] sm:$0xff]  ;;  %v562_v17 = vld [vmem:[%s1087_s0 + $0x20] sm:$0xf]  ;;  %v721_v18 = vld [vmem:[%s1087_s0 + $0x28] sm:$0xf0] }
   0x7   :  { %445 = vmatpush.bf16.msra.mxu2 %v756_v4  ;;  %390 = vmatpush.bf16.msra.mxu1 %v754_v5  ;;  %v563_v19 = vor.u32 %v721_v18, %v562_v17  ;;  %v741_v20 = vld [vmem:[%s1086_s1 + $0x8] sm:$0xff]  ;;  %v740_v22 = vld [vmem:[%s1086_s1] sm:$0xff]  ;;  %v614_v26 = vld [vmem:[%s1087_s0 + $0x90] sm:$0xf] }
   0x8   :  { %v749_v21 = vld [vmem:[%s1086_s1 + $0x48] sm:$0xff]  ;;  %v748_v23 = vld [vmem:[%s1086_s1 + $0x40] sm:$0xff]  ;;  %v735_v27 = vld [vmem:[%s1087_s0 + $0x98] sm:$0xf0] }
   0x9   :  { %v542_v24 = vld [vmem:[%s1087_s0] sm:$0xf]  ;;  %v717_v25 = vld [vmem:[%s1087_s0 + $0x8] sm:$0xf0]  ;;  %v716_v28 = vld [vmem:[%s1087_s0 + $0x4] sm:$0xf]  ;;  %v615_v31 = vor.u32 %v735_v27, %v614_v26 }
   0xa   :  { %708 = vmatmul.msk.bf16.vlgmr.msra.gmra.mxu2 %vm315_vm0, %v551_v8  ;;  %342 = vmatpush.bf16.msra.mxu0 %v745_v9  ;;  %v544_v29 = vld [vmem:[%s1087_s0 + $0xc] sm:$0xf0]  ;;  %v543_v30 = vor.u32 %v717_v25, %v542_v24  ;;  %v574_v33 = vld [vmem:[%s1087_s0 + $0x38] sm:$0xf]  ;;  %v724_v34 = vld [vmem:[%s1087_s0 + $0x40] sm:$0xf0] }
   0xb   :  { %760 = vmatpush.bf16.msra.mxu3 %v745_v9  ;;  %391 = vmatpush.bf16.msra.mxu1 %v753_v10  ;;  %v547_v32 = vor.u32 %v716_v28, %v544_v29  ;;  %v575_v35 = vor.u32 %v724_v34, %v574_v33  ;;  %v554_v36 = vld [vmem:[%s1087_s0 + $0x18] sm:$0xf]  ;;  %v720_v37 = vld [vmem:[%s1087_s0 + $0x20] sm:$0xf0]  ;;  %v626_v38 = vld [vmem:[%s1087_s0 + $0xa8] sm:$0xf] }
   0xc   :  { %v738_v39 = vld [vmem:[%s1087_s0 + $0xb0] sm:$0xf0]  ;;  %v719_v40 = vld [vmem:[%s1087_s0 + $0x1c] sm:$0xf]  ;;  %v556_v41 = vld [vmem:[%s1087_s0 + $0x24] sm:$0xf0]  ;;  %v555_v42 = vor.u32 %v720_v37, %v554_v36 }
   0xd   :  { %v627_v43 = vor.u32 %v738_v39, %v626_v38  ;;  %v559_v44 = vor.u32 %v719_v40, %v556_v41  ;;  %v586_v45 = vld [vmem:[%s1087_s0 + $0x50] sm:$0xf]  ;;  %v727_v46 = vld [vmem:[%s1087_s0 + $0x58] sm:$0xf0]  ;;  %v734_v50 = vld [vmem:[%s1087_s0 + $0x94] sm:$0xf] }
   0xe   :  { %343 = vmatpush.bf16.msra.mxu0 %v744_v11  ;;  %v587_v47 = vor.u32 %v727_v46, %v586_v45  ;;  %v566_v48 = vld [vmem:[%s1087_s0 + $0x30] sm:$0xf]  ;;  %v723_v49 = vld [vmem:[%s1087_s0 + $0x38] sm:$0xf0]  ;;  %v616_v51 = vld [vmem:[%s1087_s0 + $0x9c] sm:$0xf0] }
   0xf   :  { %761 = vmatpush.bf16.msra.mxu3 %v744_v11  ;;  %392 = vmatpush.bf16.msra.mxu1 %v752_v12  ;;  %v722_v52 = vld [vmem:[%s1087_s0 + $0x34] sm:$0xf]  ;;  %v568_v53 = vld [vmem:[%s1087_s0 + $0x3c] sm:$0xf0]  ;;  %v567_v54 = vor.u32 %v723_v49, %v566_v48  ;;  %v619_v55 = vor.u32 %v734_v50, %v616_v51  ;;  %v598_v57 = vld [vmem:[%s1087_s0 + $0x68] sm:$0xf] }
  0x10   :  { %v571_v56 = vor.u32 %v722_v52, %v568_v53  ;;  %v730_v58 = vld [vmem:[%s1087_s0 + $0x70] sm:$0xf0]  ;;  %v578_v60 = vld [vmem:[%s1087_s0 + $0x48] sm:$0xf]  ;;  %v737_v62 = vld [vmem:[%s1087_s0 + $0xac] sm:$0xf] }
  0x11   :  { %v599_v59 = vor.u32 %v730_v58, %v598_v57  ;;  %v726_v61 = vld [vmem:[%s1087_s0 + $0x50] sm:$0xf0]  ;;  %v628_v63 = vld [vmem:[%s1087_s0 + $0xb4] sm:$0xf0]  ;;  %v725_v0 = vld [vmem:[%s1087_s0 + $0x4c] sm:$0xf] }
  0x12   :  { %344 = vmatpush.bf16.msra.mxu0 %v743_v13  ;;  %v580_v1 = vld [vmem:[%s1087_s0 + $0x54] sm:$0xf0]  ;;  %v631_v3 = vor.u32 %v737_v62, %v628_v63  ;;  %v733_v6 = vld [vmem:[%s1087_s0 + $0x88] sm:$0xf0]  ;;  %v590_v8 = vld [vmem:[%s1087_s0 + $0x60] sm:$0xf] }
  0x13   :  { %762 = vmatpush.bf16.msra.mxu3 %v743_v13  ;;  %393 = vmatpush.bf16.msra.mxu1 %v751_v14  ;;  %v583_v4 = vor.u32 %v725_v0, %v580_v1  ;;  %v729_v9 = vld [vmem:[%s1087_s0 + $0x68] sm:$0xf0]  ;;  %v592_v11 = vld [vmem:[%s1087_s0 + $0x6c] sm:$0xf0]  ;;  %v602_v17 = vld [vmem:[%s1087_s0 + $0x78] sm:$0xf] }
  0x14   :  { %v732_v18 = vld [vmem:[%s1087_s0 + $0x80] sm:$0xf0]  ;;  %v739_v24 = vld [vmem:[%s1087_s0 + $0xb8] sm:$0xf0]  ;;  %v1004_v28 = vld [vmem:[%s1088_s2] ss:$0 sm:$0xff] }
  0x16   :  { %345 = vmatpush.bf16.msra.mxu0 %v742_v15 }
  0x17   :  { %763 = vmatpush.bf16.msra.mxu3 %v742_v15  ;;  %394 = vmatpush.bf16.msra.mxu1 %v750_v16  ;;  %v736_v15 = vld [vmem:[%s1087_s0 + $0xa0] sm:$0xf0] }
  0x1a   :  { %709 = vmatmul.msk.bf16.gmra.mxu2 %vm315_vm0, %v563_v19  ;;  %346 = vmatpush.bf16.msra.mxu0 %v741_v20  ;;  %v731_v19 = vld [vmem:[%s1087_s0 + $0x7c] sm:$0xf] }
  0x1b   :  { %764 = vmatpush.bf16.msra.mxu3 %v741_v20  ;;  %395 = vmatpush.bf16.msra.mxu1 %v749_v21  ;;  %v604_v20 = vld [vmem:[%s1087_s0 + $0x84] sm:$0xf0] }
  0x1e   :  { %347 = vmatpush.bf16.msra.mxu0 %v740_v22 }
  0x1f   :  { %765 = vmatpush.bf16.msra.mxu3 %v740_v22  ;;  %396 = vmatpush.bf16.msra.mxu1 %v748_v23  ;;  %v607_v22 = vor.u32 %v731_v19, %v604_v20 }
  0x21   :  { %348 = vmatmul.bf16.vlgmr.msra.gmra.mxu0 %v543_v30 }
  0x22   :  { %378 = vmatmul.bf16.vlgmr.msra.gmra.mxu3 %v615_v31  ;;  %397 = vmatmul.bf16.vlgmr.msra.gmra.mxu1 %v547_v32 }
  0x23   :  { %766 = vmatpush.bf16.msrb.mxu3 %v755_v2  ;;  %v579_v2 = vor.u32 %v726_v61, %v578_v60 }
  0x27   :  { %767 = vmatpush.bf16.msrb.mxu3 %v754_v5  ;;  %v610_v5 = vld [vmem:[%s1087_s0 + $0x80] sm:$0xf] }
  0x28   :  { %v611_v7 = vor.u32 %v733_v6, %v610_v5 }
  0x2a   :  { %710 = vmatmul.msk.bf16.gmra.mxu2 %vm315_vm0, %v575_v35 }
  0x2b   :  { %768 = vmatpush.bf16.msrb.mxu3 %v753_v10  ;;  %v728_v10 = vld [vmem:[%s1087_s0 + $0x64] sm:$0xf] }
  0x2c   :  { %v595_v13 = vor.u32 %v728_v10, %v592_v11 }
  0x2f   :  { %769 = vmatpush.bf16.msrb.mxu3 %v752_v12  ;;  %v591_v12 = vor.u32 %v729_v9, %v590_v8 }
  0x31   :  { %353 = vmatmul.bf16.gmra.mxu0 %v555_v42 }
  0x32   :  { %383 = vmatmul.bf16.gmra.mxu3 %v627_v43  ;;  %402 = vmatmul.bf16.gmra.mxu1 %v559_v44 }
  0x33   :  { %770 = vmatpush.bf16.msrb.mxu3 %v751_v14  ;;  %v622_v14 = vld [vmem:[%s1087_s0 + $0x98] sm:$0xf] }
  0x37   :  { %771 = vmatpush.bf16.msrb.mxu3 %v750_v16  ;;  %v623_v16 = vor.u32 %v736_v15, %v622_v14 }
  0x3a   :  { %711 = vmatmul.msk.bf16.gmra.mxu2 %vm315_vm0, %v587_v47 }
  0x3b   :  { %772 = vmatpush.bf16.msrb.mxu3 %v749_v21  ;;  %v603_v21 = vor.u32 %v732_v18, %v602_v17 }
  0x3f   :  { %773 = vmatpush.bf16.msrb.mxu3 %v748_v23  ;;  %v634_v23 = vld [vmem:[%s1087_s0 + $0xb0] sm:$0xf] }
  0x40   :  { %v635_v25 = vor.u32 %v739_v24, %v634_v23 }
  0x41   :  { %358 = vmatmul.bf16.gmra.mxu0 %v567_v54 }
  0x42   :  { %427 = vmatmul.bf16.vlgmr.msrb.gmra.mxu3 %v619_v55  ;;  %407 = vmatmul.bf16.gmra.mxu1 %v571_v56 }
  0x4a   :  { %712 = vmatmul.msk.bf16.gmra.mxu2 %vm315_vm0, %v599_v59 }
  0x51   :  { %363 = vmatmul.bf16.gmra.mxu0 %v579_v2 }
  0x52   :  { %432 = vmatmul.bf16.gmra.mxu3 %v631_v3  ;;  %412 = vmatmul.bf16.gmra.mxu1 %v583_v4 }
  0x5a   :  { %713 = vmatmul.msk.bf16.gmra.mxu2 %vm315_vm0, %v611_v7 }
  0x61   :  { %368 = vmatmul.bf16.gmra.mxu0 %v591_v12 }
  0x62   :  { %417 = vmatmul.bf16.gmra.mxu1 %v595_v13 }
  0x6a   :  { %714 = vmatmul.msk.bf16.gmra.mxu2 %vm315_vm0, %v623_v16 }
  0x71   :  { %373 = vmatmul.bf16.gmra.mxu0 %v603_v21 }
  0x72   :  { %422 = vmatmul.bf16.gmra.mxu1 %v607_v22 }
  0x7a   :  { %715 = vmatmul.msk.bf16.gmra.mxu2 %vm315_vm0, %v635_v25 }
  0x8d   :  { %v447_v26 = vpop.f32.mrf.mxu2 }
  0x95   :  { %v449_v27 = vpop.f32.mrf.mxu2 }
  0x9d   :  { %v452_v29 = vpop.f32.mrf.mxu2 }
  0x9e   :  { %v349_v30 = vpop.f32.mrf.mxu0 }
  0x9f   :  { %v350_v31 = vadd.f32 %v1004_v28, %v349_v30  ;;  %v398_v32 = vpop.f32.mrf.mxu1 }
  0xa1   :  { %v399_v33 = vadd.f32 %v398_v32, %v350_v31 }
  0xa3   :  { %v448_v34 = vadd.f32 %v447_v26, %v399_v33 }
  0xa5   :  { %v487_v35 = vmax.f32 %v448_v34, 0.0  ;;  %v454_v36 = vpop.f32.mrf.mxu2  ;;  %v379_v58 = vpop.f32.mrf.mxu3 }
  0xa6   :  { %v351_v37 = vpop.f32.mrf.mxu0 }
  0xa7   :  { %v503_v38 = vpack.c.bf16 %v487_v35, %v487_v35  ;;  %v352_v39 = vadd.f32 %v1004_v28, %v351_v37  ;;  %v400_v40 = vpop.f32.mrf.mxu1 }
  0xa9   :  { %520 = vst.msk [vmem:[%s1089_s3] sm:$0xf] %vm519_vm1, %v503_v38  ;;  %v401_v41 = vadd.f32 %v400_v40, %v352_v39 }
  0xab   :  { %v450_v42 = vadd.f32 %v449_v27, %v401_v41 }
  0xad   :  { %v488_v43 = vmax.f32 %v450_v42, 0.0  ;;  %v457_v44 = vpop.f32.mrf.mxu2  ;;  %v381_v4 = vpop.f32.mrf.mxu3 }
  0xae   :  { %v354_v45 = vpop.f32.mrf.mxu0 }
  0xaf   :  { %v504_v46 = vpack.c.bf16 %v488_v43, %v488_v43  ;;  %v355_v47 = vadd.f32 %v1004_v28, %v354_v45  ;;  %v403_v48 = vpop.f32.mrf.mxu1 }
  0xb1   :  { %521 = vst.msk [vmem:[%s1089_s3 + $0x4] sm:$0xf] %vm519_vm1, %v504_v46  ;;  %v404_v49 = vadd.f32 %v403_v48, %v355_v47  ;;  %v380_v47 = vadd.f32 %v1004_v28, %v379_v58 }
  0xb3   :  { %v453_v50 = vadd.f32 %v452_v29, %v404_v49 }
  0xb5   :  { %v489_v51 = vmax.f32 %v453_v50, 0.0  ;;  %v459_v52 = vpop.f32.mrf.mxu2  ;;  %v384_v16 = vpop.f32.mrf.mxu3 }
  0xb6   :  { %v356_v53 = vpop.f32.mrf.mxu0 }
  0xb7   :  { %v505_v54 = vpack.c.bf16 %v489_v51, %v489_v51  ;;  %v357_v55 = vadd.f32 %v1004_v28, %v356_v53  ;;  %v405_v56 = vpop.f32.mrf.mxu1 }
  0xb9   :  { %522 = vst.msk [vmem:[%s1089_s3 + $0x8] sm:$0xf] %vm519_vm1, %v505_v54  ;;  %v406_v57 = vadd.f32 %v405_v56, %v357_v55 }
  0xbb   :  { %v455_v59 = vadd.f32 %v454_v36, %v406_v57 }
  0xbd   :  { %v490_v60 = vmax.f32 %v455_v59, 0.0  ;;  %v462_v61 = vpop.f32.mrf.mxu2  ;;  %v386_v29 = vpop.f32.mrf.mxu3 }
  0xbe   :  { %v359_v62 = vpop.f32.mrf.mxu0 }
  0xbf   :  { %v506_v63 = vpack.c.bf16 %v490_v60, %v490_v60  ;;  %v360_v0 = vadd.f32 %v1004_v28, %v359_v62  ;;  %v408_v1 = vpop.f32.mrf.mxu1  ;;  %v382_v60 = vadd.f32 %v1004_v28, %v381_v4 }
  0xc1   :  { %523 = vst.msk [vmem:[%s1089_s3 + $0xc] sm:$0xf] %vm519_vm1, %v506_v63  ;;  %v409_v2 = vadd.f32 %v408_v1, %v360_v0 }
  0xc3   :  { %v458_v3 = vadd.f32 %v457_v44, %v409_v2 }
  0xc5   :  { %v491_v5 = vmax.f32 %v458_v3, 0.0  ;;  %v464_v6 = vpop.f32.mrf.mxu2  ;;  %v428_v39 = vpop.f32.mrf.mxu3 }
  0xc6   :  { %v361_v7 = vpop.f32.mrf.mxu0  ;;  %v429_v50 = vadd.f32 %v428_v39, %v380_v47 }
  0xc7   :  { %v507_v8 = vpack.c.bf16 %v491_v5, %v491_v5  ;;  %v362_v9 = vadd.f32 %v1004_v28, %v361_v7  ;;  %v410_v10 = vpop.f32.mrf.mxu1 }
  0xc9   :  { %524 = vst.msk [vmem:[%s1089_s3 + $0x10] sm:$0xf] %vm519_vm1, %v507_v8  ;;  %v411_v11 = vadd.f32 %v410_v10, %v362_v9  ;;  %v385_v9 = vadd.f32 %v1004_v28, %v384_v16  ;;  %v387_v16 = vadd.f32 %v1004_v28, %v386_v29 }
  0xcb   :  { %v460_v12 = vadd.f32 %v459_v52, %v411_v11 }
  0xcd   :  { %v492_v13 = vmax.f32 %v460_v12, 0.0  ;;  %v467_v14 = vpop.f32.mrf.mxu2  ;;  %v430_v51 = vpop.f32.mrf.mxu3 }
  0xce   :  { %v364_v15 = vpop.f32.mrf.mxu0  ;;  %v431_v0 = vadd.f32 %v430_v51, %v382_v60 }
  0xcf   :  { %v508_v17 = vpack.c.bf16 %v492_v13, %v492_v13  ;;  %v365_v18 = vadd.f32 %v1004_v28, %v364_v15  ;;  %v413_v19 = vpop.f32.mrf.mxu1 }
  0xd1   :  { %525 = vst.msk [vmem:[%s1089_s3 + $0x14] sm:$0xf] %vm519_vm1, %v508_v17  ;;  %v414_v20 = vadd.f32 %v413_v19, %v365_v18 }
  0xd3   :  { %v463_v21 = vadd.f32 %v462_v61, %v414_v20 }
  0xd5   :  { %v493_v22 = vmax.f32 %v463_v21, 0.0  ;;  %v469_v23 = vpop.f32.mrf.mxu2  ;;  %v433_v4 = vpop.f32.mrf.mxu3 }
  0xd6   :  { %v366_v24 = vpop.f32.mrf.mxu0 }
  0xd7   :  { %v509_v25 = vpack.c.bf16 %v493_v22, %v493_v22  ;;  %v367_v26 = vadd.f32 %v1004_v28, %v366_v24  ;;  %v415_v27 = vpop.f32.mrf.mxu1 }
  0xd9   :  { %526 = vst.msk [vmem:[%s1089_s3 + $0x18] sm:$0xf] %vm519_vm1, %v509_v25  ;;  %v416_v30 = vadd.f32 %v415_v27, %v367_v26 }
  0xdb   :  { %v465_v31 = vadd.f32 %v464_v6, %v416_v30 }
  0xdd   :  { %v494_v32 = vmax.f32 %v465_v31, 0.0  ;;  %v472_v33 = vpop.f32.mrf.mxu2  ;;  %v435_v21 = vpop.f32.mrf.mxu3 }
  0xde   :  { %v369_v34 = vpop.f32.mrf.mxu0 }
  0xdf   :  { %v510_v35 = vpack.c.bf16 %v494_v32, %v494_v32  ;;  %v370_v36 = vadd.f32 %v1004_v28, %v369_v34  ;;  %v418_v37 = vpop.f32.mrf.mxu1 }
  0xe1   :  { %527 = vst.msk [vmem:[%s1089_s3 + $0x1c] sm:$0xf] %vm519_vm1, %v510_v35  ;;  %v419_v38 = vadd.f32 %v418_v37, %v370_v36 }
  0xe3   :  { %v468_v40 = vadd.f32 %v467_v14, %v419_v38  ;;  %v434_v14 = vadd.f32 %v433_v4, %v385_v9 }
  0xe5   :  { %v495_v41 = vmax.f32 %v468_v40, 0.0  ;;  %v474_v42 = vpop.f32.mrf.mxu2 }
  0xe6   :  { %v371_v43 = vpop.f32.mrf.mxu0 }
  0xe7   :  { %v511_v44 = vpack.c.bf16 %v495_v41, %v495_v41  ;;  %v372_v45 = vadd.f32 %v1004_v28, %v371_v43  ;;  %v420_v46 = vpop.f32.mrf.mxu1 }
  0xe9   :  { %528 = vst.msk [vmem:[%s1089_s3 + $0x20] sm:$0xf] %vm519_vm1, %v511_v44  ;;  %v421_v48 = vadd.f32 %v420_v46, %v372_v45 }
  0xeb   :  { %v470_v49 = vadd.f32 %v469_v23, %v421_v48  ;;  %v436_v23 = vadd.f32 %v435_v21, %v387_v16 }
  0xed   :  { %v496_v52 = vmax.f32 %v470_v49, 0.0  ;;  %v477_v53 = vpop.f32.mrf.mxu2 }
  0xee   :  { %v478_v54 = vadd.f32 %v477_v53, %v429_v50  ;;  %v374_v55 = vpop.f32.mrf.mxu0 }
  0xef   :  { %v512_v56 = vpack.c.bf16 %v496_v52, %v496_v52  ;;  %v375_v57 = vadd.f32 %v1004_v28, %v374_v55  ;;  %v423_v59 = vpop.f32.mrf.mxu1 }
  0xf0   :  { %v499_v58 = vmax.f32 %v478_v54, 0.0 }
  0xf1   :  { %529 = vst.msk [vmem:[%s1089_s3 + $0x24] sm:$0xf] %vm519_vm1, %v512_v56  ;;  %v424_v61 = vadd.f32 %v423_v59, %v375_v57 }
  0xf2   :  { %v515_v62 = vpack.c.bf16 %v499_v58, %v499_v58 }
  0xf3   :  { %v473_v63 = vadd.f32 %v472_v33, %v424_v61 }
  0xf4   :  { %532 = vst.msk [vmem:[%s1089_s3 + $0x30] sm:$0xf] %vm519_vm1, %v515_v62 }
  0xf5   :  { %v497_v1 = vmax.f32 %v473_v63, 0.0  ;;  %v479_v2 = vpop.f32.mrf.mxu2 }
  0xf6   :  { %v480_v3 = vadd.f32 %v479_v2, %v431_v0  ;;  %v376_v5 = vpop.f32.mrf.mxu0 }
  0xf7   :  { %v513_v6 = vpack.c.bf16 %v497_v1, %v497_v1  ;;  %v377_v7 = vadd.f32 %v1004_v28, %v376_v5  ;;  %v425_v8 = vpop.f32.mrf.mxu1 }
  0xf8   :  { %v500_v10 = vmax.f32 %v480_v3, 0.0 }
  0xf9   :  { %530 = vst.msk [vmem:[%s1089_s3 + $0x28] sm:$0xf] %vm519_vm1, %v513_v6  ;;  %v426_v11 = vadd.f32 %v425_v8, %v377_v7 }
  0xfa   :  { %v516_v12 = vpack.c.bf16 %v500_v10, %v500_v10 }
  0xfb   :  { %v475_v13 = vadd.f32 %v474_v42, %v426_v11 }
  0xfc   :  { %533 = vst.msk [vmem:[%s1089_s3 + $0x34] sm:$0xf] %vm519_vm1, %v516_v12 }
  0xfd   :  { %v498_v15 = vmax.f32 %v475_v13, 0.0  ;;  %v482_v17 = vpop.f32.mrf.mxu2 }
  0xfe   :  { %v483_v18 = vadd.f32 %v482_v17, %v434_v14 }
  0xff   :  { %v514_v19 = vpack.c.bf16 %v498_v15, %v498_v15 }
 0x100   :  { %v501_v20 = vmax.f32 %v483_v18, 0.0 }
 0x101   :  { %531 = vst.msk [vmem:[%s1089_s3 + $0x2c] sm:$0xf] %vm519_vm1, %v514_v19 }
 0x102   :  { %v517_v22 = vpack.c.bf16 %v501_v20, %v501_v20 }
 0x104   :  { %534 = vst.msk [vmem:[%s1089_s3 + $0x38] sm:$0xf] %vm519_vm1, %v517_v22 }
 0x105   :  { %v484_v24 = vpop.f32.mrf.mxu2 }
 0x106   :  { %v485_v25 = vadd.f32 %v484_v24, %v436_v23 }
 0x108   :  { %v502_v26 = vmax.f32 %v485_v25, 0.0 }
 0x10a   :  { %v518_v27 = vpack.c.bf16 %v502_v26, %v502_v26 }
 0x10c   :  { %535 = vst.msk [vmem:[%s1089_s3 + $0x3c] sm:$0xf] %vm519_vm1, %v518_v27 }

// kernel: _lambda_.33
= control target key start
LH: loop header
LB: loop body
LE: loop exit
PB: predicated region body
PF: predicated region fallthrough
CT: control target
= control target key end

     0   :  { %s893_s12 = smov 0   ;;  %s895_s13 = smov 0   ;;  %s1054_s0 = inlined_call_operand.vmem [shape: bf16[512,144], index: 0, kind: input, shape index: {}]   ;;  %s1055_s1 = inlined_call_operand.vmem [shape: bf16[144,8], index: 1, kind: input, shape index: {}]   ;;  %s1056_s2 = inlined_call_operand.vmem [shape: f32[1,8], index: 2, kind: input, shape index: {}]   ;;  %s1057_s3 = inlined_call_operand.vmem [shape: bf16[512,8], index: 3, kind: output, shape index: {}]  }
   0x1   :  { %s897_s14 = smov 0  }
   0x2 LB: > { %s25_s15 = sadd.s32 1, %s867_s13  ;;  %p673_p0 = scmp.ge.s32.totalorder %s871_s14, 1  ;;  %s871_s14 = sphi %s897_s14, %s13_s14   ;;  %s867_s13 = sphi %s895_s13, %s1059_s13   ;;  %s863_s12 = sphi %s893_s12, %s1058_s12  }
   0x3   : > { %p27_p1 = scmp.ge.s32.totalorder %s25_s15, 4  ;;  %p170_p2 = scmp.lt.s32.totalorder %s871_s14, 5 }
   0x5   : > { %s1061_s15 = smov (%p27_p1, %s25_s15), 0  ;;  %p171_p3 = pnand %p673_p0, %p170_p2 }
   0x6   : > { %s674_s20 = sshll.u32 (!%p171_p3), %s863_s12, 4 }
   0x7   : > { %174 = sbr.rel (%p171_p3) target bundleno = 241 (0xf1), region = 32  ;;  %p206_p4 = scmp.lt.s32.totalorder (!%p171_p3), %s674_s20, 63 }
   0xc   : > { %v813_v0 = vld [vmem:[%s1055_s1 + $0x38] sm:$0xff]  ;;  %v814_v1 = vld [vmem:[%s1055_s1 + $0x40] sm:$0xff]  ;;  %v812_v2 = vld [vmem:[%s1055_s1 + $0x30] sm:$0xff]  ;;  %s1063_s20 = smov (!%p206_p4, %s674_s20), 63  ;;  %vm393_vm0 = vcmask 130048   ;;  %vm548_vm1 = vcmask 60416  }
   0xd   : > { %418 = vmatpush.bf16.msra.mxu0 %v813_v0  ;;  %815 = vmatpush.bf16.msra.mxu2 %v813_v0  ;;  %s789_s23 = sshll.u32 %s1063_s20, 3  ;;  %v811_v3 = vld [vmem:[%s1055_s1 + $0x28] sm:$0xff]  ;;  %v810_v7 = vld [vmem:[%s1055_s1 + $0x20] sm:$0xff]  ;;  %v809_v11 = vld [vmem:[%s1055_s1 + $0x18] sm:$0xff]  ;;  %s678_s17 = sshll.u32 %s1063_s20, 2 }
   0xe   : > { %474 = vmatpush.bf16.msra.mxu1 %v814_v1  ;;  %823 = vmatpush.bf16.msra.mxu3 %v814_v1  ;;  %s926_s26 = scalar_lea.vmem %s1054_s0, %s789_s23  ;;  %v808_v12 = vld [vmem:[%s1055_s1 + $0x10] sm:$0xff]  ;;  %v807_v16 = vld [vmem:[%s1055_s1 + $0x8] sm:$0xff]  ;;  %v806_v19 = vld [vmem:[%s1055_s1] sm:$0xff]  ;;  %s996_s21 = scalar_lea.vmem %s1057_s3, %s678_s17 }
   0xf   : > { %v790_v4 = vld [vmem:[%s926_s26 + $0x4] sm:$0xf]  ;;  %v683_v5 = vld [vmem:[%s926_s26 + $0x8] sm:$0xf0]  ;;  %v800_v8 = vld [vmem:[%s926_s26 + $0x54] sm:$0xf] }
  0x10   : > { %v686_v6 = vor.u32 %v790_v4, %v683_v5  ;;  %v723_v9 = vld [vmem:[%s926_s26 + $0x58] sm:$0xf0]  ;;  %v792_v13 = vld [vmem:[%s926_s26 + $0x14] sm:$0xf]  ;;  %v802_v17 = vld [vmem:[%s926_s26 + $0x64] sm:$0xf] }
  0x11   : > { %419 = vmatpush.bf16.msra.mxu0 %v812_v2  ;;  %816 = vmatpush.bf16.msra.mxu2 %v812_v2  ;;  %v726_v10 = vor.u32 %v800_v8, %v723_v9  ;;  %v691_v14 = vld [vmem:[%s926_s26 + $0x18] sm:$0xf0]  ;;  %v731_v18 = vld [vmem:[%s926_s26 + $0x68] sm:$0xf0]  ;;  %v681_v20 = vld [vmem:[%s926_s26] sm:$0xf] }
  0x12   : > { %779 = vmatmul.msk.bf16.vlgmr.msra.gmra.mxu1 %vm393_vm0, %v686_v6  ;;  %v694_v15 = vor.u32 %v792_v13, %v691_v14  ;;  %v791_v21 = vld [vmem:[%s926_s26 + $0x4] sm:$0xf0]  ;;  %v734_v22 = vor.u32 %v802_v17, %v731_v18  ;;  %v713_v23 = vld [vmem:[%s926_s26 + $0x40] sm:$0xf]  ;;  %v794_v27 = vld [vmem:[%s926_s26 + $0x24] sm:$0xf] }
  0x13   : > { %784 = vmatmul.msk.bf16.vlgmr.msra.gmra.mxu3 %vm393_vm0, %v726_v10  ;;  %v799_v24 = vld [vmem:[%s926_s26 + $0x44] sm:$0xf0]  ;;  %v682_v25 = vor.u32 %v791_v21, %v681_v20  ;;  %v699_v28 = vld [vmem:[%s926_s26 + $0x28] sm:$0xf0]  ;;  %v804_v30 = vld [vmem:[%s926_s26 + $0x74] sm:$0xf] }
  0x14   : > { %v714_v26 = vor.u32 %v799_v24, %v713_v23  ;;  %v702_v29 = vor.u32 %v794_v27, %v699_v28  ;;  %v739_v31 = vld [vmem:[%s926_s26 + $0x78] sm:$0xf0]  ;;  %v689_v32 = vld [vmem:[%s926_s26 + $0x10] sm:$0xf]  ;;  %v793_v33 = vld [vmem:[%s926_s26 + $0x14] sm:$0xf0] }
  0x15   : > { %420 = vmatpush.bf16.msra.mxu0 %v811_v3  ;;  %817 = vmatpush.bf16.msra.mxu2 %v811_v3  ;;  %v742_v34 = vor.u32 %v804_v30, %v739_v31  ;;  %v721_v35 = vld [vmem:[%s926_s26 + $0x50] sm:$0xf]  ;;  %v801_v36 = vld [vmem:[%s926_s26 + $0x54] sm:$0xf0]  ;;  %v690_v37 = vor.u32 %v793_v33, %v689_v32  ;;  %v796_v39 = vld [vmem:[%s926_s26 + $0x34] sm:$0xf] }
  0x16   : > { %v722_v38 = vor.u32 %v801_v36, %v721_v35  ;;  %v707_v40 = vld [vmem:[%s926_s26 + $0x38] sm:$0xf0]  ;;  %v697_v42 = vld [vmem:[%s926_s26 + $0x20] sm:$0xf]  ;;  %v795_v43 = vld [vmem:[%s926_s26 + $0x24] sm:$0xf0] }
  0x17   : > { %v710_v41 = vor.u32 %v796_v39, %v707_v40  ;;  %v729_v44 = vld [vmem:[%s926_s26 + $0x60] sm:$0xf]  ;;  %v803_v45 = vld [vmem:[%s926_s26 + $0x64] sm:$0xf0]  ;;  %v698_v46 = vor.u32 %v795_v43, %v697_v42  ;;  %v798_v48 = vld [vmem:[%s926_s26 + $0x44] sm:$0xf] }
  0x18   : > { %v730_v47 = vor.u32 %v803_v45, %v729_v44  ;;  %v715_v49 = vld [vmem:[%s926_s26 + $0x48] sm:$0xf0]  ;;  %v705_v51 = vld [vmem:[%s926_s26 + $0x30] sm:$0xf]  ;;  %v797_v52 = vld [vmem:[%s926_s26 + $0x34] sm:$0xf0] }
  0x19   : > { %421 = vmatpush.bf16.msra.mxu0 %v810_v7  ;;  %818 = vmatpush.bf16.msra.mxu2 %v810_v7  ;;  %v718_v50 = vor.u32 %v798_v48, %v715_v49  ;;  %v737_v53 = vld [vmem:[%s926_s26 + $0x70] sm:$0xf]  ;;  %v805_v54 = vld [vmem:[%s926_s26 + $0x74] sm:$0xf0]  ;;  %v706_v55 = vor.u32 %v797_v52, %v705_v51  ;;  %v989_v60 = vld [vmem:[%s1056_s2] ss:$0 sm:$0xff] }
  0x1a   : > { %v738_v56 = vor.u32 %v805_v54, %v737_v53 }
  0x1d   : > { %422 = vmatpush.bf16.msra.mxu0 %v809_v11  ;;  %819 = vmatpush.bf16.msra.mxu2 %v809_v11 }
  0x21   : > { %423 = vmatpush.bf16.msra.mxu0 %v808_v12  ;;  %820 = vmatpush.bf16.msra.mxu2 %v808_v12 }
  0x22   : > { %780 = vmatmul.msk.bf16.gmra.mxu1 %vm393_vm0, %v694_v15 }
  0x23   : > { %785 = vmatmul.msk.bf16.gmra.mxu3 %vm393_vm0, %v734_v22 }
  0x25   : > { %424 = vmatpush.bf16.msra.mxu0 %v807_v16  ;;  %821 = vmatpush.bf16.msra.mxu2 %v807_v16 }
  0x29   : > { %425 = vmatpush.bf16.msra.mxu0 %v806_v19  ;;  %822 = vmatpush.bf16.msra.mxu2 %v806_v19 }
  0x2c   : > { %426 = vmatmul.bf16.vlgmr.msra.gmra.mxu0 %v682_v25  ;;  %446 = vmatmul.bf16.vlgmr.msra.gmra.mxu2 %v714_v26 }
  0x32   : > { %781 = vmatmul.msk.bf16.gmra.mxu1 %vm393_vm0, %v702_v29 }
  0x33   : > { %786 = vmatmul.msk.bf16.gmra.mxu3 %vm393_vm0, %v742_v34 }
  0x3c   : > { %431 = vmatmul.bf16.gmra.mxu0 %v690_v37  ;;  %451 = vmatmul.bf16.gmra.mxu2 %v722_v38 }
  0x42   : > { %782 = vmatmul.msk.bf16.gmra.mxu1 %vm393_vm0, %v710_v41 }
  0x4c   : > { %436 = vmatmul.bf16.gmra.mxu0 %v698_v46  ;;  %456 = vmatmul.bf16.gmra.mxu2 %v730_v47 }
  0x52   : > { %783 = vmatmul.msk.bf16.gmra.mxu1 %vm393_vm0, %v718_v50 }
  0x5c   : > { %441 = vmatmul.bf16.gmra.mxu0 %v706_v55  ;;  %461 = vmatmul.bf16.gmra.mxu2 %v738_v56 }
  0x8f   : > { %v476_v57 = vpop.f32.mrf.mxu1 }
  0x96   : > { %v501_v11 = vpop.f32.mrf.mxu3 }
  0x97   : > { %v478_v58 = vpop.f32.mrf.mxu1 }
  0x9e   : > { %v503_v23 = vpop.f32.mrf.mxu3 }
  0x9f   : > { %v481_v59 = vpop.f32.mrf.mxu1 }
  0xa6   : > { %v506_v37 = vpop.f32.mrf.mxu3 }
  0xa7   : > { %v483_v63 = vpop.f32.mrf.mxu1 }
  0xa9   : > { %v427_v61 = vpop.f32.mrf.mxu0 }
  0xaa   : > { %v428_v62 = vadd.f32 %v989_v60, %v427_v61 }
  0xac   : > { %v477_v0 = vadd.f32 %v476_v57, %v428_v62 }
  0xae   : > { %v516_v1 = vmax.f32 %v477_v0, 0.0  ;;  %v508_v54 = vpop.f32.mrf.mxu3 }
  0xaf   : > { %v447_v3 = vpop.f32.mrf.mxu2  ;;  %v486_v6 = vpop.f32.mrf.mxu1 }
  0xb0   : > { %v532_v2 = vpack.c.bf16 %v516_v1, %v516_v1  ;;  %v448_v43 = vadd.f32 %v989_v60, %v447_v3 }
  0xb1   : > { %v429_v4 = vpop.f32.mrf.mxu0 }
  0xb2   : > { %549 = vst.msk [vmem:[%s996_s21] sm:$0xf] %vm548_vm1, %v532_v2  ;;  %v430_v5 = vadd.f32 %v989_v60, %v429_v4 }
  0xb4   : > { %v479_v7 = vadd.f32 %v478_v58, %v430_v5 }
  0xb6   : > { %v517_v8 = vmax.f32 %v479_v7, 0.0 }
  0xb7   : > { %v449_v10 = vpop.f32.mrf.mxu2  ;;  %v488_v14 = vpop.f32.mrf.mxu1 }
  0xb8   : > { %v533_v9 = vpack.c.bf16 %v517_v8, %v517_v8 }
  0xb9   : > { %v432_v12 = vpop.f32.mrf.mxu0 }
  0xba   : > { %550 = vst.msk [vmem:[%s996_s21 + $0x4] sm:$0xf] %vm548_vm1, %v533_v9  ;;  %v433_v13 = vadd.f32 %v989_v60, %v432_v12 }
  0xbc   : > { %v482_v15 = vadd.f32 %v481_v59, %v433_v13  ;;  %v450_v59 = vadd.f32 %v989_v60, %v449_v10  ;;  %v511_v10 = vpop.f32.mrf.mxu3 }
  0xbe   : > { %v518_v16 = vmax.f32 %v482_v15, 0.0 }
  0xbf   : > { %v452_v18 = vpop.f32.mrf.mxu2  ;;  %v491_v22 = vpop.f32.mrf.mxu1 }
  0xc0   : > { %v534_v17 = vpack.c.bf16 %v518_v16, %v518_v16  ;;  %v453_v19 = vadd.f32 %v989_v60, %v452_v18 }
  0xc1   : > { %v434_v20 = vpop.f32.mrf.mxu0 }
  0xc2   : > { %551 = vst.msk [vmem:[%s996_s21 + $0x8] sm:$0xf] %vm548_vm1, %v534_v17  ;;  %v435_v21 = vadd.f32 %v989_v60, %v434_v20  ;;  %v502_v24 = vadd.f32 %v501_v11, %v453_v19 }
  0xc4   : > { %v484_v25 = vadd.f32 %v483_v63, %v435_v21  ;;  %v526_v26 = vmax.f32 %v502_v24, 0.0 }
  0xc6   : > { %v519_v27 = vmax.f32 %v484_v25, 0.0  ;;  %v542_v28 = vpack.c.bf16 %v526_v26, %v526_v26 }
  0xc7   : > { %v454_v30 = vpop.f32.mrf.mxu2  ;;  %v493_v34 = vpop.f32.mrf.mxu1 }
  0xc8   : > { %v535_v29 = vpack.c.bf16 %v519_v27, %v519_v27  ;;  %559 = vst.msk [vmem:[%s996_s21 + $0x28] sm:$0xf] %vm548_vm1, %v542_v28  ;;  %v455_v31 = vadd.f32 %v989_v60, %v454_v30 }
  0xc9   : > { %v437_v32 = vpop.f32.mrf.mxu0 }
  0xca   : > { %552 = vst.msk [vmem:[%s996_s21 + $0xc] sm:$0xf] %vm548_vm1, %v535_v29  ;;  %v438_v33 = vadd.f32 %v989_v60, %v437_v32  ;;  %v504_v35 = vadd.f32 %v503_v23, %v455_v31  ;;  %v513_v23 = vpop.f32.mrf.mxu3 }
  0xcc   : > { %v487_v36 = vadd.f32 %v486_v6, %v438_v33  ;;  %v527_v38 = vmax.f32 %v504_v35, 0.0 }
  0xce   : > { %v520_v39 = vmax.f32 %v487_v36, 0.0  ;;  %v543_v40 = vpack.c.bf16 %v527_v38, %v527_v38 }
  0xcf   : > { %v457_v42 = vpop.f32.mrf.mxu2  ;;  %v496_v47 = vpop.f32.mrf.mxu1 }
  0xd0   : > { %v536_v41 = vpack.c.bf16 %v520_v39, %v520_v39  ;;  %560 = vst.msk [vmem:[%s996_s21 + $0x2c] sm:$0xf] %vm548_vm1, %v543_v40  ;;  %v458_v44 = vadd.f32 %v989_v60, %v457_v42  ;;  %v497_v49 = vadd.f32 %v496_v47, %v448_v43 }
  0xd1   : > { %v439_v45 = vpop.f32.mrf.mxu0 }
  0xd2   : > { %553 = vst.msk [vmem:[%s996_s21 + $0x10] sm:$0xf] %vm548_vm1, %v536_v41  ;;  %v440_v46 = vadd.f32 %v989_v60, %v439_v45  ;;  %v507_v48 = vadd.f32 %v506_v37, %v458_v44  ;;  %v524_v52 = vmax.f32 %v497_v49, 0.0 }
  0xd4   : > { %v489_v50 = vadd.f32 %v488_v14, %v440_v46  ;;  %v528_v51 = vmax.f32 %v507_v48, 0.0  ;;  %v540_v56 = vpack.c.bf16 %v524_v52, %v524_v52 }
  0xd6   : > { %v521_v53 = vmax.f32 %v489_v50, 0.0  ;;  %v544_v55 = vpack.c.bf16 %v528_v51, %v528_v51  ;;  %557 = vst.msk [vmem:[%s996_s21 + $0x20] sm:$0xf] %vm548_vm1, %v540_v56 }
  0xd7   : > { %v459_v58 = vpop.f32.mrf.mxu2  ;;  %v498_v0 = vpop.f32.mrf.mxu1 }
  0xd8   : > { %v537_v57 = vpack.c.bf16 %v521_v53, %v521_v53  ;;  %561 = vst.msk [vmem:[%s996_s21 + $0x30] sm:$0xf] %vm548_vm1, %v544_v55  ;;  %v460_v61 = vadd.f32 %v989_v60, %v459_v58  ;;  %v499_v2 = vadd.f32 %v498_v0, %v450_v59 }
  0xd9   : > { %v442_v62 = vpop.f32.mrf.mxu0 }
  0xda   : > { %554 = vst.msk [vmem:[%s996_s21 + $0x14] sm:$0xf] %vm548_vm1, %v537_v57  ;;  %v443_v63 = vadd.f32 %v989_v60, %v442_v62  ;;  %v509_v1 = vadd.f32 %v508_v54, %v460_v61  ;;  %v525_v5 = vmax.f32 %v499_v2, 0.0 }
  0xdc   : > { %v492_v3 = vadd.f32 %v491_v22, %v443_v63  ;;  %v529_v4 = vmax.f32 %v509_v1, 0.0  ;;  %v541_v8 = vpack.c.bf16 %v525_v5, %v525_v5 }
  0xde   : > { %v522_v6 = vmax.f32 %v492_v3, 0.0  ;;  %v545_v7 = vpack.c.bf16 %v529_v4, %v529_v4  ;;  %558 = vst.msk [vmem:[%s996_s21 + $0x24] sm:$0xf] %vm548_vm1, %v541_v8 }
  0xdf   : > { %v462_v11 = vpop.f32.mrf.mxu2 }
  0xe0   : > { %v538_v9 = vpack.c.bf16 %v522_v6, %v522_v6  ;;  %562 = vst.msk [vmem:[%s996_s21 + $0x34] sm:$0xf] %vm548_vm1, %v545_v7  ;;  %v463_v12 = vadd.f32 %v989_v60, %v462_v11 }
  0xe1   : > { %v444_v13 = vpop.f32.mrf.mxu0 }
  0xe2   : > { %555 = vst.msk [vmem:[%s996_s21 + $0x18] sm:$0xf] %vm548_vm1, %v538_v9  ;;  %v445_v14 = vadd.f32 %v989_v60, %v444_v13  ;;  %v512_v15 = vadd.f32 %v511_v10, %v463_v12 }
  0xe4   : > { %v494_v16 = vadd.f32 %v493_v34, %v445_v14  ;;  %v530_v17 = vmax.f32 %v512_v15, 0.0 }
  0xe6   : > { %v523_v18 = vmax.f32 %v494_v16, 0.0  ;;  %v546_v19 = vpack.c.bf16 %v530_v17, %v530_v17 }
  0xe7   : > { %v464_v21 = vpop.f32.mrf.mxu2 }
  0xe8   : > { %v539_v20 = vpack.c.bf16 %v523_v18, %v523_v18  ;;  %563 = vst.msk [vmem:[%s996_s21 + $0x38] sm:$0xf] %vm548_vm1, %v546_v19  ;;  %v465_v22 = vadd.f32 %v989_v60, %v464_v21 }
  0xea   : > { %556 = vst.msk [vmem:[%s996_s21 + $0x1c] sm:$0xf] %vm548_vm1, %v539_v20  ;;  %v514_v24 = vadd.f32 %v513_v23, %v465_v22 }
  0xec   : > { %v531_v25 = vmax.f32 %v514_v24, 0.0 }
  0xee   : > { %v547_v26 = vpack.c.bf16 %v531_v25, %v531_v25 }
  0xf0   : > { %564 = vst.msk [vmem:[%s996_s21 + $0x3c] sm:$0xf] %vm548_vm1, %v547_v26 }
  0xf1 PF: > { %s13_s14 = sadd.s32 1, %s871_s14   ;;  %s1058_s12 = smov %s867_s13 }
  0xf2   : > { %p10_p5 = scmp.ge.s32.totalorder %s13_s14, 6   ;;  %s1059_s13 = smov %s1061_s15 }
  0xf4   :  { %12 = sbr.rel (!%p10_p5) target bundleno = 2 (0x2), region = 68 }

</bundles_post_ra>
